<compile_context>
chip_gen: v6e
topology: v6e:2x2x1
jax: 0.10.0
libtpu: 0.0.40
codegen_flags: <defaults>
</compile_context>

<pallas_src>
import functools

import jax
import jax.numpy as jnp
from jax import lax
from jax.experimental import pallas as pl
from jax.experimental.pallas import tpu as pltpu


def _attention_kernel(*refs, num_heads, head_dim, n_valid, n_pad, shared_x):
    if shared_x:
        x_ref, wq_ref, wk_ref, wv_ref, wp_ref, b_ref, o_ref, ctx_ref = refs
        x_q = x_ref[0]            # (tq, dim) bf16; tq == n_pad here
        x_kv = x_q
    else:
        (x_q_ref, x_kv_ref, wq_ref, wk_ref, wv_ref, wp_ref, b_ref,
         o_ref, ctx_ref) = refs
        x_q = x_q_ref[0]          # (tq, dim)    bf16 (query token tile)
        x_kv = x_kv_ref[0]        # (n_pad, dim) bf16 (full sequence for K/V)

    # Dense, all-heads-fused projections: (tq, dim) @ (dim, hidden).
    # Weights are pre-transposed on the host; scale is folded into Wq.
    q_all = jnp.dot(x_q, wq_ref[...],
                    preferred_element_type=jnp.float32).astype(jnp.bfloat16)
    k_all = jnp.dot(x_kv, wk_ref[...],
                    preferred_element_type=jnp.float32).astype(jnp.bfloat16)
    v_all = jnp.dot(x_kv, wv_ref[...],
                    preferred_element_type=jnp.float32).astype(jnp.bfloat16)

    tq = x_q.shape[0]
    if n_valid != n_pad:
        # Mask padded key positions to -inf so they get zero probability.
        key_valid = lax.broadcasted_iota(jnp.int32, (tq, n_pad), 1) < n_valid
    else:
        key_valid = None

    # Per-head attention (head_dim-wide matmuls are inherent to the op).
    for h in range(num_heads):
        lo = h * head_dim
        hi = lo + head_dim
        q_h = q_all[:, lo:hi]     # (tq, hd)    bf16
        k_h = k_all[:, lo:hi]     # (n_pad, hd) bf16
        v_h = v_all[:, lo:hi]     # (n_pad, hd) bf16

        # Scores q @ k^T (contract dim 1 of both) -> (tq, n_pad), f32.
        s = lax.dot_general(
            q_h, k_h, dimension_numbers=(((1,), (1,)), ((), ())),
            preferred_element_type=jnp.float32)
        if key_valid is not None:
            s = jnp.where(key_valid, s, -jnp.inf)

        # Softmax in f32; normalization deferred past the PV matmul.
        s = s - jnp.max(s, axis=-1, keepdims=True)
        p = jnp.exp(s)
        denom = jnp.sum(p, axis=-1, keepdims=True)
        ctx = jnp.dot(p.astype(jnp.bfloat16), v_h,
                      preferred_element_type=jnp.float32)        # (tq, hd)
        ctx_ref[:, lo:hi] = ctx * pl.reciprocal(denom, approx=True)

    # Single dense output projection over all heads: (tq, hidden) @ (hidden, dim).
    out = jnp.dot(ctx_ref[...].astype(jnp.bfloat16), wp_ref[...],
                  preferred_element_type=jnp.float32) + b_ref[...]
    o_ref[0] = out.astype(o_ref.dtype)


def attention_forward(x, w_qk, w_v, w_proj, b_proj, *, num_heads, block_q=256):
    """Pallas-backed forward pass of the `Attention` module (eval mode)."""
    B, N, dim = x.shape
    hidden = w_v.shape[0]
    assert hidden % num_heads == 0
    head_dim = hidden // num_heads
    scale = head_dim ** (-0.5)
    out_dtype = x.dtype

    # Pad sequence length to a lane multiple (dense score tiles); mask later.
    n_pad = ((N + 127) // 128) * 128
    if n_pad != N:
        x = jnp.pad(x, ((0, 0), (0, n_pad - N), (0, 0)))
    block_q = min(block_q, n_pad)
    if n_pad % block_q != 0:
        block_q = 128                 # n_pad is always a multiple of 128
    num_q = n_pad // block_q
    shared_x = num_q == 1             # default TransUNet path (N=196 -> 256)

    # Host-side weight prep: head-major dense (in, out) layouts, bf16 for the
    # MXU, softmax scale folded into Wq. Column layout matches the PyTorch
    # reshape(B, N, 2, H, hd): q = rows [0:hidden] of w_qk, k = rows
    # [hidden:2*hidden]; within each, head h occupies columns [h*hd:(h+1)*hd].
    wq = (w_qk[:hidden] * scale).T.astype(jnp.bfloat16)     # (dim, hidden)
    wk = w_qk[hidden:].T.astype(jnp.bfloat16)               # (dim, hidden)
    wv = w_v.T.astype(jnp.bfloat16)                         # (dim, hidden)
    wp = w_proj.T.astype(jnp.bfloat16)                      # (hidden, dim)
    b2d = b_proj.reshape(1, dim).astype(jnp.float32)
    x_bf = x.astype(jnp.bfloat16)

    kernel = functools.partial(
        _attention_kernel, num_heads=num_heads, head_dim=head_dim,
        n_valid=N, n_pad=n_pad, shared_x=shared_x)

    if shared_x:
        # One x block serves both the query tile and K/V (halves x DMA).
        x_specs = [pl.BlockSpec((1, n_pad, dim), lambda b, qi: (b, 0, 0))]
        x_args = [x_bf]
    else:
        x_specs = [pl.BlockSpec((1, block_q, dim), lambda b, qi: (b, qi, 0)),
                   pl.BlockSpec((1, n_pad, dim), lambda b, qi: (b, 0, 0))]
        x_args = [x_bf, x_bf]

    # Weights: full arrays, constant index_map -> DMA'd once, VMEM-resident.
    weight_specs = [
        pl.BlockSpec((dim, hidden), lambda b, qi: (0, 0)),   # Wq^T (scaled)
        pl.BlockSpec((dim, hidden), lambda b, qi: (0, 0)),   # Wk^T
        pl.BlockSpec((dim, hidden), lambda b, qi: (0, 0)),   # Wv^T
        pl.BlockSpec((hidden, dim), lambda b, qi: (0, 0)),   # Wproj^T
        pl.BlockSpec((1, dim), lambda b, qi: (0, 0)),        # b_proj
    ]

    out = pl.pallas_call(
        kernel,
        out_shape=jax.ShapeDtypeStruct((B, n_pad, dim), out_dtype),
        grid_spec=pltpu.PrefetchScalarGridSpec(
            num_scalar_prefetch=0,
            grid=(B, num_q),
            in_specs=x_specs + weight_specs,
            out_specs=pl.BlockSpec((1, block_q, dim), lambda b, qi: (b, qi, 0)),
            scratch_shapes=[pltpu.VMEM((block_q, hidden), jnp.float32)],
        ),
        compiler_params=pltpu.CompilerParams(
            dimension_semantics=("parallel", "parallel"),
            vmem_limit_bytes=32 * 1024 * 1024),
    )(*x_args, wq, wk, wv, wp, b2d)

    if n_pad != N:
        out = out[:, :N, :]
    return out


def attention_reference(x, w_qk, w_v, w_proj, b_proj, *, num_heads):
    """Pure-JAX f32 reference mirroring the PyTorch forward exactly."""
    B, N, dim = x.shape
    hidden = w_v.shape[0]
    head_dim = hidden // num_heads
    scale = head_dim ** (-0.5)

    qk = x @ w_qk.T                                                  # (B, N, 2*hidden)
    qk = qk.reshape(B, N, 2, num_heads, head_dim).transpose(2, 0, 3, 1, 4)
    q, k = qk[0], qk[1]                                              # (B, H, N, hd)
    v = (x @ w_v.T).reshape(B, N, num_heads, head_dim).transpose(0, 2, 1, 3)

    attn = jax.nn.softmax(
        jnp.einsum('bhnd,bhmd->bhnm', q, k * scale), axis=-1)
    out = jnp.einsum('bhnm,bhmd->bhnd', attn, v)
    out = out.transpose(0, 2, 1, 3).reshape(B, N, hidden)
    return out @ w_proj.T + b_proj


if __name__ == "__main__":
    key = jax.random.PRNGKey(0)

    def run_case(B, N, dim, num_heads, block_q, case_key):
        hidden_dim = dim
        kx, kqk, kv, kp, kb = jax.random.split(case_key, 5)
        x = jax.random.normal(kx, (B, N, dim), dtype=jnp.float32)
        # Deterministic synthetic params (PyTorch Linear convention W[out, in]).
        w_qk = 0.05 * jax.random.normal(kqk, (2 * hidden_dim, dim), dtype=jnp.float32)
        w_v = 0.05 * jax.random.normal(kv, (hidden_dim, dim), dtype=jnp.float32)
        w_proj = 0.05 * jax.random.normal(kp, (dim, hidden_dim), dtype=jnp.float32)
        b_proj = 0.05 * jax.random.normal(kb, (dim,), dtype=jnp.float32)

        out = attention_forward(x, w_qk, w_v, w_proj, b_proj,
                                num_heads=num_heads, block_q=block_q)
        out = jax.block_until_ready(out)
        ref = attention_reference(x, w_qk, w_v, w_proj, b_proj,
                                  num_heads=num_heads)
        assert out.shape == ref.shape
        # bf16 matmul operands + approx reciprocal vs. f32 reference -> loose tol.
        assert jnp.allclose(out, ref, atol=3e-2, rtol=3e-2), (
            f"max abs err {jnp.max(jnp.abs(out - ref))}")

    key1, key2 = jax.random.split(key)
    # Small shapes consistent with the module: B=2, N=8 tokens, dim=hidden=32,
    # num_heads=8 -> head_dim=4.  Exercises the shared-x (num_q == 1) path.
    run_case(2, 8, 32, 8, 256, key1)
    # Second small case exercising sequence padding (136 -> 256) plus query
    # tiling (block_q=128 -> num_q=2, non-shared x path).
    run_case(2, 136, 32, 8, 128, key2)

    print("KERNEL_OK")
</pallas_src>

<mosaic_0001>
module attributes {stable_mosaic.version = 11 : i64} {
  func.func @_attention_kernel(%arg0: i32, %arg1: i32, %arg2: memref<1x128x32xbf16, #tpu.memory_space<vmem>>, %arg3: memref<32x32xbf16, #tpu.memory_space<vmem>>, %arg4: memref<32x32xbf16, #tpu.memory_space<vmem>>, %arg5: memref<32x32xbf16, #tpu.memory_space<vmem>>, %arg6: memref<32x32xbf16, #tpu.memory_space<vmem>>, %arg7: memref<1x32xf32, #tpu.memory_space<vmem>>, %arg8: memref<1x128x32xf32, #tpu.memory_space<vmem>>, %arg9: memref<128x32xf32, #tpu.memory_space<vmem>>) attributes {dimension_semantics = [#tpu.dimension_semantics<parallel>, #tpu.dimension_semantics<parallel>], iteration_bounds = array<i64: 2, 1>, scalar_prefetch = 0 : i64, scratch_operands = 1 : i64, tpu.core_type = #tpu.core_type<tc>, window_params = [{transform_indices = @transform_0, window_bounds = array<i64: 1, 128, 32>}, {pipeline_mode = #tpu.pipeline_mode<synchronous>, transform_indices = @transform_1, window_bounds = array<i64: 32, 32>}, {pipeline_mode = #tpu.pipeline_mode<synchronous>, transform_indices = @transform_2, window_bounds = array<i64: 32, 32>}, {pipeline_mode = #tpu.pipeline_mode<synchronous>, transform_indices = @transform_3, window_bounds = array<i64: 32, 32>}, {pipeline_mode = #tpu.pipeline_mode<synchronous>, transform_indices = @transform_4, window_bounds = array<i64: 32, 32>}, {pipeline_mode = #tpu.pipeline_mode<synchronous>, transform_indices = @transform_5, window_bounds = array<i64: 1, 32>}, {transform_indices = @transform_6, window_bounds = array<i64: 1, 128, 32>}]} {
    %c0 = arith.constant 0 : index
    %c0_0 = arith.constant 0 : index
    %c0_1 = arith.constant 0 : index
    %0 = vector.load %arg2[%c0, %c0_0, %c0_1] : memref<1x128x32xbf16, #tpu.memory_space<vmem>>, vector<1x128x32xbf16>
    %1 = vector.shape_cast %0 : vector<1x128x32xbf16> to vector<128x32xbf16>
    %c0_2 = arith.constant 0 : index
    %c0_3 = arith.constant 0 : index
    %2 = vector.load %arg3[%c0_2, %c0_3] : memref<32x32xbf16, #tpu.memory_space<vmem>>, vector<32x32xbf16>
    %cst = arith.constant dense<0.000000e+00> : vector<128x32xf32>
    %3 = tpu.matmul %1, %2, %cst {dimension_numbers = #tpu.dot_dimension_numbers<[1], [0], [0], [1], [0, 0, 1, 1], [], []>} : vector<128x32xbf16>, vector<32x32xbf16>, vector<128x32xf32> -> vector<128x32xf32>
    %4 = arith.truncf %3 : vector<128x32xf32> to vector<128x32xbf16>
    %c0_4 = arith.constant 0 : index
    %c0_5 = arith.constant 0 : index
    %5 = vector.load %arg4[%c0_4, %c0_5] : memref<32x32xbf16, #tpu.memory_space<vmem>>, vector<32x32xbf16>
    %cst_6 = arith.constant dense<0.000000e+00> : vector<128x32xf32>
    %6 = tpu.matmul %1, %5, %cst_6 {dimension_numbers = #tpu.dot_dimension_numbers<[1], [0], [0], [1], [0, 0, 1, 1], [], []>} : vector<128x32xbf16>, vector<32x32xbf16>, vector<128x32xf32> -> vector<128x32xf32>
    %7 = arith.truncf %6 : vector<128x32xf32> to vector<128x32xbf16>
    %c0_7 = arith.constant 0 : index
    %c0_8 = arith.constant 0 : index
    %8 = vector.load %arg5[%c0_7, %c0_8] : memref<32x32xbf16, #tpu.memory_space<vmem>>, vector<32x32xbf16>
    %cst_9 = arith.constant dense<0.000000e+00> : vector<128x32xf32>
    %9 = tpu.matmul %1, %8, %cst_9 {dimension_numbers = #tpu.dot_dimension_numbers<[1], [0], [0], [1], [0, 0, 1, 1], [], []>} : vector<128x32xbf16>, vector<32x32xbf16>, vector<128x32xf32> -> vector<128x32xf32>
    %10 = arith.truncf %9 : vector<128x32xf32> to vector<128x32xbf16>
    %11 = tpu.iota {dimensions = array<i32: 1>} : vector<128x128xi32>
    %c8_i32 = arith.constant 8 : i32
    %12 = vector.broadcast %c8_i32 : i32 to vector<128x128xi32>
    %13 = arith.cmpi slt, %11, %12 : vector<128x128xi32>
    %14 = vector.extract_strided_slice %4 {offsets = [0, 0], sizes = [128, 4], strides = [1, 1]} : vector<128x32xbf16> to vector<128x4xbf16>
    %15 = vector.extract_strided_slice %7 {offsets = [0, 0], sizes = [128, 4], strides = [1, 1]} : vector<128x32xbf16> to vector<128x4xbf16>
    %16 = vector.extract_strided_slice %10 {offsets = [0, 0], sizes = [128, 4], strides = [1, 1]} : vector<128x32xbf16> to vector<128x4xbf16>
    %cst_10 = arith.constant dense<0.000000e+00> : vector<128x128xf32>
    %17 = tpu.matmul %14, %15, %cst_10 {dimension_numbers = #tpu.dot_dimension_numbers<[1], [1], [0], [0], [0, 0, 1, 0], [], []>} : vector<128x4xbf16>, vector<128x4xbf16>, vector<128x128xf32> -> vector<128x128xf32>
    %cst_11 = arith.constant 0xFF800000 : f32
    %18 = vector.broadcast %cst_11 : f32 to vector<128x128xf32>
    %19 = arith.select %13, %17, %18 : vector<128x128xi1>, vector<128x128xf32>
    %cst_12 = arith.constant dense<0xFF800000> : vector<128xf32>
    %20 = vector.multi_reduction <maximumf>, %19, %cst_12 [1] : vector<128x128xf32> to vector<128xf32>
    %21 = vector.shape_cast %20 : vector<128xf32> to vector<128x1xf32>
    %22 = vector.broadcast %21 : vector<128x1xf32> to vector<128x128xf32>
    %23 = arith.subf %19, %22 : vector<128x128xf32>
    %24 = math.exp %23 : vector<128x128xf32>
    %cst_13 = arith.constant dense<0.000000e+00> : vector<128xf32>
    %25 = vector.multi_reduction <add>, %24, %cst_13 [1] : vector<128x128xf32> to vector<128xf32>
    %26 = vector.shape_cast %25 : vector<128xf32> to vector<128x1xf32>
    %27 = arith.truncf %24 : vector<128x128xf32> to vector<128x128xbf16>
    %cst_14 = arith.constant dense<0.000000e+00> : vector<128x4xf32>
    %28 = tpu.matmul %27, %16, %cst_14 {dimension_numbers = #tpu.dot_dimension_numbers<[1], [0], [0], [1], [0, 0, 1, 1], [], []>} : vector<128x128xbf16>, vector<128x4xbf16>, vector<128x4xf32> -> vector<128x4xf32>
    %29 = tpu.reciprocal %26 {approx = true} : vector<128x1xf32> -> vector<128x1xf32>
    %30 = vector.broadcast %29 : vector<128x1xf32> to vector<128x4xf32>
    %31 = arith.mulf %28, %30 : vector<128x4xf32>
    %c0_15 = arith.constant 0 : index
    %c0_16 = arith.constant 0 : index
    %32 = vector.load %arg9[%c0_15, %c0_16] : memref<128x32xf32, #tpu.memory_space<vmem>>, vector<128x4xf32>
    tpu.vector_store %arg9[%c0_15, %c0_16], %31 {strides = array<i32>} : memref<128x32xf32, #tpu.memory_space<vmem>>, vector<128x4xf32>,
    %33 = vector.extract_strided_slice %4 {offsets = [0, 4], sizes = [128, 4], strides = [1, 1]} : vector<128x32xbf16> to vector<128x4xbf16>
    %34 = vector.extract_strided_slice %7 {offsets = [0, 4], sizes = [128, 4], strides = [1, 1]} : vector<128x32xbf16> to vector<128x4xbf16>
    %35 = vector.extract_strided_slice %10 {offsets = [0, 4], sizes = [128, 4], strides = [1, 1]} : vector<128x32xbf16> to vector<128x4xbf16>
    %cst_17 = arith.constant dense<0.000000e+00> : vector<128x128xf32>
    %36 = tpu.matmul %33, %34, %cst_17 {dimension_numbers = #tpu.dot_dimension_numbers<[1], [1], [0], [0], [0, 0, 1, 0], [], []>} : vector<128x4xbf16>, vector<128x4xbf16>, vector<128x128xf32> -> vector<128x128xf32>
    %cst_18 = arith.constant 0xFF800000 : f32
    %37 = vector.broadcast %cst_18 : f32 to vector<128x128xf32>
    %38 = arith.select %13, %36, %37 : vector<128x128xi1>, vector<128x128xf32>
    %cst_19 = arith.constant dense<0xFF800000> : vector<128xf32>
    %39 = vector.multi_reduction <maximumf>, %38, %cst_19 [1] : vector<128x128xf32> to vector<128xf32>
    %40 = vector.shape_cast %39 : vector<128xf32> to vector<128x1xf32>
    %41 = vector.broadcast %40 : vector<128x1xf32> to vector<128x128xf32>
    %42 = arith.subf %38, %41 : vector<128x128xf32>
    %43 = math.exp %42 : vector<128x128xf32>
    %cst_20 = arith.constant dense<0.000000e+00> : vector<128xf32>
    %44 = vector.multi_reduction <add>, %43, %cst_20 [1] : vector<128x128xf32> to vector<128xf32>
    %45 = vector.shape_cast %44 : vector<128xf32> to vector<128x1xf32>
    %46 = arith.truncf %43 : vector<128x128xf32> to vector<128x128xbf16>
    %cst_21 = arith.constant dense<0.000000e+00> : vector<128x4xf32>
    %47 = tpu.matmul %46, %35, %cst_21 {dimension_numbers = #tpu.dot_dimension_numbers<[1], [0], [0], [1], [0, 0, 1, 1], [], []>} : vector<128x128xbf16>, vector<128x4xbf16>, vector<128x4xf32> -> vector<128x4xf32>
    %48 = tpu.reciprocal %45 {approx = true} : vector<128x1xf32> -> vector<128x1xf32>
    %49 = vector.broadcast %48 : vector<128x1xf32> to vector<128x4xf32>
    %50 = arith.mulf %47, %49 : vector<128x4xf32>
    %c0_22 = arith.constant 0 : index
    %c4 = arith.constant 4 : index
    %51 = vector.load %arg9[%c0_22, %c4] : memref<128x32xf32, #tpu.memory_space<vmem>>, vector<128x4xf32>
    tpu.vector_store %arg9[%c0_22, %c4], %50 {strides = array<i32>} : memref<128x32xf32, #tpu.memory_space<vmem>>, vector<128x4xf32>,
    %52 = vector.extract_strided_slice %4 {offsets = [0, 8], sizes = [128, 4], strides = [1, 1]} : vector<128x32xbf16> to vector<128x4xbf16>
    %53 = vector.extract_strided_slice %7 {offsets = [0, 8], sizes = [128, 4], strides = [1, 1]} : vector<128x32xbf16> to vector<128x4xbf16>
    %54 = vector.extract_strided_slice %10 {offsets = [0, 8], sizes = [128, 4], strides = [1, 1]} : vector<128x32xbf16> to vector<128x4xbf16>
    %cst_23 = arith.constant dense<0.000000e+00> : vector<128x128xf32>
    %55 = tpu.matmul %52, %53, %cst_23 {dimension_numbers = #tpu.dot_dimension_numbers<[1], [1], [0], [0], [0, 0, 1, 0], [], []>} : vector<128x4xbf16>, vector<128x4xbf16>, vector<128x128xf32> -> vector<128x128xf32>
    %cst_24 = arith.constant 0xFF800000 : f32
    %56 = vector.broadcast %cst_24 : f32 to vector<128x128xf32>
    %57 = arith.select %13, %55, %56 : vector<128x128xi1>, vector<128x128xf32>
    %cst_25 = arith.constant dense<0xFF800000> : vector<128xf32>
    %58 = vector.multi_reduction <maximumf>, %57, %cst_25 [1] : vector<128x128xf32> to vector<128xf32>
    %59 = vector.shape_cast %58 : vector<128xf32> to vector<128x1xf32>
    %60 = vector.broadcast %59 : vector<128x1xf32> to vector<128x128xf32>
    %61 = arith.subf %57, %60 : vector<128x128xf32>
    %62 = math.exp %61 : vector<128x128xf32>
    %cst_26 = arith.constant dense<0.000000e+00> : vector<128xf32>
    %63 = vector.multi_reduction <add>, %62, %cst_26 [1] : vector<128x128xf32> to vector<128xf32>
    %64 = vector.shape_cast %63 : vector<128xf32> to vector<128x1xf32>
    %65 = arith.truncf %62 : vector<128x128xf32> to vector<128x128xbf16>
    %cst_27 = arith.constant dense<0.000000e+00> : vector<128x4xf32>
    %66 = tpu.matmul %65, %54, %cst_27 {dimension_numbers = #tpu.dot_dimension_numbers<[1], [0], [0], [1], [0, 0, 1, 1], [], []>} : vector<128x128xbf16>, vector<128x4xbf16>, vector<128x4xf32> -> vector<128x4xf32>
    %67 = tpu.reciprocal %64 {approx = true} : vector<128x1xf32> -> vector<128x1xf32>
    %68 = vector.broadcast %67 : vector<128x1xf32> to vector<128x4xf32>
    %69 = arith.mulf %66, %68 : vector<128x4xf32>
    %c0_28 = arith.constant 0 : index
    %c8 = arith.constant 8 : index
    %70 = vector.load %arg9[%c0_28, %c8] : memref<128x32xf32, #tpu.memory_space<vmem>>, vector<128x4xf32>
    tpu.vector_store %arg9[%c0_28, %c8], %69 {strides = array<i32>} : memref<128x32xf32, #tpu.memory_space<vmem>>, vector<128x4xf32>,
    %71 = vector.extract_strided_slice %4 {offsets = [0, 12], sizes = [128, 4], strides = [1, 1]} : vector<128x32xbf16> to vector<128x4xbf16>
    %72 = vector.extract_strided_slice %7 {offsets = [0, 12], sizes = [128, 4], strides = [1, 1]} : vector<128x32xbf16> to vector<128x4xbf16>
    %73 = vector.extract_strided_slice %10 {offsets = [0, 12], sizes = [128, 4], strides = [1, 1]} : vector<128x32xbf16> to vector<128x4xbf16>
    %cst_29 = arith.constant dense<0.000000e+00> : vector<128x128xf32>
    %74 = tpu.matmul %71, %72, %cst_29 {dimension_numbers = #tpu.dot_dimension_numbers<[1], [1], [0], [0], [0, 0, 1, 0], [], []>} : vector<128x4xbf16>, vector<128x4xbf16>, vector<128x128xf32> -> vector<128x128xf32>
    %cst_30 = arith.constant 0xFF800000 : f32
    %75 = vector.broadcast %cst_30 : f32 to vector<128x128xf32>
    %76 = arith.select %13, %74, %75 : vector<128x128xi1>, vector<128x128xf32>
    %cst_31 = arith.constant dense<0xFF800000> : vector<128xf32>
    %77 = vector.multi_reduction <maximumf>, %76, %cst_31 [1] : vector<128x128xf32> to vector<128xf32>
    %78 = vector.shape_cast %77 : vector<128xf32> to vector<128x1xf32>
    %79 = vector.broadcast %78 : vector<128x1xf32> to vector<128x128xf32>
    %80 = arith.subf %76, %79 : vector<128x128xf32>
    %81 = math.exp %80 : vector<128x128xf32>
    %cst_32 = arith.constant dense<0.000000e+00> : vector<128xf32>
    %82 = vector.multi_reduction <add>, %81, %cst_32 [1] : vector<128x128xf32> to vector<128xf32>
    %83 = vector.shape_cast %82 : vector<128xf32> to vector<128x1xf32>
    %84 = arith.truncf %81 : vector<128x128xf32> to vector<128x128xbf16>
    %cst_33 = arith.constant dense<0.000000e+00> : vector<128x4xf32>
    %85 = tpu.matmul %84, %73, %cst_33 {dimension_numbers = #tpu.dot_dimension_numbers<[1], [0], [0], [1], [0, 0, 1, 1], [], []>} : vector<128x128xbf16>, vector<128x4xbf16>, vector<128x4xf32> -> vector<128x4xf32>
    %86 = tpu.reciprocal %83 {approx = true} : vector<128x1xf32> -> vector<128x1xf32>
    %87 = vector.broadcast %86 : vector<128x1xf32> to vector<128x4xf32>
    %88 = arith.mulf %85, %87 : vector<128x4xf32>
    %c0_34 = arith.constant 0 : index
    %c12 = arith.constant 12 : index
    %89 = vector.load %arg9[%c0_34, %c12] : memref<128x32xf32, #tpu.memory_space<vmem>>, vector<128x4xf32>
    tpu.vector_store %arg9[%c0_34, %c12], %88 {strides = array<i32>} : memref<128x32xf32, #tpu.memory_space<vmem>>, vector<128x4xf32>,
    %90 = vector.extract_strided_slice %4 {offsets = [0, 16], sizes = [128, 4], strides = [1, 1]} : vector<128x32xbf16> to vector<128x4xbf16>
    %91 = vector.extract_strided_slice %7 {offsets = [0, 16], sizes = [128, 4], strides = [1, 1]} : vector<128x32xbf16> to vector<128x4xbf16>
    %92 = vector.extract_strided_slice %10 {offsets = [0, 16], sizes = [128, 4], strides = [1, 1]} : vector<128x32xbf16> to vector<128x4xbf16>
    %cst_35 = arith.constant dense<0.000000e+00> : vector<128x128xf32>
    %93 = tpu.matmul %90, %91, %cst_35 {dimension_numbers = #tpu.dot_dimension_numbers<[1], [1], [0], [0], [0, 0, 1, 0], [], []>} : vector<128x4xbf16>, vector<128x4xbf16>, vector<128x128xf32> -> vector<128x128xf32>
    %cst_36 = arith.constant 0xFF800000 : f32
    %94 = vector.broadcast %cst_36 : f32 to vector<128x128xf32>
    %95 = arith.select %13, %93, %94 : vector<128x128xi1>, vector<128x128xf32>
    %cst_37 = arith.constant dense<0xFF800000> : vector<128xf32>
    %96 = vector.multi_reduction <maximumf>, %95, %cst_37 [1] : vector<128x128xf32> to vector<128xf32>
    %97 = vector.shape_cast %96 : vector<128xf32> to vector<128x1xf32>
    %98 = vector.broadcast %97 : vector<128x1xf32> to vector<128x128xf32>
    %99 = arith.subf %95, %98 : vector<128x128xf32>
    %100 = math.exp %99 : vector<128x128xf32>
    %cst_38 = arith.constant dense<0.000000e+00> : vector<128xf32>
    %101 = vector.multi_reduction <add>, %100, %cst_38 [1] : vector<128x128xf32> to vector<128xf32>
    %102 = vector.shape_cast %101 : vector<128xf32> to vector<128x1xf32>
    %103 = arith.truncf %100 : vector<128x128xf32> to vector<128x128xbf16>
    %cst_39 = arith.constant dense<0.000000e+00> : vector<128x4xf32>
    %104 = tpu.matmul %103, %92, %cst_39 {dimension_numbers = #tpu.dot_dimension_numbers<[1], [0], [0], [1], [0, 0, 1, 1], [], []>} : vector<128x128xbf16>, vector<128x4xbf16>, vector<128x4xf32> -> vector<128x4xf32>
    %105 = tpu.reciprocal %102 {approx = true} : vector<128x1xf32> -> vector<128x1xf32>
    %106 = vector.broadcast %105 : vector<128x1xf32> to vector<128x4xf32>
    %107 = arith.mulf %104, %106 : vector<128x4xf32>
    %c0_40 = arith.constant 0 : index
    %c16 = arith.constant 16 : index
    %108 = vector.load %arg9[%c0_40, %c16] : memref<128x32xf32, #tpu.memory_space<vmem>>, vector<128x4xf32>
    tpu.vector_store %arg9[%c0_40, %c16], %107 {strides = array<i32>} : memref<128x32xf32, #tpu.memory_space<vmem>>, vector<128x4xf32>,
    %109 = vector.extract_strided_slice %4 {offsets = [0, 20], sizes = [128, 4], strides = [1, 1]} : vector<128x32xbf16> to vector<128x4xbf16>
    %110 = vector.extract_strided_slice %7 {offsets = [0, 20], sizes = [128, 4], strides = [1, 1]} : vector<128x32xbf16> to vector<128x4xbf16>
    %111 = vector.extract_strided_slice %10 {offsets = [0, 20], sizes = [128, 4], strides = [1, 1]} : vector<128x32xbf16> to vector<128x4xbf16>
    %cst_41 = arith.constant dense<0.000000e+00> : vector<128x128xf32>
    %112 = tpu.matmul %109, %110, %cst_41 {dimension_numbers = #tpu.dot_dimension_numbers<[1], [1], [0], [0], [0, 0, 1, 0], [], []>} : vector<128x4xbf16>, vector<128x4xbf16>, vector<128x128xf32> -> vector<128x128xf32>
    %cst_42 = arith.constant 0xFF800000 : f32
    %113 = vector.broadcast %cst_42 : f32 to vector<128x128xf32>
    %114 = arith.select %13, %112, %113 : vector<128x128xi1>, vector<128x128xf32>
    %cst_43 = arith.constant dense<0xFF800000> : vector<128xf32>
    %115 = vector.multi_reduction <maximumf>, %114, %cst_43 [1] : vector<128x128xf32> to vector<128xf32>
    %116 = vector.shape_cast %115 : vector<128xf32> to vector<128x1xf32>
    %117 = vector.broadcast %116 : vector<128x1xf32> to vector<128x128xf32>
    %118 = arith.subf %114, %117 : vector<128x128xf32>
    %119 = math.exp %118 : vector<128x128xf32>
    %cst_44 = arith.constant dense<0.000000e+00> : vector<128xf32>
    %120 = vector.multi_reduction <add>, %119, %cst_44 [1] : vector<128x128xf32> to vector<128xf32>
    %121 = vector.shape_cast %120 : vector<128xf32> to vector<128x1xf32>
    %122 = arith.truncf %119 : vector<128x128xf32> to vector<128x128xbf16>
    %cst_45 = arith.constant dense<0.000000e+00> : vector<128x4xf32>
    %123 = tpu.matmul %122, %111, %cst_45 {dimension_numbers = #tpu.dot_dimension_numbers<[1], [0], [0], [1], [0, 0, 1, 1], [], []>} : vector<128x128xbf16>, vector<128x4xbf16>, vector<128x4xf32> -> vector<128x4xf32>
    %124 = tpu.reciprocal %121 {approx = true} : vector<128x1xf32> -> vector<128x1xf32>
    %125 = vector.broadcast %124 : vector<128x1xf32> to vector<128x4xf32>
    %126 = arith.mulf %123, %125 : vector<128x4xf32>
    %c0_46 = arith.constant 0 : index
    %c20 = arith.constant 20 : index
    %127 = vector.load %arg9[%c0_46, %c20] : memref<128x32xf32, #tpu.memory_space<vmem>>, vector<128x4xf32>
    tpu.vector_store %arg9[%c0_46, %c20], %126 {strides = array<i32>} : memref<128x32xf32, #tpu.memory_space<vmem>>, vector<128x4xf32>,
    %128 = vector.extract_strided_slice %4 {offsets = [0, 24], sizes = [128, 4], strides = [1, 1]} : vector<128x32xbf16> to vector<128x4xbf16>
    %129 = vector.extract_strided_slice %7 {offsets = [0, 24], sizes = [128, 4], strides = [1, 1]} : vector<128x32xbf16> to vector<128x4xbf16>
    %130 = vector.extract_strided_slice %10 {offsets = [0, 24], sizes = [128, 4], strides = [1, 1]} : vector<128x32xbf16> to vector<128x4xbf16>
    %cst_47 = arith.constant dense<0.000000e+00> : vector<128x128xf32>
    %131 = tpu.matmul %128, %129, %cst_47 {dimension_numbers = #tpu.dot_dimension_numbers<[1], [1], [0], [0], [0, 0, 1, 0], [], []>} : vector<128x4xbf16>, vector<128x4xbf16>, vector<128x128xf32> -> vector<128x128xf32>
    %cst_48 = arith.constant 0xFF800000 : f32
    %132 = vector.broadcast %cst_48 : f32 to vector<128x128xf32>
    %133 = arith.select %13, %131, %132 : vector<128x128xi1>, vector<128x128xf32>
    %cst_49 = arith.constant dense<0xFF800000> : vector<128xf32>
    %134 = vector.multi_reduction <maximumf>, %133, %cst_49 [1] : vector<128x128xf32> to vector<128xf32>
    %135 = vector.shape_cast %134 : vector<128xf32> to vector<128x1xf32>
    %136 = vector.broadcast %135 : vector<128x1xf32> to vector<128x128xf32>
    %137 = arith.subf %133, %136 : vector<128x128xf32>
    %138 = math.exp %137 : vector<128x128xf32>
    %cst_50 = arith.constant dense<0.000000e+00> : vector<128xf32>
    %139 = vector.multi_reduction <add>, %138, %cst_50 [1] : vector<128x128xf32> to vector<128xf32>
    %140 = vector.shape_cast %139 : vector<128xf32> to vector<128x1xf32>
    %141 = arith.truncf %138 : vector<128x128xf32> to vector<128x128xbf16>
    %cst_51 = arith.constant dense<0.000000e+00> : vector<128x4xf32>
    %142 = tpu.matmul %141, %130, %cst_51 {dimension_numbers = #tpu.dot_dimension_numbers<[1], [0], [0], [1], [0, 0, 1, 1], [], []>} : vector<128x128xbf16>, vector<128x4xbf16>, vector<128x4xf32> -> vector<128x4xf32>
    %143 = tpu.reciprocal %140 {approx = true} : vector<128x1xf32> -> vector<128x1xf32>
    %144 = vector.broadcast %143 : vector<128x1xf32> to vector<128x4xf32>
    %145 = arith.mulf %142, %144 : vector<128x4xf32>
    %c0_52 = arith.constant 0 : index
    %c24 = arith.constant 24 : index
    %146 = vector.load %arg9[%c0_52, %c24] : memref<128x32xf32, #tpu.memory_space<vmem>>, vector<128x4xf32>
    tpu.vector_store %arg9[%c0_52, %c24], %145 {strides = array<i32>} : memref<128x32xf32, #tpu.memory_space<vmem>>, vector<128x4xf32>,
    %147 = vector.extract_strided_slice %4 {offsets = [0, 28], sizes = [128, 4], strides = [1, 1]} : vector<128x32xbf16> to vector<128x4xbf16>
    %148 = vector.extract_strided_slice %7 {offsets = [0, 28], sizes = [128, 4], strides = [1, 1]} : vector<128x32xbf16> to vector<128x4xbf16>
    %149 = vector.extract_strided_slice %10 {offsets = [0, 28], sizes = [128, 4], strides = [1, 1]} : vector<128x32xbf16> to vector<128x4xbf16>
    %cst_53 = arith.constant dense<0.000000e+00> : vector<128x128xf32>
    %150 = tpu.matmul %147, %148, %cst_53 {dimension_numbers = #tpu.dot_dimension_numbers<[1], [1], [0], [0], [0, 0, 1, 0], [], []>} : vector<128x4xbf16>, vector<128x4xbf16>, vector<128x128xf32> -> vector<128x128xf32>
    %cst_54 = arith.constant 0xFF800000 : f32
    %151 = vector.broadcast %cst_54 : f32 to vector<128x128xf32>
    %152 = arith.select %13, %150, %151 : vector<128x128xi1>, vector<128x128xf32>
    %cst_55 = arith.constant dense<0xFF800000> : vector<128xf32>
    %153 = vector.multi_reduction <maximumf>, %152, %cst_55 [1] : vector<128x128xf32> to vector<128xf32>
    %154 = vector.shape_cast %153 : vector<128xf32> to vector<128x1xf32>
    %155 = vector.broadcast %154 : vector<128x1xf32> to vector<128x128xf32>
    %156 = arith.subf %152, %155 : vector<128x128xf32>
    %157 = math.exp %156 : vector<128x128xf32>
    %cst_56 = arith.constant dense<0.000000e+00> : vector<128xf32>
    %158 = vector.multi_reduction <add>, %157, %cst_56 [1] : vector<128x128xf32> to vector<128xf32>
    %159 = vector.shape_cast %158 : vector<128xf32> to vector<128x1xf32>
    %160 = arith.truncf %157 : vector<128x128xf32> to vector<128x128xbf16>
    %cst_57 = arith.constant dense<0.000000e+00> : vector<128x4xf32>
    %161 = tpu.matmul %160, %149, %cst_57 {dimension_numbers = #tpu.dot_dimension_numbers<[1], [0], [0], [1], [0, 0, 1, 1], [], []>} : vector<128x128xbf16>, vector<128x4xbf16>, vector<128x4xf32> -> vector<128x4xf32>
    %162 = tpu.reciprocal %159 {approx = true} : vector<128x1xf32> -> vector<128x1xf32>
    %163 = vector.broadcast %162 : vector<128x1xf32> to vector<128x4xf32>
    %164 = arith.mulf %161, %163 : vector<128x4xf32>
    %c0_58 = arith.constant 0 : index
    %c28 = arith.constant 28 : index
    %165 = vector.load %arg9[%c0_58, %c28] : memref<128x32xf32, #tpu.memory_space<vmem>>, vector<128x4xf32>
    tpu.vector_store %arg9[%c0_58, %c28], %164 {strides = array<i32>} : memref<128x32xf32, #tpu.memory_space<vmem>>, vector<128x4xf32>,
    %c0_59 = arith.constant 0 : index
    %c0_60 = arith.constant 0 : index
    %166 = vector.load %arg9[%c0_59, %c0_60] : memref<128x32xf32, #tpu.memory_space<vmem>>, vector<128x32xf32>
    %167 = arith.truncf %166 : vector<128x32xf32> to vector<128x32xbf16>
    %c0_61 = arith.constant 0 : index
    %c0_62 = arith.constant 0 : index
    %168 = vector.load %arg6[%c0_61, %c0_62] : memref<32x32xbf16, #tpu.memory_space<vmem>>, vector<32x32xbf16>
    %cst_63 = arith.constant dense<0.000000e+00> : vector<128x32xf32>
    %169 = tpu.matmul %167, %168, %cst_63 {dimension_numbers = #tpu.dot_dimension_numbers<[1], [0], [0], [1], [0, 0, 1, 1], [], []>} : vector<128x32xbf16>, vector<32x32xbf16>, vector<128x32xf32> -> vector<128x32xf32>
    %c0_64 = arith.constant 0 : index
    %c0_65 = arith.constant 0 : index
    %170 = vector.load %arg7[%c0_64, %c0_65] : memref<1x32xf32, #tpu.memory_space<vmem>>, vector<1x32xf32>
    %171 = vector.broadcast %170 : vector<1x32xf32> to vector<128x32xf32>
    %172 = arith.addf %169, %171 : vector<128x32xf32>
    %c0_66 = arith.constant 0 : index
    %c0_67 = arith.constant 0 : index
    %c0_68 = arith.constant 0 : index
    %173 = vector.load %arg8[%c0_66, %c0_67, %c0_68] : memref<1x128x32xf32, #tpu.memory_space<vmem>>, vector<1x128x32xf32>
    %174 = vector.shape_cast %173 : vector<1x128x32xf32> to vector<128x32xf32>
    %175 = vector.shape_cast %172 : vector<128x32xf32> to vector<1x128x32xf32>
    tpu.vector_store %arg8[%c0_66, %c0_67, %c0_68], %175 {strides = array<i32>} : memref<1x128x32xf32, #tpu.memory_space<vmem>>, vector<1x128x32xf32>,
    return
  }
  func.func @transform_0(%arg0: i32, %arg1: i32) -> (i32, i32, i32) {
    %c0_i32 = arith.constant 0 : i32
    %c0_i32_0 = arith.constant 0 : i32
    %c0_i32_1 = arith.constant 0 : i32
    return %arg0, %c0_i32, %c0_i32_0 : i32, i32, i32
  }
  func.func @transform_1(%arg0: i32, %arg1: i32) -> (i32, i32) {
    %c0_i32 = arith.constant 0 : i32
    %c0_i32_0 = arith.constant 0 : i32
    %c0_i32_1 = arith.constant 0 : i32
    return %c0_i32, %c0_i32_0 : i32, i32
  }
  func.func @transform_2(%arg0: i32, %arg1: i32) -> (i32, i32) {
    %c0_i32 = arith.constant 0 : i32
    %c0_i32_0 = arith.constant 0 : i32
    %c0_i32_1 = arith.constant 0 : i32
    return %c0_i32, %c0_i32_0 : i32, i32
  }
  func.func @transform_3(%arg0: i32, %arg1: i32) -> (i32, i32) {
    %c0_i32 = arith.constant 0 : i32
    %c0_i32_0 = arith.constant 0 : i32
    %c0_i32_1 = arith.constant 0 : i32
    return %c0_i32, %c0_i32_0 : i32, i32
  }
  func.func @transform_4(%arg0: i32, %arg1: i32) -> (i32, i32) {
    %c0_i32 = arith.constant 0 : i32
    %c0_i32_0 = arith.constant 0 : i32
    %c0_i32_1 = arith.constant 0 : i32
    return %c0_i32, %c0_i32_0 : i32, i32
  }
  func.func @transform_5(%arg0: i32, %arg1: i32) -> (i32, i32) {
    %c0_i32 = arith.constant 0 : i32
    %c0_i32_0 = arith.constant 0 : i32
    %c0_i32_1 = arith.constant 0 : i32
    return %c0_i32, %c0_i32_0 : i32, i32
  }
  func.func @transform_6(%arg0: i32, %arg1: i32) -> (i32, i32, i32) {
    %c0_i32 = arith.constant 0 : i32
    %c0_i32_0 = arith.constant 0 : i32
    return %arg0, %arg1, %c0_i32 : i32, i32, i32
  }
}

</mosaic_0001>

<bundles_post_ra>
// kernel: tpu_custom_call.1
= control target key start
LH: loop header
LB: loop body
LE: loop exit
PB: predicated region body
PF: predicated region fallthrough
CT: control target
= control target key end

     0   :  { %s6985_s21 = smov 0   ;;  %s6987_s22 = smov 0   ;;  %s10002_s0 = inlined_call_operand.vmem [shape: bf16[2,128,32], index: 0, kind: input, shape index: {}]   ;;  %s10003_s1 = inlined_call_operand.vmem [shape: bf16[32,32], index: 1, kind: input, shape index: {}]   ;;  %s10004_s2 = inlined_call_operand.vmem [shape: bf16[32,32], index: 2, kind: input, shape index: {}]   ;;  %s10005_s3 = inlined_call_operand.vmem [shape: bf16[32,32], index: 3, kind: input, shape index: {}]   ;;  %s10006_s4 = inlined_call_operand.vmem [shape: bf16[32,32], index: 4, kind: input, shape index: {}]   ;;  %s10007_s5 = inlined_call_operand.vmem [shape: f32[1,32], index: 5, kind: input, shape index: {}]   ;;  %s10008_s6 = inlined_call_operand.vmem [shape: f32[2,128,32], index: 6, kind: output, shape index: {}]  }
   0x1   :  { %s6989_s23 = smov 0  }
   0x2 LB: > { %s28_s24 = sadd.s32 1, %s6930_s22  ;;  %p5272_p0 = scmp.ge.s32.totalorder %s6934_s23, 1  ;;  %s6934_s23 = sphi %s6989_s23, %s16_s23   ;;  %s6930_s22 = sphi %s6987_s22, %s10490_s22   ;;  %s6926_s21 = sphi %s6985_s21, %s10489_s21  }
   0x3   : > { %p30_p1 = scmp.ge.s32.totalorder %s28_s24, 2  ;;  %p226_p2 = scmp.lt.s32.totalorder %s6934_s23, 3 }
   0x5   : > { %s10492_s24 = smov (%p30_p1, %s28_s24), 0  ;;  %p227_p3 = pnand %p5272_p0, %p226_p2 }
   0x7   : > { %230 = sbr.rel (%p227_p3) target bundleno = 4364 (0x110c), region = 44 }
   0xc   : > { %v6384_v0 = vld [vmem:[%s10004_s2 + $0x8] sm:$0xff]   ;;  %p260_p4 = scmp.lt.s32.totalorder %s6926_s21, 1  ;;  %v6385_v1 = vld [vmem:[%s10004_s2] sm:$0xff]   ;;  %vm348_vm0 = vcmask 261120   ;;  %vm723_vm1 = vcmask 31744   ;;  %s6936_s17 = smov 124  }
   0xd   : > { %5710 = vmatprep.subr.bf16.mxu1 %v6384_v0  ;;  %v6394_v2 = vld [vmem:[%s10003_s1 + $0x8] sm:$0xff]   ;;  %v6395_v3 = vld [vmem:[%s10003_s1] sm:$0xff]   ;;  %s6937_s18 = smov 120   ;;  %s6938_s19 = smov 116   ;;  %vm1704_vm3 = vcmask 64544   ;;  %vm2251_vm4 = vcmask 97344  }
   0xe   : > { %s10494_s21 = smov (!%p260_p4, %s6926_s21), 1  ;;  %5711 = vmatpush3.bf16.msra.mxu1 %v6384_v0  ;;  %5690 = vmatprep.subr.bf16.mxu0 %v6394_v2  ;;  %v6396_v4 = vld [vmem:[%s10005_s3 + $0x8] sm:$0xff]   ;;  %v6397_v8 = vld [vmem:[%s10005_s3] sm:$0xff]   ;;  %s6939_s20 = smov 112   ;;  %vm2798_vm5 = vcmask 130144   ;;  %vm3345_vm6 = vcmask 162944  }
   0xf   : > { %5712 = vmatprep.subr.bf16.mxu1 %v6385_v1  ;;  %s5392_s9 = sshll.u32 %s10494_s21, 6  ;;  %5691 = vmatpush3.bf16.msra.mxu0 %v6394_v2  ;;  %s6940_s25 = smov 108   ;;  %vm3892_vm7 = vcmask 195744   ;;  %vm4439_vm8 = vcmask 228544   ;;  %vm4986_vm9 = vcmask 261344  }
  0x10   : > { %s7021_s12 = scalar_lea.vmem %s10002_s0, %s5392_s9  ;;  %5692 = vmatprep.subr.bf16.mxu0 %v6395_v3  ;;  %s6941_s26 = smov 104  }
  0x11   : > { %v6386_v5 = vld [vmem:[%s7021_s12] sm:$0xff]   ;;  %v6387_v6 = vld [vmem:[%s7021_s12 + $0x8] sm:$0xff]   ;;  %v6388_v7 = vld [vmem:[%s7021_s12 + $0x10] sm:$0xff]   ;;  %s6942_s27 = smov 100   ;;  %s6943_s28 = smov 4  }
  0x12   : > { %5713 = vmatpush3.bf16.msra.mxu1 %v6385_v1  ;;  %5714 = vmatprep.mubr.msk.bf16.mxu1 %vm348_vm0, %v6386_v5  ;;  %v6389_v9 = vld [vmem:[%s7021_s12 + $0x18] sm:$0xff]   ;;  %v6390_v10 = vld [vmem:[%s7021_s12 + $0x20] sm:$0xff]   ;;  %v6391_v11 = vld [vmem:[%s7021_s12 + $0x28] sm:$0xff]   ;;  %s6944_s29 = smov 8   ;;  %s6945_s30 = smov 12  }
  0x13   : > { %5694 = vmatprep.mubr.msk.bf16.mxu0 %vm348_vm0, %v6386_v5  ;;  %5693 = vmatpush3.bf16.msra.mxu0 %v6395_v3  ;;  %v6392_v12 = vld [vmem:[%s7021_s12 + $0x30] sm:$0xff]   ;;  %v6393_v13 = vld [vmem:[%s7021_s12 + $0x38] sm:$0xff]   ;;  %s6946_s7 = smov 16   ;;  %s6947_s8 = smov 20  }
  0x14   : > { %5730 = vmatprep.subr.bf16.mxu0 %v6396_v4  ;;  %s6948_s9 = smov 24   ;;  %s6949_s14 = smov 28  }
  0x15   : > { %5715 = vmatmul.mubr.msk.bf16.vlgmr.msra.gmra.mxu1 %vm348_vm0, %v6387_v6  ;;  %s5393_s15 = sshll.u32 %s10494_s21, 7 }
  0x16   : > { %5718 = vmatprep.mubr.msk.bf16.mxu1 %vm348_vm0, %v6388_v7  ;;  %5695 = vmatmul.mubr.msk.bf16.vlgmr.msra.gmra.mxu0 %vm348_vm0, %v6387_v6 }
  0x17   : > { %5698 = vmatprep.mubr.msk.bf16.mxu0 %vm348_vm0, %v6388_v7  ;;  %5731 = vmatpush3.bf16.msra.mxu0 %v6396_v4 }
  0x18   : > { %5732 = vmatprep.subr.bf16.mxu0 %v6397_v8 }
  0x1b   : > { %5733 = vmatpush3.bf16.msra.mxu0 %v6397_v8 }
  0x1d   : > { %5719 = vmatmul.mubr.msk.bf16.gmra.mxu1 %vm348_vm0, %v6389_v9 }
  0x1e   : > { %5722 = vmatprep.mubr.msk.bf16.mxu1 %vm348_vm0, %v6390_v10  ;;  %5699 = vmatmul.mubr.msk.bf16.gmra.mxu0 %vm348_vm0, %v6389_v9 }
  0x1f   : > { %5702 = vmatprep.mubr.msk.bf16.mxu0 %vm348_vm0, %v6390_v10 }
  0x25   : > { %5723 = vmatmul.mubr.msk.bf16.gmra.mxu1 %vm348_vm0, %v6391_v11 }
  0x26   : > { %5726 = vmatprep.mubr.msk.bf16.mxu1 %vm348_vm0, %v6392_v12  ;;  %5703 = vmatmul.mubr.msk.bf16.gmra.mxu0 %vm348_vm0, %v6391_v11 }
  0x27   : > { %5706 = vmatprep.mubr.msk.bf16.mxu0 %vm348_vm0, %v6392_v12 }
  0x2d   : > { %5727 = vmatmul.mubr.msk.bf16.gmra.mxu1 %vm348_vm0, %v6393_v13 }
  0x2e   : > { %5707 = vmatmul.mubr.msk.bf16.gmra.mxu0 %vm348_vm0, %v6393_v13 }
  0x2f   : > { %5734 = vmatprep.mubr.msk.bf16.mxu0 %vm348_vm0, %v6386_v5 }
  0x36   : > { %5735 = vmatmul.mubr.msk.bf16.vlgmr.msra.gmra.mxu0 %vm348_vm0, %v6387_v6 }
  0x37   : > { %5738 = vmatprep.mubr.msk.bf16.mxu0 %vm348_vm0, %v6388_v7 }
  0x3e   : > { %5739 = vmatmul.mubr.msk.bf16.gmra.mxu0 %vm348_vm0, %v6389_v9 }
  0x3f   : > { %5742 = vmatprep.mubr.msk.bf16.mxu0 %vm348_vm0, %v6390_v10 }
  0x46   : > { %5743 = vmatmul.mubr.msk.bf16.gmra.mxu0 %vm348_vm0, %v6391_v11 }
  0x47   : > { %5746 = vmatprep.mubr.msk.bf16.mxu0 %vm348_vm0, %v6392_v12 }
  0x4e   : > { %5747 = vmatmul.mubr.msk.bf16.gmra.mxu0 %vm348_vm0, %v6393_v13 }
  0xd5   : > { %v5716_v14 = vpop.f32.mrf.mxu1 }
  0xd6   : > { %v5696_v16 = vpop.f32.mrf.mxu0 }
  0xd7   : > { %v7061_v15 = vpop.f32.mrf.mxu1 }
  0xd8   : > { %v407_v18 = vpop.f32.mrf.mxu0 }
  0xd9   : > { %v5717_v17 = vpop.f32.mrf.mxu1 }
  0xda   : > { %v7063_v19 = vpack.c.bf16 %v5717_v17, %v5716_v14  ;;  %v5697_v21 = vpop.f32.mrf.mxu0 }
  0xdb   : > { %v7065_v20 = vpop.f32.mrf.mxu1  ;;  %v7067_v22 = vpack.c.bf16 %v5697_v21, %v5696_v16 }
  0xdc   : > { %v410_v24 = vpop.f32.mrf.mxu0 }
  0xdd   : > { %v5720_v23 = vpop.f32.mrf.mxu1  ;;  %v7069_v25 = vpack.c.bf16 %v410_v24, %v407_v18 }
  0xde   : > { %v5700_v27 = vpop.f32.mrf.mxu0 }
  0xdf   : > { %v7071_v26 = vpop.f32.mrf.mxu1  ;;  %5766 = vmatprep.mubr.msk.bf16.mxu1 %vm723_vm1, %v7069_v25 }
  0xe0   : > { %v7075_v29 = vpop.f32.mrf.mxu0 }
  0xe1   : > { %v5721_v28 = vpop.f32.mrf.mxu1 }
  0xe2   : > { %v5701_v31 = vpop.f32.mrf.mxu0  ;;  %v7121_v6 = vpack.c.bf16 %v5721_v28, %v5720_v23 }
  0xe3   : > { %v547_v30 = vpop.f32.mrf.mxu1  ;;  %v7077_v32 = vpack.c.bf16 %v5701_v31, %v5700_v27  ;;  %v752_v27 = vsel %vm723_vm1, %v7063_v19, 0 }
  0xe4   : > { %v7079_v34 = vpop.f32.mrf.mxu0  ;;  %v7128_v12 = vpack.c.bf16 %v547_v30, %v7071_v26  ;;  %v758_v13 = vsel %vm723_vm1, %v7121_v6, 0  ;;  %v7158_v26 = vpack.c.bf16 %v7065_v20, %v7061_v15 }
  0xe5   : > { %v5724_v33 = vpop.f32.mrf.mxu1  ;;  %v7181_v31 = vpack.c.bf16 %v7079_v34, %v7075_v29 }
  0xe6   : > { %v5704_v36 = vpop.f32.mrf.mxu0  ;;  %v755_v21 = vsel %vm723_vm1, %v7128_v12, 0  ;;  %v749_v15 = vsel %vm723_vm1, %v7158_v26, 0 }
  0xe7   : > { %v560_v35 = vpop.f32.mrf.mxu1 }
  0xe8   : > { %v7081_v38 = vpop.f32.mrf.mxu0 }
  0xe9   : > { %v5725_v37 = vpop.f32.mrf.mxu1 }
  0xea   : > { %v7083_v39 = vpack.c.bf16 %v5725_v37, %v5724_v33  ;;  %v5705_v41 = vpop.f32.mrf.mxu0 }
  0xeb   : > { %v563_v40 = vpop.f32.mrf.mxu1  ;;  %v7087_v42 = vpack.c.bf16 %v5705_v41, %v5704_v36  ;;  %v720_v36 = vlaneseq }
  0xec   : > { %1192 = vrot.lane.b32.xlu0 %v7083_v39, %s6936_s17  ;;  %v7089_v44 = vpop.f32.mrf.mxu0  ;;  %v7115_v0 = vpack.c.bf16 %v563_v40, %v560_v35  ;;  %v764_v1 = vsel %vm723_vm1, %v7083_v39, 0 }
  0xed   : > { %v5728_v43 = vpop.f32.mrf.mxu1  ;;  %v7190_v33 = vpack.c.bf16 %v7089_v44, %v7081_v38  ;;  %v7212_v37 = vand.u32 127, %v720_v36 }
  0xee   : > { %v5708_v46 = vpop.f32.mrf.mxu0  ;;  %v761_v7 = vsel %vm723_vm1, %v7115_v0, 0 }
  0xef   : > { %v576_v45 = vpop.f32.mrf.mxu1  ;;  %vm722_vm2 = vcmp.lt.s32.totalorder %v7212_v37, 8 }
  0xf0   : > { %v7091_v48 = vpop.f32.mrf.mxu0 }
  0xf1   : > { %v5729_v47 = vpop.f32.mrf.mxu1 }
  0xf2   : > { %v7093_v49 = vpack.c.bf16 %v5729_v47, %v5728_v43  ;;  %v5709_v51 = vpop.f32.mrf.mxu0 }
  0xf3   : > { %v579_v50 = vpop.f32.mrf.mxu1  ;;  %v7103_v54 = vpack.c.bf16 %v5709_v51, %v5708_v46 }
  0xf4   : > { %v7095_v52 = vpack.c.bf16 %v579_v50, %v576_v45  ;;  %1196 = vrot.lane.b32.xlu0 %v7093_v49, %s6936_s17  ;;  %6282 = vmatprep.subr.msk.bf16.mxu1 %vm723_vm1, %v7093_v49  ;;  %v770_v53 = vsel %vm723_vm1, %v7093_v49, 0  ;;  %v7105_v55 = vpop.f32.mrf.mxu0 }
  0xf5   : > { %5751 = vmatpush3.bf16.xpose.msra.mxu1 %v770_v53  ;;  %v7198_v29 = vpack.c.bf16 %v7105_v55, %v7091_v48 }
  0xf6   : > { %1194 = vrot.lane.b32.xlu1 %v7095_v52, %s6936_s17  ;;  %6283 = vmatprep.subr.msk.bf16.mxu1 %vm723_vm1, %v7095_v52  ;;  %v5736_v56 = vpop.f32.mrf.mxu0  ;;  %v767_v59 = vsel %vm723_vm1, %v7095_v52, 0 }
  0xf8   : > { %v649_v57 = vpop.f32.mrf.mxu0 }
  0xfa   : > { %v5737_v58 = vpop.f32.mrf.mxu0 }
  0xfb   : > { %v7168_v30 = vpack.c.bf16 %v5737_v58, %v5736_v56 }
  0xfc   : > { %v652_v60 = vpop.f32.mrf.mxu0 }
  0xfd   : > { %5753 = vmatpush3.bf16.xpose.msra.mxu1 %v767_v59  ;;  %v7174_v20 = vpack.c.bf16 %v652_v60, %v649_v57 }
  0xfe   : > { %6284 = vmatprep.subr.msk.bf16.mxu1 %vm723_vm1, %v7083_v39  ;;  %v5740_v61 = vpop.f32.mrf.mxu0 }
 0x100   : > { %v665_v62 = vpop.f32.mrf.mxu0 }
 0x102   : > { %v5741_v63 = vpop.f32.mrf.mxu0 }
 0x103   : > { %v7152_v24 = vpack.c.bf16 %v5741_v63, %v5740_v61 }
 0x104   : > { %v668_v2 = vpop.f32.mrf.mxu0 }
 0x105   : > { %5755 = vmatpush3.bf16.xpose.msra.mxu1 %v764_v1  ;;  %v7162_v28 = vpack.c.bf16 %v668_v2, %v665_v62 }
 0x106   : > { %6285 = vmatprep.subr.msk.bf16.mxu1 %vm723_vm1, %v7115_v0  ;;  %v5744_v3 = vpop.f32.mrf.mxu0 }
 0x108   : > { %v681_v4 = vpop.f32.mrf.mxu0 }
 0x10a   : > { %v5745_v5 = vpop.f32.mrf.mxu0 }
 0x10b   : > { %v7140_v18 = vpack.c.bf16 %v5745_v5, %v5744_v3 }
 0x10c   : > { %v684_v8 = vpop.f32.mrf.mxu0 }
 0x10d   : > { %5757 = vmatpush3.bf16.xpose.msra.mxu1 %v761_v7  ;;  %v7146_v23 = vpack.c.bf16 %v684_v8, %v681_v4 }
 0x10e   : > { %6286 = vmatprep.subr.msk.bf16.mxu1 %vm723_vm1, %v7121_v6  ;;  %v5748_v9 = vpop.f32.mrf.mxu0 }
 0x110   : > { %v697_v10 = vpop.f32.mrf.mxu0 }
 0x112   : > { %v5749_v11 = vpop.f32.mrf.mxu0 }
 0x113   : > { %v7132_v14 = vpack.c.bf16 %v5749_v11, %v5748_v9 }
 0x114   : > { %v700_v16 = vpop.f32.mrf.mxu0 }
 0x115   : > { %5759 = vmatpush3.bf16.xpose.msra.mxu1 %v758_v13  ;;  %5782 = vmatprep.subr.bf16.mxu0 %v7132_v14  ;;  %v7137_v17 = vpack.c.bf16 %v700_v16, %v697_v10 }
 0x116   : > { %6287 = vmatprep.subr.msk.bf16.mxu1 %vm723_vm1, %v7128_v12  ;;  %5783 = vmatpush3.bf16.msra.mxu0 %v7132_v14 }
 0x117   : > { %5784 = vmatprep.subr.bf16.mxu0 %v7137_v17 }
 0x11a   : > { %5785 = vmatpush3.bf16.msra.mxu0 %v7137_v17 }
 0x11b   : > { %5786 = vmatprep.subr.bf16.mxu0 %v7140_v18 }
 0x11d   : > { %5761 = vmatpush3.bf16.xpose.msra.mxu1 %v755_v21 }
 0x11e   : > { %6288 = vmatprep.subr.msk.bf16.mxu1 %vm723_vm1, %v7063_v19  ;;  %5787 = vmatpush3.bf16.msra.mxu0 %v7140_v18 }
 0x11f   : > { %5788 = vmatprep.subr.bf16.mxu0 %v7146_v23 }
 0x122   : > { %5789 = vmatpush3.bf16.msra.mxu0 %v7146_v23 }
 0x123   : > { %5790 = vmatprep.subr.bf16.mxu0 %v7152_v24 }
 0x125   : > { %5763 = vmatpush3.bf16.xpose.msra.mxu1 %v752_v27 }
 0x126   : > { %6289 = vmatprep.subr.msk.bf16.mxu1 %vm723_vm1, %v7158_v26  ;;  %5791 = vmatpush3.bf16.msra.mxu0 %v7152_v24 }
 0x127   : > { %5792 = vmatprep.subr.bf16.mxu0 %v7162_v28 }
 0x12a   : > { %5793 = vmatpush3.bf16.msra.mxu0 %v7162_v28 }
 0x12b   : > { %5794 = vmatprep.subr.bf16.mxu0 %v7168_v30 }
 0x12d   : > { %5765 = vmatpush3.bf16.xpose.msra.mxu1 %v749_v15 }
 0x12e   : > { %5795 = vmatpush3.bf16.msra.mxu0 %v7168_v30 }
 0x12f   : > { %5796 = vmatprep.subr.bf16.mxu0 %v7174_v20 }
 0x132   : > { %5797 = vmatpush3.bf16.msra.mxu0 %v7174_v20 }
 0x134   : > { %5767 = vmatmul.mubr.msk.bf16.vlgmr.msra.gmra.mxu1 %vm723_vm1, %v7067_v22 }
 0x135   : > { %5770 = vmatprep.mubr.msk.bf16.mxu1 %vm723_vm1, %v7181_v31 }
 0x13c   : > { %5771 = vmatmul.mubr.msk.bf16.gmra.mxu1 %vm723_vm1, %v7077_v32 }
 0x13d   : > { %5774 = vmatprep.mubr.msk.bf16.mxu1 %vm723_vm1, %v7190_v33 }
 0x144   : > { %5775 = vmatmul.mubr.msk.bf16.gmra.mxu1 %vm723_vm1, %v7087_v42 }
 0x145   : > { %5778 = vmatprep.mubr.msk.bf16.mxu1 %vm723_vm1, %v7198_v29 }
 0x14c   : > { %5779 = vmatmul.mubr.msk.bf16.gmra.mxu1 %vm723_vm1, %v7103_v54 }
 0x15e   : > { %v7206_v34 = vpop.permute.xlu0 %1192 }
 0x166   : > { %v7208_v35 = vpop.permute.xlu0 %1196 }
 0x167   : > { %6290 = vmatprep.subr.msk.bf16.mxu0 %vm723_vm1, %v7208_v35 }
 0x168   : > { %v1195_v16 = vpop.permute.xlu1 %1194 }
 0x1f4   : > { %v5768_v38 = vpop.f32.mrf.mxu1 }
 0x1f5   : > { %v7217_v40 = vsel %vm722_vm2, %v5768_v38, -inf }
 0x1f6   : > { %889 = vmax.xlane.f32.xlu1 %v7217_v40  ;;  %v806_v41 = vpop.f32.mrf.mxu1 }
 0x1f7   : > { %v7222_v43 = vsel %vm722_vm2, %v806_v41, -inf }
 0x1f8   : > { %885 = vmax.xlane.f32.xlu0 %v7222_v43  ;;  %v5769_v44 = vpop.f32.mrf.mxu1 }
 0x1f9   : > { %v7227_v45 = vsel %vm722_vm2, %v5769_v44, -inf }
 0x1fa   : > { %891 = vmax.xlane.f32.xlu1 %v7227_v45  ;;  %v809_v46 = vpop.f32.mrf.mxu1 }
 0x1fb   : > { %v7232_v47 = vsel %vm722_vm2, %v809_v46, -inf }
 0x1fc   : > { %887 = vmax.xlane.f32.xlu0 %v7232_v47  ;;  %v5772_v48 = vpop.f32.mrf.mxu1 }
 0x1fd   : > { %v7237_v50 = vsel %vm722_vm2, %v5772_v48, -inf }
 0x1fe   : > { %897 = vmax.xlane.f32.xlu1 %v7237_v50  ;;  %v822_v51 = vpop.f32.mrf.mxu1 }
 0x1ff   : > { %v7242_v53 = vsel %vm722_vm2, %v822_v51, -inf }
 0x200   : > { %v5773_v55 = vpop.f32.mrf.mxu1 }
 0x201   : > { %v7247_v57 = vsel %vm722_vm2, %v5773_v55, -inf }
 0x202   : > { %893 = vmax.xlane.f32.xlu1 %v7242_v53  ;;  %v825_v56 = vpop.f32.mrf.mxu1 }
 0x203   : > { %v7252_v60 = vsel %vm722_vm2, %v825_v56, -inf }
 0x204   : > { %v5776_v58 = vpop.f32.mrf.mxu1 }
 0x205   : > { %v7286_v10 = vsel %vm722_vm2, %v5776_v58, -inf }
 0x206   : > { %899 = vmax.xlane.f32.xlu1 %v7247_v57  ;;  %v838_v59 = vpop.f32.mrf.mxu1 }
 0x207   : > { %v7293_v11 = vsel %vm722_vm2, %v838_v59, -inf }
 0x208   : > { %v5777_v61 = vpop.f32.mrf.mxu1 }
 0x209   : > { %v7300_v13 = vsel %vm722_vm2, %v5777_v61, -inf }
 0x20a   : > { %895 = vmax.xlane.f32.xlu1 %v7252_v60  ;;  %v841_v62 = vpop.f32.mrf.mxu1 }
 0x20b   : > { %v7257_v63 = vsel %vm722_vm2, %v841_v62, -inf }
 0x20c   : > { %v5780_v1 = vpop.f32.mrf.mxu1 }
 0x20d   : > { %v7262_v2 = vsel %vm722_vm2, %v5780_v1, -inf }
 0x20e   : > { %903 = vmax.xlane.f32.xlu1 %v7257_v63  ;;  %v854_v3 = vpop.f32.mrf.mxu1 }
 0x20f   : > { %v7269_v4 = vsel %vm722_vm2, %v854_v3, -inf }
 0x210   : > { %v5781_v5 = vpop.f32.mrf.mxu1 }
 0x211   : > { %v7274_v7 = vsel %vm722_vm2, %v5781_v5, -inf }
 0x212   : > { %1190 = vrot.lane.b32.xlu0 %v7115_v0, %s6936_s17  ;;  %913 = vmax.xlane.f32.xlu1 %v7262_v2  ;;  %v857_v8 = vpop.f32.mrf.mxu1 }
 0x213   : > { %v7279_v9 = vsel %vm722_vm2, %v857_v8, -inf }
 0x216   : > { %909 = vmax.xlane.f32.xlu1 %v7269_v4 }
 0x21a   : > { %915 = vmax.xlane.f32.xlu1 %v7274_v7 }
 0x21e   : > { %911 = vmax.xlane.f32.xlu1 %v7279_v9 }
 0x22f   : > { %1188 = vrot.lane.b32.xlu1 %v7121_v6, %s6936_s17 }
 0x231   : > { %905 = vmax.xlane.f32.xlu0 %v7286_v10 }
 0x233   : > { %1160 = vrot.lane.b32.xlu1 %v7067_v22, %s6936_s17 }
 0x235   : > { %901 = vmax.xlane.f32.xlu0 %v7293_v11 }
 0x237   : > { %1164 = vrot.lane.b32.xlu1 %v7077_v32, %s6936_s17 }
 0x239   : > { %907 = vmax.xlane.f32.xlu0 %v7300_v13 }
 0x23b   : > { %1168 = vrot.lane.b32.xlu1 %v7087_v42, %s6936_s17 }
 0x23f   : > { %1172 = vrot.lane.b32.xlu1 %v7103_v54, %s6936_s17 }
 0x243   : > { %1499 = vrot.lane.b32.xlu1 %v7137_v17, %s6936_s17 }
 0x247   : > { %1491 = vrot.lane.b32.xlu1 %v7162_v28, %s6936_s17 }
 0x24b   : > { %1487 = vrot.lane.b32.xlu1 %v7174_v20, %s6936_s17 }
 0x24f   : > { %1186 = vrot.lane.b32.xlu0 %v7128_v12, %s6936_s17  ;;  %1749 = vrot.lane.b32.xlu1 %v7095_v52, %s6937_s18 }
 0x253   : > { %1184 = vrot.lane.b32.xlu0 %v7063_v19, %s6936_s17 }
 0x257   : > { %1182 = vrot.lane.b32.xlu0 %v7158_v26, %s6936_s17 }
 0x25b   : > { %1158 = vrot.lane.b32.xlu0 %v7069_v25, %s6936_s17 }
 0x25f   : > { %1162 = vrot.lane.b32.xlu0 %v7181_v31, %s6936_s17 }
 0x263   : > { %1166 = vrot.lane.b32.xlu0 %v7190_v33, %s6936_s17 }
 0x267   : > { %1170 = vrot.lane.b32.xlu0 %v7198_v29, %s6936_s17 }
 0x26b   : > { %1501 = vrot.lane.b32.xlu0 %v7132_v14, %s6936_s17 }
 0x26f   : > { %1497 = vrot.lane.b32.xlu0 %v7140_v18, %s6936_s17 }
 0x273   : > { %1495 = vrot.lane.b32.xlu0 %v7146_v23, %s6936_s17 }
 0x277   : > { %1493 = vrot.lane.b32.xlu0 %v7152_v24, %s6936_s17 }
 0x27b   : > { %1489 = vrot.lane.b32.xlu0 %v7168_v30, %s6936_s17 }
 0x27f   : > { %v890_v21 = vpop.xlane.xlu1 %889  ;;  %1751 = vrot.lane.b32.xlu0 %v7093_v49, %s6937_s18 }
 0x280   : > { %v919_v36 = vsub.f32 %v7217_v40, %v890_v21 }
 0x281   : > { %v886_v27 = vpop.xlane.xlu0 %885 }
 0x282   : > { %v917_v15 = vsub.f32 %v7222_v43, %v886_v27  ;;  %v937_v55 = vmul.f32 1.442695, %v919_v36 }
 0x283   : > { %v892_v38 = vpop.xlane.xlu1 %891 }
 0x284   : > { %v933_v41 = vmul.f32 1.442695, %v917_v15  ;;  %v920_v44 = vsub.f32 %v7227_v45, %v892_v38 }
 0x285   : > { %v888_v46 = vpop.xlane.xlu0 %887 }
 0x286   : > { %v939_v48 = vmul.f32 1.442695, %v920_v44  ;;  %v918_v51 = vsub.f32 %v7232_v47, %v888_v46  ;;  %6400 = vpow2.f32 %v933_v41  ;;  %v1241_v46 = vsel %vm723_vm1, %v1195_v16, 0 }
 0x287   : > { %v898_v56 = vpop.xlane.xlu1 %897 }
 0x288   : > { %v935_v58 = vmul.f32 1.442695, %v918_v51  ;;  %6402 = vpow2.f32 %v939_v48  ;;  %v923_v62 = vsub.f32 %v7237_v50, %v898_v56 }
 0x28a   : > { %6404 = vpow2.f32 %v935_v58  ;;  %v945_v8 = vmul.f32 1.442695, %v923_v62 }
 0x28b   : > { %6406 = vpow2.f32 %v937_v55  ;;  %v894_v59 = vpop.xlane.xlu1 %893 }
 0x28c   : > { %v921_v43 = vsub.f32 %v7242_v53, %v894_v59  ;;  %v1191_v59 = vpop.permute.xlu0 %1190 }
 0x28e   : > { %v941_v45 = vmul.f32 1.442695, %v921_v43 }
 0x28f   : > { %v900_v61 = vpop.xlane.xlu1 %899 }
 0x290   : > { %v924_v40 = vsub.f32 %v7247_v57, %v900_v61  ;;  %6408 = vpow2.f32 %v941_v45  ;;  %v1235_v61 = vsel %vm723_vm1, %v1191_v59, 0 }
 0x292   : > { %v947_v1 = vmul.f32 1.442695, %v924_v40 }
 0x293   : > { %v896_v3 = vpop.xlane.xlu1 %895  ;;  %v7349_v5 = vpop.eup %6400 }
 0x294   : > { %v922_v47 = vsub.f32 %v7252_v60, %v896_v3  ;;  %10085 = vst [vmem:[#allocation3_spill] sm:$0xff] %v7349_v5  ;;  %6410 = vpow2.f32 %v947_v1  ;;  %v1244_v60 = vsel %vm723_vm1, %v7208_v35, 0 }
 0x295   : > { %v7351_v21 = vpop.eup %6402 }
 0x296   : > { %10086 = vst [vmem:[#allocation4_spill] sm:$0xff] %v7351_v21  ;;  %v943_v27 = vmul.f32 1.442695, %v922_v47 }
 0x297   : > { %v7353_v15 = vpop.eup %6404  ;;  %v904_v53 = vpop.xlane.xlu1 %903 }
 0x298   : > { %10087 = vst [vmem:[#allocation5_spill] sm:$0xff] %v7353_v15  ;;  %v7355_v36 = vpop.eup %6406  ;;  %6412 = vpow2.f32 %v943_v27  ;;  %v997_v50 = vpack.c.bf16 %v7353_v15, %v7349_v5  ;;  %v926_v62 = vsub.f32 %v7257_v63, %v904_v53 }
 0x299   : > { %10088 = vst [vmem:[#allocation6_spill] sm:$0xff] %v7355_v36  ;;  %6414 = vpow2.f32 %v945_v8  ;;  %v998_v57 = vpack.c.bf16 %v7351_v21, %v7355_v36 }
 0x29a   : > { %5798 = vmatprep.mubr.bf16.mxu0 %v997_v50 }
 0x29b   : > { %5799 = vmatmul.mubr.bf16.vlgmr.msra.gmra.mxu0 %v998_v57  ;;  %v914_v38 = vpop.xlane.xlu1 %913 }
 0x29c   : > { %5815 = vmatpush3.bf16.xpose.msra.mxu0 %v1244_v60 }
 0x29d   : > { %6291 = vmatprep.subr.msk.bf16.mxu0 %vm723_vm1, %v1195_v16  ;;  %v7364_v44 = vpop.eup %6408  ;;  %v1238_v16 = vsel %vm723_vm1, %v7206_v34, 0 }
 0x29e   : > { %10089 = vst [vmem:[#allocation7_spill] sm:$0xff] %v7364_v44 }
 0x29f   : > { %v910_v41 = vpop.xlane.xlu1 %909 }
 0x2a0   : > { %v929_v50 = vsub.f32 %v7269_v4, %v910_v41 }
 0x2a1   : > { %v7367_v48 = vpop.eup %6410 }
 0x2a2   : > { %10090 = vst [vmem:[#allocation8_spill] sm:$0xff] %v7367_v48  ;;  %v957_v53 = vmul.f32 1.442695, %v929_v50 }
 0x2a3   : > { %v916_v58 = vpop.xlane.xlu1 %915 }
 0x2a4   : > { %5817 = vmatpush3.bf16.xpose.msra.mxu0 %v1241_v46 }
 0x2a5   : > { %v7369_v51 = vpop.eup %6412  ;;  %6292 = vmatprep.subr.msk.bf16.mxu0 %vm723_vm1, %v7206_v34  ;;  %v951_v34 = vmul.f32 1.442695, %v926_v62 }
 0x2a6   : > { %10091 = vst [vmem:[#allocation9_spill] sm:$0xff] %v7369_v51  ;;  %v7373_v55 = vpop.eup %6414  ;;  %v999_v35 = vpack.c.bf16 %v7369_v51, %v7364_v44 }
 0x2a7   : > { %10092 = vst [vmem:[#allocation10_spill] sm:$0xff] %v7373_v55  ;;  %v1000_v56 = vpack.c.bf16 %v7367_v48, %v7373_v55  ;;  %v912_v43 = vpop.xlane.xlu1 %911  ;;  %6416 = vpow2.f32 %v951_v34 }
 0x2a8   : > { %5802 = vmatprep.mubr.bf16.mxu0 %v999_v35  ;;  %v930_v3 = vsub.f32 %v7279_v9, %v912_v43 }
 0x2a9   : > { %5803 = vmatmul.mubr.bf16.gmra.mxu0 %v1000_v56  ;;  %v932_v56 = vsub.f32 %v7274_v7, %v916_v58 }
 0x2aa   : > { %v959_v57 = vmul.f32 1.442695, %v930_v3 }
 0x2ab   : > { %v1189_v40 = vpop.permute.xlu1 %1188 }
 0x2ac   : > { %5819 = vmatpush3.bf16.xpose.msra.mxu0 %v1238_v16  ;;  %v1232_v1 = vsel %vm723_vm1, %v1189_v40, 0  ;;  %v931_v16 = vsub.f32 %v7262_v2, %v914_v38 }
 0x2ad   : > { %6293 = vmatprep.subr.msk.bf16.mxu0 %vm723_vm1, %v1191_v59 }
 0x2ae   : > { %v961_v59 = vmul.f32 1.442695, %v931_v16 }
 0x2b4   : > { %5821 = vmatpush3.bf16.xpose.msra.mxu0 %v1235_v61  ;;  %v7396_v58 = vpop.eup %6416 }
 0x2b5   : > { %6294 = vmatprep.subr.msk.bf16.mxu0 %vm723_vm1, %v1189_v40  ;;  %10093 = vst [vmem:[#allocation11_spill] sm:$0xff] %v7396_v58 }
 0x2ba   : > { %v906_v45 = vpop.xlane.xlu0 %905 }
 0x2bb   : > { %v927_v47 = vsub.f32 %v7286_v10, %v906_v45 }
 0x2bc   : > { %5823 = vmatpush3.bf16.xpose.msra.mxu0 %v1232_v1 }
 0x2bd   : > { %v953_v46 = vmul.f32 1.442695, %v927_v47 }
 0x2be   : > { %v902_v8 = vpop.xlane.xlu0 %901 }
 0x2bf   : > { %v925_v27 = vsub.f32 %v7293_v11, %v902_v8  ;;  %v963_v11 = vmul.f32 1.442695, %v932_v56 }
 0x2c1   : > { %v949_v60 = vmul.f32 1.442695, %v925_v27 }
 0x2c2   : > { %v908_v35 = vpop.xlane.xlu0 %907 }
 0x2c3   : > { %6418 = vpow2.f32 %v949_v60  ;;  %v928_v63 = vsub.f32 %v7300_v13, %v908_v35  ;;  %v1161_v13 = vpop.permute.xlu1 %1160 }
 0x2c4   : > { %6420 = vpow2.f32 %v959_v57 }
 0x2c5   : > { %v955_v9 = vmul.f32 1.442695, %v928_v63  ;;  %6422 = vpow2.f32 %v953_v46 }
 0x2c6   : > { %v1187_v10 = vpop.permute.xlu0 %1186 }
 0x2c7   : > { %6424 = vpow2.f32 %v955_v9  ;;  %6295 = vmatprep.subr.msk.bf16.mxu0 %vm723_vm1, %v1187_v10  ;;  %v1229_v4 = vsel %vm723_vm1, %v1187_v10, 0  ;;  %v1165_v40 = vpop.permute.xlu1 %1164 }
 0x2c8   : > { %6426 = vpow2.f32 %v957_v53  ;;  %5825 = vmatpush3.bf16.xpose.msra.mxu0 %v1229_v4 }
 0x2c9   : > { %6428 = vpow2.f32 %v963_v11 }
 0x2ca   : > { %v1185_v41 = vpop.permute.xlu0 %1184  ;;  %6430 = vpow2.f32 %v961_v59 }
 0x2cb   : > { %6296 = vmatprep.subr.msk.bf16.mxu0 %vm723_vm1, %v1185_v41  ;;  %v1226_v2 = vsel %vm723_vm1, %v1185_v41, 0  ;;  %v1169_v50 = vpop.permute.xlu1 %1168 }
 0x2ce   : > { %v1183_v7 = vpop.permute.xlu0 %1182 }
 0x2cf   : > { %v1223_v27 = vsel %vm723_vm1, %v1183_v7, 0  ;;  %v1173_v63 = vpop.permute.xlu1 %1172 }
 0x2d0   : > { %v7399_v38 = vpop.eup %6418  ;;  %5827 = vmatpush3.bf16.xpose.msra.mxu0 %v1226_v2 }
 0x2d1   : > { %10094 = vst [vmem:[#allocation12_spill] sm:$0xff] %v7399_v38  ;;  %6297 = vmatprep.subr.msk.bf16.mxu0 %vm723_vm1, %v1183_v7  ;;  %v1001_v43 = vpack.c.bf16 %v7396_v58, %v7399_v38  ;;  %v7404_v61 = vpop.eup %6420 }
 0x2d2   : > { %10095 = vst [vmem:[#allocation13_spill] sm:$0xff] %v7404_v61  ;;  %v1159_v62 = vpop.permute.xlu0 %1158  ;;  %v7406_v45 = vpop.eup %6422 }
 0x2d3   : > { %10096 = vst [vmem:[#allocation14_spill] sm:$0xff] %v7406_v45  ;;  %5806 = vmatprep.mubr.bf16.mxu0 %v1001_v43  ;;  %v1500_v9 = vpop.permute.xlu1 %1499 }
 0x2d4   : > { %v7408_v1 = vpop.eup %6424 }
 0x2d5   : > { %10097 = vst [vmem:[#allocation15_spill] sm:$0xff] %v7408_v1  ;;  %v7410_v3 = vpop.eup %6426  ;;  %v1002_v34 = vpack.c.bf16 %v7408_v1, %v7406_v45 }
 0x2d6   : > { %10098 = vst [vmem:[#allocation16_spill] sm:$0xff] %v7410_v3  ;;  %v1163_v47 = vpop.permute.xlu0 %1162  ;;  %v1003_v8 = vpack.c.bf16 %v7404_v61, %v7410_v3  ;;  %v7417_v57 = vpop.eup %6428 }
 0x2d7   : > { %5807 = vmatmul.mubr.bf16.gmra.mxu0 %v1002_v34  ;;  %10099 = vst [vmem:[#allocation17_spill] sm:$0xff] %v7417_v57  ;;  %v7419_v46 = vpop.eup %6430  ;;  %v1492_v11 = vpop.permute.xlu1 %1491 }
 0x2d8   : > { %5810 = vmatprep.mubr.bf16.mxu0 %v1003_v8  ;;  %5829 = vmatpush3.bf16.xpose.msra.mxu0 %v1223_v27  ;;  %10100 = vst [vmem:[#allocation18_spill] sm:$0xff] %v7419_v46  ;;  %v1004_v35 = vpack.c.bf16 %v7417_v57, %v7419_v46 }
 0x2da   : > { %v1167_v60 = vpop.permute.xlu0 %1166 }
 0x2db   : > { %v1488_v59 = vpop.permute.xlu1 %1487 }
 0x2de   : > { %v1171_v53 = vpop.permute.xlu0 %1170 }
 0x2df   : > { %5811 = vmatmul.mubr.bf16.gmra.mxu0 %v1004_v35 }
 0x2e0   : > { %5830 = vmatprep.mubr.msk.bf16.mxu0 %vm723_vm1, %v1159_v62 }
 0x2e2   : > { %v1502_v56 = vpop.permute.xlu0 %1501 }
 0x2e3   : > { %5846 = vmatprep.subr.bf16.mxu1 %v1502_v56 }
 0x2e4   : > { %5847 = vmatpush3.bf16.msra.mxu1 %v1502_v56 }
 0x2e5   : > { %5848 = vmatprep.subr.bf16.mxu1 %v1500_v9 }
 0x2e6   : > { %v1498_v10 = vpop.permute.xlu0 %1497 }
 0x2e7   : > { %5831 = vmatmul.mubr.msk.bf16.vlgmr.msra.gmra.mxu0 %vm723_vm1, %v1161_v13 }
 0x2e8   : > { %5834 = vmatprep.mubr.msk.bf16.mxu0 %vm723_vm1, %v1163_v47  ;;  %5849 = vmatpush3.bf16.msra.mxu1 %v1500_v9 }
 0x2e9   : > { %5850 = vmatprep.subr.bf16.mxu1 %v1498_v10 }
 0x2ea   : > { %v1496_v16 = vpop.permute.xlu0 %1495 }
 0x2ec   : > { %5851 = vmatpush3.bf16.msra.mxu1 %v1498_v10 }
 0x2ed   : > { %5852 = vmatprep.subr.bf16.mxu1 %v1496_v16 }
 0x2ee   : > { %v1494_v4 = vpop.permute.xlu0 %1493 }
 0x2ef   : > { %5835 = vmatmul.mubr.msk.bf16.gmra.mxu0 %vm723_vm1, %v1165_v40 }
 0x2f0   : > { %5838 = vmatprep.mubr.msk.bf16.mxu0 %vm723_vm1, %v1167_v60  ;;  %5853 = vmatpush3.bf16.msra.mxu1 %v1496_v16 }
 0x2f1   : > { %5854 = vmatprep.subr.bf16.mxu1 %v1494_v4 }
 0x2f2   : > { %v1490_v41 = vpop.permute.xlu0 %1489 }
 0x2f4   : > { %5855 = vmatpush3.bf16.msra.mxu1 %v1494_v4 }
 0x2f5   : > { %5856 = vmatprep.subr.bf16.mxu1 %v1492_v11 }
 0x2f6   : > { %v7431_v13 = vpop.permute.xlu0 %1751 }
 0x2f7   : > { %5839 = vmatmul.mubr.msk.bf16.gmra.mxu0 %vm723_vm1, %v1169_v50 }
 0x2f8   : > { %5842 = vmatprep.mubr.msk.bf16.mxu0 %vm723_vm1, %v1171_v53  ;;  %5857 = vmatpush3.bf16.msra.mxu1 %v1492_v11 }
 0x2f9   : > { %5858 = vmatprep.subr.bf16.mxu1 %v1490_v41 }
 0x2fc   : > { %5859 = vmatpush3.bf16.msra.mxu1 %v1490_v41 }
 0x2fd   : > { %5860 = vmatprep.subr.bf16.mxu1 %v1488_v59 }
 0x2ff   : > { %5843 = vmatmul.mubr.msk.bf16.gmra.mxu0 %vm723_vm1, %v1173_v63 }
 0x300   : > { %5861 = vmatpush3.bf16.msra.mxu1 %v1488_v59 }
 0x301   : > { %6298 = vmatprep.subr.msk.bf16.mxu1 %vm723_vm1, %v7431_v13 }
 0x35b   : > { %v7435_v7 = vpop.f32.mrf.mxu0 }
 0x35c   : > { %10101 = vst [vmem:[#allocation19_spill] sm:$0xff] %v7435_v7 }
 0x35d   : > { %v7437_v2 = vpop.f32.mrf.mxu0 }
 0x35e   : > { %10102 = vst [vmem:[#allocation20_spill] sm:$0xff] %v7437_v2 }
 0x35f   : > { %v7439_v43 = vpop.f32.mrf.mxu0 }
 0x360   : > { %10103 = vst [vmem:[#allocation21_spill] sm:$0xff] %v7439_v43 }
 0x361   : > { %v7441_v40 = vpop.f32.mrf.mxu0 }
 0x362   : > { %10104 = vst [vmem:[#allocation22_spill] sm:$0xff] %v7441_v40 }
 0x369   : > { %v7443_v62 = vpop.f32.mrf.mxu0 }
 0x36a   : > { %10105 = vst [vmem:[#allocation23_spill] sm:$0xff] %v7443_v62 }
 0x36b   : > { %v7445_v34 = vpop.f32.mrf.mxu0 }
 0x36c   : > { %10106 = vst [vmem:[#allocation24_spill] sm:$0xff] %v7445_v34 }
 0x36d   : > { %v7447_v47 = vpop.f32.mrf.mxu0 }
 0x36e   : > { %10107 = vst [vmem:[#allocation25_spill] sm:$0xff] %v7447_v47 }
 0x36f   : > { %v7449_v8 = vpop.f32.mrf.mxu0 }
 0x370   : > { %10108 = vst [vmem:[#allocation26_spill] sm:$0xff] %v7449_v8 }
 0x397   : > { %v7451_v27 = vpop.f32.mrf.mxu0 }
 0x398   : > { %10109 = vst [vmem:[#allocation27_spill] sm:$0xff] %v7451_v27 }
 0x399   : > { %v7453_v50 = vpop.f32.mrf.mxu0 }
 0x39a   : > { %10110 = vst [vmem:[#allocation28_spill] sm:$0xff] %v7453_v50 }
 0x39b   : > { %v7455_v60 = vpop.f32.mrf.mxu0 }
 0x39c   : > { %10111 = vst [vmem:[#allocation29_spill] sm:$0xff] %v7455_v60 }
 0x39d   : > { %v7457_v35 = vpop.f32.mrf.mxu0 }
 0x39e   : > { %10112 = vst [vmem:[#allocation30_spill] sm:$0xff] %v7457_v35 }
 0x39f   : > { %v7459_v63 = vpop.f32.mrf.mxu0 }
 0x3a0   : > { %10113 = vst [vmem:[#allocation31_spill] sm:$0xff] %v7459_v63 }
 0x3a1   : > { %v7461_v53 = vpop.f32.mrf.mxu0 }
 0x3a2   : > { %10114 = vst [vmem:[#allocation32_spill] sm:$0xff] %v7461_v53 }
 0x3a3   : > { %v7463_v56 = vpop.f32.mrf.mxu0 }
 0x3a4   : > { %10115 = vst [vmem:[#allocation33_spill] sm:$0xff] %v7463_v56 }
 0x3a5   : > { %v7465_v9 = vpop.f32.mrf.mxu0 }
 0x3a6   : > { %10116 = vst [vmem:[#allocation34_spill] sm:$0xff] %v7465_v9 }
 0x3a7   : > { %v5832_v10 = vpop.f32.mrf.mxu0 }
 0x3a8   : > { %v7469_v16 = vsel %vm722_vm2, %v5832_v10, -inf }
 0x3a9   : > { %1363 = vmax.xlane.f32.xlu1 %v7469_v16  ;;  %v1280_v4 = vpop.f32.mrf.mxu0 }
 0x3aa   : > { %v7474_v11 = vsel %vm722_vm2, %v1280_v4, -inf }
 0x3ab   : > { %1359 = vmax.xlane.f32.xlu0 %v7474_v11  ;;  %v5833_v41 = vpop.f32.mrf.mxu0 }
 0x3ac   : > { %v7479_v59 = vsel %vm722_vm2, %v5833_v41, -inf }
 0x3ad   : > { %1365 = vmax.xlane.f32.xlu1 %v7479_v59  ;;  %v1283_v63 = vpop.f32.mrf.mxu0 }
 0x3ae   : > { %v7484_v10 = vsel %vm722_vm2, %v1283_v63, -inf }
 0x3af   : > { %v5836_v53 = vpop.f32.mrf.mxu0 }
 0x3b0   : > { %v7495_v7 = vsel %vm722_vm2, %v5836_v53, -inf }
 0x3b1   : > { %1361 = vmax.xlane.f32.xlu1 %v7484_v10  ;;  %v1296_v27 = vpop.f32.mrf.mxu0 }
 0x3b2   : > { %v7500_v35 = vsel %vm722_vm2, %v1296_v27, -inf }
 0x3b3   : > { %v5837_v4 = vpop.f32.mrf.mxu0 }
 0x3b4   : > { %v7505_v47 = vsel %vm722_vm2, %v5837_v4, -inf }
 0x3b5   : > { %v1299_v41 = vpop.f32.mrf.mxu0 }
 0x3b6   : > { %v7515_v53 = vsel %vm722_vm2, %v1299_v41, -inf }
 0x3b7   : > { %v5840_v50 = vpop.f32.mrf.mxu0 }
 0x3b8   : > { %v7520_v27 = vsel %vm722_vm2, %v5840_v50, -inf }
 0x3b9   : > { %v1312_v56 = vpop.f32.mrf.mxu0 }
 0x3ba   : > { %v7525_v4 = vsel %vm722_vm2, %v1312_v56, -inf }
 0x3bb   : > { %v5841_v62 = vpop.f32.mrf.mxu0 }
 0x3bd   : > { %v1315_v63 = vpop.f32.mrf.mxu0 }
 0x3be   : > { %v7537_v50 = vsel %vm722_vm2, %v1315_v63, -inf }
 0x3bf   : > { %v5844_v9 = vpop.f32.mrf.mxu0 }
 0x3c0   : > { %v7544_v56 = vsel %vm722_vm2, %v5844_v9, -inf }
 0x3c1   : > { %1745 = vrot.lane.b32.xlu0 %v7115_v0, %s6937_s18  ;;  %v1328_v34 = vpop.f32.mrf.mxu0 }
 0x3c2   : > { %1747 = vrot.lane.b32.xlu1 %v7083_v39, %s6937_s18 }
 0x3c3   : > { %v5845_v60 = vpop.f32.mrf.mxu0 }
 0x3c4   : > { %v7558_v41 = vsel %vm722_vm2, %v5845_v60, -inf }
 0x3c5   : > { %1743 = vrot.lane.b32.xlu0 %v7121_v6, %s6937_s18  ;;  %v1331_v2 = vpop.f32.mrf.mxu0 }
 0x3c6   : > { %v7510_v8 = vsel %vm722_vm2, %v1331_v2, -inf  ;;  %v7530_v2 = vsel %vm722_vm2, %v5841_v62, -inf  ;;  %v7551_v62 = vsel %vm722_vm2, %v1328_v34, -inf  ;;  %v1750_v34 = vpop.permute.xlu1 %1749 }
 0x3e4   : > { %1371 = vmax.xlane.f32.xlu0 %v7495_v7 }
 0x3e6   : > { %1367 = vmax.xlane.f32.xlu1 %v7500_v35 }
 0x3e8   : > { %1373 = vmax.xlane.f32.xlu0 %v7505_v47 }
 0x3ea   : > { %1385 = vmax.xlane.f32.xlu1 %v7510_v8 }
 0x3ec   : > { %1369 = vmax.xlane.f32.xlu0 %v7515_v53 }
 0x3f0   : > { %1379 = vmax.xlane.f32.xlu0 %v7520_v27 }
 0x3f4   : > { %1375 = vmax.xlane.f32.xlu0 %v7525_v4 }
 0x3f8   : > { %1381 = vmax.xlane.f32.xlu0 %v7530_v2 }
 0x3fb   : > { %1741 = vrot.lane.b32.xlu1 %v7128_v12, %s6937_s18 }
 0x3fc   : > { %1377 = vmax.xlane.f32.xlu0 %v7537_v50 }
 0x3ff   : > { %1727 = vrot.lane.b32.xlu1 %v7077_v32, %s6937_s18 }
 0x400   : > { %1387 = vmax.xlane.f32.xlu0 %v7544_v56 }
 0x403   : > { %1731 = vrot.lane.b32.xlu1 %v7087_v42, %s6937_s18 }
 0x404   : > { %1383 = vmax.xlane.f32.xlu0 %v7551_v62 }
 0x407   : > { %1735 = vrot.lane.b32.xlu1 %v7103_v54, %s6937_s18 }
 0x408   : > { %1389 = vmax.xlane.f32.xlu0 %v7558_v41 }
 0x40b   : > { %2046 = vrot.lane.b32.xlu1 %v7137_v17, %s6937_s18 }
 0x40f   : > { %2038 = vrot.lane.b32.xlu1 %v7162_v28, %s6937_s18 }
 0x413   : > { %2034 = vrot.lane.b32.xlu1 %v7174_v20, %s6937_s18 }
 0x417   : > { %2294 = vrot.lane.b32.xlu1 %v7083_v39, %s6938_s19 }
 0x41e   : > { %1739 = vrot.lane.b32.xlu0 %v7063_v19, %s6937_s18 }
 0x422   : > { %1737 = vrot.lane.b32.xlu0 %v7158_v26, %s6937_s18 }
 0x426   : > { %1721 = vrot.lane.b32.xlu0 %v7069_v25, %s6937_s18 }
 0x42a   : > { %1723 = vrot.lane.b32.xlu0 %v7067_v22, %s6937_s18 }
 0x42e   : > { %1725 = vrot.lane.b32.xlu0 %v7181_v31, %s6937_s18 }
 0x432   : > { %1729 = vrot.lane.b32.xlu0 %v7190_v33, %s6937_s18  ;;  %v1364_v60 = vpop.xlane.xlu1 %1363 }
 0x433   : > { %v1393_v46 = vsub.f32 %v7469_v16, %v1364_v60 }
 0x434   : > { %v1360_v9 = vpop.xlane.xlu0 %1359 }
 0x435   : > { %v1391_v63 = vsub.f32 %v7474_v11, %v1360_v9  ;;  %v1411_v55 = vmul.f32 1.442695, %v1393_v46  ;;  %v1796_v46 = vsel %vm723_vm1, %v1750_v34, 0 }
 0x436   : > { %1733 = vrot.lane.b32.xlu0 %v7198_v29, %s6937_s18  ;;  %v1366_v43 = vpop.xlane.xlu1 %1365 }
 0x437   : > { %v1394_v40 = vsub.f32 %v7479_v59, %v1366_v43  ;;  %v1407_v3 = vmul.f32 1.442695, %v1391_v63 }
 0x438   : > { %v1746_v11 = vpop.permute.xlu0 %1745 }
 0x439   : > { %v1413_v45 = vmul.f32 1.442695, %v1394_v40  ;;  %6432 = vpow2.f32 %v1407_v3 }
 0x43a   : > { %2048 = vrot.lane.b32.xlu0 %v7132_v14, %s6937_s18  ;;  %v1362_v38 = vpop.xlane.xlu1 %1361 }
 0x43b   : > { %v1392_v57 = vsub.f32 %v7484_v10, %v1362_v38  ;;  %6434 = vpow2.f32 %v1413_v45 }
 0x43c   : > { %v1744_v59 = vpop.permute.xlu0 %1743 }
 0x43d   : > { %v1409_v61 = vmul.f32 1.442695, %v1392_v57  ;;  %v1799_v57 = vsel %vm723_vm1, %v7431_v13, 0  ;;  %v1790_v13 = vsel %vm723_vm1, %v1746_v11, 0  ;;  %v1787_v9 = vsel %vm723_vm1, %v1744_v59, 0 }
 0x43e   : > { %2044 = vrot.lane.b32.xlu0 %v7140_v18, %s6937_s18  ;;  %v1748_v40 = vpop.permute.xlu1 %1747 }
 0x43f   : > { %6436 = vpow2.f32 %v1409_v61  ;;  %v1793_v16 = vsel %vm723_vm1, %v1748_v40, 0 }
 0x440   : > { %6438 = vpow2.f32 %v1411_v55 }
 0x442   : > { %2042 = vrot.lane.b32.xlu0 %v7146_v23, %s6937_s18 }
 0x446   : > { %2040 = vrot.lane.b32.xlu0 %v7152_v24, %s6937_s18  ;;  %v7595_v43 = vpop.eup %6432 }
 0x448   : > { %v7599_v38 = vpop.eup %6434 }
 0x44a   : > { %2036 = vrot.lane.b32.xlu0 %v7168_v30, %s6937_s18 }
 0x44c   : > { %v7601_v3 = vpop.eup %6436 }
 0x44d   : > { %v7603_v45 = vpop.eup %6438  ;;  %v1471_v55 = vpack.c.bf16 %v7601_v3, %v7595_v43 }
 0x44e   : > { %2298 = vrot.lane.b32.xlu0 %v7093_v49, %s6938_s19  ;;  %v1472_v61 = vpack.c.bf16 %v7599_v38, %v7603_v45 }
 0x44f   : > { %5862 = vmatprep.mubr.bf16.mxu1 %v1471_v55 }
 0x450   : > { %5863 = vmatmul.mubr.bf16.vlgmr.msra.gmra.mxu1 %v1472_v61 }
 0x451   : > { %5879 = vmatpush3.bf16.xpose.msra.mxu1 %v1799_v57 }
 0x452   : > { %6299 = vmatprep.subr.msk.bf16.mxu1 %vm723_vm1, %v1750_v34  ;;  %2296 = vrot.lane.b32.xlu0 %v7095_v52, %s6938_s19 }
 0x456   : > { %2292 = vrot.lane.b32.xlu0 %v7115_v0, %s6938_s19 }
 0x459   : > { %5881 = vmatpush3.bf16.xpose.msra.mxu1 %v1796_v46 }
 0x45a   : > { %6300 = vmatprep.subr.msk.bf16.mxu1 %vm723_vm1, %v1748_v40 }
 0x461   : > { %5883 = vmatpush3.bf16.xpose.msra.mxu1 %v1793_v16 }
 0x462   : > { %6301 = vmatprep.subr.msk.bf16.mxu1 %vm723_vm1, %v1746_v11 }
 0x469   : > { %5885 = vmatpush3.bf16.xpose.msra.mxu1 %v1790_v13 }
 0x46a   : > { %6302 = vmatprep.subr.msk.bf16.mxu1 %vm723_vm1, %v1744_v59 }
 0x46d   : > { %v1372_v10 = vpop.xlane.xlu0 %1371 }
 0x46e   : > { %v1397_v61 = vsub.f32 %v7495_v7, %v1372_v10 }
 0x46f   : > { %v1368_v60 = vpop.xlane.xlu1 %1367 }
 0x470   : > { %v1395_v34 = vsub.f32 %v7500_v35, %v1368_v60  ;;  %v1419_v13 = vmul.f32 1.442695, %v1397_v61 }
 0x471   : > { %5887 = vmatpush3.bf16.xpose.msra.mxu1 %v1787_v9  ;;  %v1374_v63 = vpop.xlane.xlu0 %1373 }
 0x472   : > { %v1398_v55 = vsub.f32 %v7505_v47, %v1374_v63  ;;  %v1415_v46 = vmul.f32 1.442695, %v1395_v34 }
 0x473   : > { %v1386_v57 = vpop.xlane.xlu1 %1385 }
 0x474   : > { %v1421_v40 = vmul.f32 1.442695, %v1398_v55  ;;  %6440 = vpow2.f32 %v1415_v46 }
 0x475   : > { %v1370_v16 = vpop.xlane.xlu0 %1369 }
 0x476   : > { %v1396_v11 = vsub.f32 %v7515_v53, %v1370_v16  ;;  %6442 = vpow2.f32 %v1421_v40 }
 0x477   : > { %v1742_v44 = vpop.permute.xlu1 %1741 }
 0x478   : > { %v1417_v1 = vmul.f32 1.442695, %v1396_v11  ;;  %6303 = vmatprep.subr.msk.bf16.mxu1 %vm723_vm1, %v1742_v44  ;;  %v1784_v35 = vsel %vm723_vm1, %v1742_v44, 0 }
 0x479   : > { %v1380_v59 = vpop.xlane.xlu0 %1379  ;;  %5889 = vmatpush3.bf16.xpose.msra.mxu1 %v1784_v35 }
 0x47a   : > { %6444 = vpow2.f32 %v1417_v1  ;;  %v1401_v53 = vsub.f32 %v7520_v27, %v1380_v59  ;;  %v1404_v27 = vsub.f32 %v7510_v8, %v1386_v57 }
 0x47b   : > { %6446 = vpow2.f32 %v1419_v13 }
 0x47c   : > { %v1427_v1 = vmul.f32 1.442695, %v1401_v53 }
 0x47d   : > { %v1376_v7 = vpop.xlane.xlu0 %1375 }
 0x47e   : > { %v1399_v47 = vsub.f32 %v7525_v4, %v1376_v7 }
 0x480   : > { %v1423_v34 = vmul.f32 1.442695, %v1399_v47 }
 0x481   : > { %v1382_v10 = vpop.xlane.xlu0 %1381  ;;  %v7634_v9 = vpop.eup %6440 }
 0x482   : > { %v1402_v60 = vsub.f32 %v7530_v2, %v1382_v10  ;;  %10117 = vst [vmem:[#allocation35_spill] sm:$0xff] %v7634_v9  ;;  %6448 = vpow2.f32 %v1423_v34 }
 0x483   : > { %v7636_v61 = vpop.eup %6442 }
 0x484   : > { %v1429_v63 = vmul.f32 1.442695, %v1402_v60  ;;  %10118 = vst [vmem:[#allocation36_spill] sm:$0xff] %v7636_v61 }
 0x485   : > { %v1378_v55 = vpop.xlane.xlu0 %1377 }
 0x486   : > { %v1400_v44 = vsub.f32 %v7537_v50, %v1378_v55  ;;  %6450 = vpow2.f32 %v1429_v63  ;;  %v1433_v50 = vmul.f32 1.442695, %v1404_v27 }
 0x487   : > { %v7639_v46 = vpop.eup %6444 }
 0x488   : > { %10119 = vst [vmem:[#allocation37_spill] sm:$0xff] %v7639_v46  ;;  %v7641_v40 = vpop.eup %6446  ;;  %v1425_v4 = vmul.f32 1.442695, %v1400_v44  ;;  %v1473_v2 = vpack.c.bf16 %v7639_v46, %v7634_v9 }
 0x489   : > { %10120 = vst [vmem:[#allocation38_spill] sm:$0xff] %v7641_v40  ;;  %v1388_v16 = vpop.xlane.xlu0 %1387  ;;  %v1474_v11 = vpack.c.bf16 %v7636_v61, %v7641_v40 }
 0x48a   : > { %6452 = vpow2.f32 %v1425_v4  ;;  %5866 = vmatprep.mubr.bf16.mxu1 %v1473_v2  ;;  %v1405_v13 = vsub.f32 %v7544_v56, %v1388_v16 }
 0x48b   : > { %6454 = vpow2.f32 %v1427_v1  ;;  %5867 = vmatmul.mubr.bf16.gmra.mxu1 %v1474_v11  ;;  %v1728_v11 = vpop.permute.xlu1 %1727 }
 0x48c   : > { %6456 = vpow2.f32 %v1433_v50  ;;  %v1435_v47 = vmul.f32 1.442695, %v1405_v13 }
 0x48d   : > { %v1384_v35 = vpop.xlane.xlu0 %1383 }
 0x48e   : > { %v1403_v59 = vsub.f32 %v7551_v62, %v1384_v35 }
 0x48f   : > { %v7651_v60 = vpop.eup %6448 }
 0x490   : > { %v1431_v7 = vmul.f32 1.442695, %v1403_v59  ;;  %10121 = vst [vmem:[#allocation39_spill] sm:$0xff] %v7651_v60 }
 0x491   : > { %v1390_v10 = vpop.xlane.xlu0 %1389 }
 0x492   : > { %6458 = vpow2.f32 %v1431_v7  ;;  %v1406_v8 = vsub.f32 %v7558_v41, %v1390_v10 }
 0x493   : > { %6460 = vpow2.f32 %v1435_v47  ;;  %v7653_v34 = vpop.eup %6450  ;;  %v1732_v47 = vpop.permute.xlu1 %1731 }
 0x494   : > { %v1437_v57 = vmul.f32 1.442695, %v1406_v8  ;;  %10122 = vst [vmem:[#allocation40_spill] sm:$0xff] %v7653_v34 }
 0x495   : > { %v1740_v53 = vpop.permute.xlu0 %1739 }
 0x496   : > { %6462 = vpow2.f32 %v1437_v57  ;;  %6304 = vmatprep.subr.msk.bf16.mxu1 %vm723_vm1, %v1740_v53  ;;  %v1781_v56 = vsel %vm723_vm1, %v1740_v53, 0 }
 0x497   : > { %v7657_v62 = vpop.eup %6452  ;;  %5891 = vmatpush3.bf16.xpose.msra.mxu1 %v1781_v56  ;;  %v1736_v8 = vpop.permute.xlu1 %1735 }
 0x498   : > { %10123 = vst [vmem:[#allocation41_spill] sm:$0xff] %v7657_v62  ;;  %v7659_v63 = vpop.eup %6454  ;;  %v1475_v41 = vpack.c.bf16 %v7657_v62, %v7651_v60 }
 0x499   : > { %10124 = vst [vmem:[#allocation42_spill] sm:$0xff] %v7659_v63  ;;  %v1738_v55 = vpop.permute.xlu0 %1737  ;;  %v1476_v44 = vpack.c.bf16 %v7653_v34, %v7659_v63  ;;  %v7666_v4 = vpop.eup %6456 }
 0x49a   : > { %5870 = vmatprep.mubr.bf16.mxu1 %v1475_v41  ;;  %6305 = vmatprep.subr.msk.bf16.mxu1 %vm723_vm1, %v1738_v55  ;;  %10125 = vst [vmem:[#allocation43_spill] sm:$0xff] %v7666_v4  ;;  %v1778_v2 = vsel %vm723_vm1, %v1738_v55, 0 }
 0x49b   : > { %5871 = vmatmul.mubr.bf16.gmra.mxu1 %v1476_v44  ;;  %v2047_v56 = vpop.permute.xlu1 %2046 }
 0x49d   : > { %v1722_v1 = vpop.permute.xlu0 %1721 }
 0x49f   : > { %v7669_v27 = vpop.eup %6458  ;;  %5893 = vmatpush3.bf16.xpose.msra.mxu1 %v1778_v2 }
 0x4a0   : > { %10126 = vst [vmem:[#allocation44_spill] sm:$0xff] %v7669_v27  ;;  %v1477_v16 = vpack.c.bf16 %v7666_v4, %v7669_v27  ;;  %v7673_v13 = vpop.eup %6460 }
 0x4a1   : > { %v1724_v50 = vpop.permute.xlu0 %1723  ;;  %10127 = vst [vmem:[#allocation45_spill] sm:$0xff] %v7673_v13 }
 0x4a2   : > { %5874 = vmatprep.mubr.bf16.mxu1 %v1477_v16 }
 0x4a3   : > { %v7675_v35 = vpop.eup %6462 }
 0x4a4   : > { %10128 = vst [vmem:[#allocation46_spill] sm:$0xff] %v7675_v35  ;;  %v1478_v59 = vpack.c.bf16 %v7675_v35, %v7673_v13 }
 0x4a5   : > { %v1726_v7 = vpop.permute.xlu0 %1725 }
 0x4a6   : > { %5875 = vmatmul.mubr.bf16.gmra.mxu1 %v1478_v59 }
 0x4a7   : > { %5894 = vmatprep.mubr.msk.bf16.mxu1 %vm723_vm1, %v1722_v1  ;;  %v2039_v1 = vpop.permute.xlu1 %2038 }
 0x4a9   : > { %v1730_v10 = vpop.permute.xlu0 %1729 }
 0x4ab   : > { %v2035_v16 = vpop.permute.xlu1 %2034 }
 0x4ad   : > { %v1734_v57 = vpop.permute.xlu0 %1733 }
 0x4ae   : > { %5895 = vmatmul.mubr.msk.bf16.vlgmr.msra.gmra.mxu1 %vm723_vm1, %v1724_v50 }
 0x4af   : > { %5898 = vmatprep.mubr.msk.bf16.mxu1 %vm723_vm1, %v1726_v7 }
 0x4b1   : > { %v2049_v53 = vpop.permute.xlu0 %2048 }
 0x4b2   : > { %5910 = vmatprep.subr.bf16.mxu0 %v2049_v53 }
 0x4b3   : > { %5911 = vmatpush3.bf16.msra.mxu0 %v2049_v53 }
 0x4b4   : > { %5912 = vmatprep.subr.bf16.mxu0 %v2047_v56 }
 0x4b5   : > { %v2045_v41 = vpop.permute.xlu0 %2044 }
 0x4b6   : > { %5899 = vmatmul.mubr.msk.bf16.gmra.mxu1 %vm723_vm1, %v1728_v11 }
 0x4b7   : > { %5902 = vmatprep.mubr.msk.bf16.mxu1 %vm723_vm1, %v1730_v10  ;;  %5913 = vmatpush3.bf16.msra.mxu0 %v2047_v56 }
 0x4b8   : > { %5914 = vmatprep.subr.bf16.mxu0 %v2045_v41 }
 0x4b9   : > { %v2043_v55 = vpop.permute.xlu0 %2042 }
 0x4bb   : > { %5915 = vmatpush3.bf16.msra.mxu0 %v2045_v41 }
 0x4bc   : > { %5916 = vmatprep.subr.bf16.mxu0 %v2043_v55 }
 0x4bd   : > { %v2041_v44 = vpop.permute.xlu0 %2040 }
 0x4be   : > { %5903 = vmatmul.mubr.msk.bf16.gmra.mxu1 %vm723_vm1, %v1732_v47 }
 0x4bf   : > { %5906 = vmatprep.mubr.msk.bf16.mxu1 %vm723_vm1, %v1734_v57  ;;  %5917 = vmatpush3.bf16.msra.mxu0 %v2043_v55 }
 0x4c0   : > { %5918 = vmatprep.subr.bf16.mxu0 %v2041_v44 }
 0x4c1   : > { %v2037_v2 = vpop.permute.xlu0 %2036 }
 0x4c3   : > { %5919 = vmatpush3.bf16.msra.mxu0 %v2041_v44 }
 0x4c4   : > { %5920 = vmatprep.subr.bf16.mxu0 %v2039_v1 }
 0x4c5   : > { %v7687_v11 = vpop.permute.xlu0 %2298 }
 0x4c6   : > { %5907 = vmatmul.mubr.msk.bf16.gmra.mxu1 %vm723_vm1, %v1736_v8 }
 0x4c7   : > { %5921 = vmatpush3.bf16.msra.mxu0 %v2039_v1 }
 0x4c8   : > { %5922 = vmatprep.subr.bf16.mxu0 %v2037_v2 }
 0x4cb   : > { %5923 = vmatpush3.bf16.msra.mxu0 %v2037_v2 }
 0x4cc   : > { %5924 = vmatprep.subr.bf16.mxu0 %v2035_v16 }
 0x4cf   : > { %5925 = vmatpush3.bf16.msra.mxu0 %v2035_v16 }
 0x4d0   : > { %6306 = vmatprep.subr.msk.bf16.mxu0 %vm723_vm1, %v7687_v11 }
 0x510   : > { %v7691_v50 = vpop.f32.mrf.mxu1 }
 0x511   : > { %10129 = vst [vmem:[#allocation47_spill] sm:$0xff] %v7691_v50 }
 0x512   : > { %v7693_v59 = vpop.f32.mrf.mxu1 }
 0x513   : > { %10130 = vst [vmem:[#allocation48_spill] sm:$0xff] %v7693_v59 }
 0x514   : > { %v7695_v7 = vpop.f32.mrf.mxu1 }
 0x515   : > { %10131 = vst [vmem:[#allocation49_spill] sm:$0xff] %v7695_v7 }
 0x516   : > { %v7697_v47 = vpop.f32.mrf.mxu1 }
 0x517   : > { %10132 = vst [vmem:[#allocation50_spill] sm:$0xff] %v7697_v47 }
 0x54b   : > { %v7699_v10 = vpop.f32.mrf.mxu1 }
 0x54c   : > { %10133 = vst [vmem:[#allocation51_spill] sm:$0xff] %v7699_v10 }
 0x54d   : > { %v7701_v8 = vpop.f32.mrf.mxu1 }
 0x54e   : > { %10134 = vst [vmem:[#allocation52_spill] sm:$0xff] %v7701_v8 }
 0x54f   : > { %v7703_v57 = vpop.f32.mrf.mxu1 }
 0x550   : > { %10135 = vst [vmem:[#allocation53_spill] sm:$0xff] %v7703_v57 }
 0x551   : > { %v7705_v53 = vpop.f32.mrf.mxu1 }
 0x552   : > { %10136 = vst [vmem:[#allocation54_spill] sm:$0xff] %v7705_v53 }
 0x55b   : > { %v7707_v56 = vpop.f32.mrf.mxu1 }
 0x55c   : > { %10137 = vst [vmem:[#allocation55_spill] sm:$0xff] %v7707_v56 }
 0x55d   : > { %v7709_v41 = vpop.f32.mrf.mxu1 }
 0x55e   : > { %10138 = vst [vmem:[#allocation56_spill] sm:$0xff] %v7709_v41 }
 0x55f   : > { %v7711_v55 = vpop.f32.mrf.mxu1 }
 0x560   : > { %10139 = vst [vmem:[#allocation57_spill] sm:$0xff] %v7711_v55 }
 0x561   : > { %v7713_v44 = vpop.f32.mrf.mxu1 }
 0x562   : > { %10140 = vst [vmem:[#allocation58_spill] sm:$0xff] %v7713_v44 }
 0x566   : > { %v7715_v1 = vpop.f32.mrf.mxu1 }
 0x567   : > { %10141 = vst [vmem:[#allocation59_spill] sm:$0xff] %v7715_v1 }
 0x568   : > { %v7717_v2 = vpop.f32.mrf.mxu1 }
 0x569   : > { %10142 = vst [vmem:[#allocation60_spill] sm:$0xff] %v7717_v2 }
 0x56a   : > { %v7719_v16 = vpop.f32.mrf.mxu1 }
 0x56b   : > { %10143 = vst [vmem:[#allocation61_spill] sm:$0xff] %v7719_v16 }
 0x56c   : > { %v7721_v10 = vpop.f32.mrf.mxu1 }
 0x56d   : > { %10144 = vst [vmem:[#allocation62_spill] sm:$0xff] %v7721_v10 }
 0x56e   : > { %v5896_v8 = vpop.f32.mrf.mxu1 }
 0x56f   : > { %v7725_v57 = vsel %vm722_vm2, %v5896_v8, -inf }
 0x570   : > { %1918 = vmax.xlane.f32.xlu1 %v7725_v57  ;;  %v1835_v56 = vpop.f32.mrf.mxu1 }
 0x571   : > { %v7730_v41 = vsel %vm722_vm2, %v1835_v56, -inf }
 0x572   : > { %1914 = vmax.xlane.f32.xlu0 %v7730_v41  ;;  %v5897_v1 = vpop.f32.mrf.mxu1 }
 0x573   : > { %v7735_v2 = vsel %vm722_vm2, %v5897_v1, -inf }
 0x574   : > { %1920 = vmax.xlane.f32.xlu1 %v7735_v2  ;;  %v1838_v16 = vpop.f32.mrf.mxu1 }
 0x575   : > { %v7744_v55 = vsel %vm722_vm2, %v1838_v16, -inf }
 0x576   : > { %v5900_v10 = vpop.f32.mrf.mxu1 }
 0x577   : > { %v7740_v8 = vsel %vm722_vm2, %v5900_v10, -inf }
 0x578   : > { %1916 = vmax.xlane.f32.xlu1 %v7744_v55  ;;  %1926 = vmax.xlane.f32.xlu0 %v7740_v8  ;;  %v1851_v56 = vpop.f32.mrf.mxu1 }
 0x579   : > { %v7750_v1 = vsel %vm722_vm2, %v1851_v56, -inf }
 0x57a   : > { %v5901_v44 = vpop.f32.mrf.mxu1 }
 0x57b   : > { %v7760_v16 = vsel %vm722_vm2, %v5901_v44, -inf }
 0x57c   : > { %1922 = vmax.xlane.f32.xlu1 %v7750_v1  ;;  %v1854_v53 = vpop.f32.mrf.mxu1 }
 0x57d   : > { %v7755_v10 = vsel %vm722_vm2, %v1854_v53, -inf }
 0x57e   : > { %1924 = vmax.xlane.f32.xlu0 %v7755_v10  ;;  %v5904_v7 = vpop.f32.mrf.mxu1 }
 0x57f   : > { %v7765_v56 = vsel %vm722_vm2, %v5904_v7, -inf }
 0x580   : > { %1928 = vmax.xlane.f32.xlu1 %v7760_v16  ;;  %v1867_v50 = vpop.f32.mrf.mxu1 }
 0x581   : > { %v7770_v53 = vsel %vm722_vm2, %v1867_v50, -inf }
 0x582   : > { %v5905_v59 = vpop.f32.mrf.mxu1 }
 0x583   : > { %v7775_v44 = vsel %vm722_vm2, %v5905_v59, -inf }
 0x584   : > { %1934 = vmax.xlane.f32.xlu1 %v7765_v56  ;;  %v1870_v47 = vpop.f32.mrf.mxu1 }
 0x585   : > { %v7780_v7 = vsel %vm722_vm2, %v1870_v47, -inf }
 0x586   : > { %v5908_v50 = vpop.f32.mrf.mxu1 }
 0x587   : > { %v7789_v59 = vsel %vm722_vm2, %v5908_v50, -inf }
 0x588   : > { %1930 = vmax.xlane.f32.xlu1 %v7770_v53  ;;  %v1883_v36 = vpop.f32.mrf.mxu1 }
 0x589   : > { %v7794_v47 = vsel %vm722_vm2, %v1883_v36, -inf  ;;  %v7837_v36 = vpop.permute.xlu0 %2296 }
 0x58a   : > { %v5909_v58 = vpop.f32.mrf.mxu1 }
 0x58b   : > { %v7799_v5 = vsel %vm722_vm2, %v5909_v58, -inf }
 0x58c   : > { %1936 = vmax.xlane.f32.xlu1 %v7775_v44  ;;  %v1886_v48 = vpop.f32.mrf.mxu1 }
 0x58d   : > { %v7804_v50 = vsel %vm722_vm2, %v1886_v48, -inf  ;;  %v7843_v48 = vpop.permute.xlu1 %2294  ;;  %v7849_v58 = vpop.permute.xlu0 %2292 }
 0x590   : > { %1932 = vmax.xlane.f32.xlu1 %v7780_v7 }
 0x594   : > { %2288 = vrot.lane.b32.xlu0 %v7128_v12, %s6938_s19 }
 0x5a1   : > { %2290 = vrot.lane.b32.xlu1 %v7121_v6, %s6938_s19 }
 0x5b3   : > { %1942 = vmax.xlane.f32.xlu0 %v7789_v59 }
 0x5b7   : > { %1938 = vmax.xlane.f32.xlu0 %v7794_v47 }
 0x5bb   : > { %1944 = vmax.xlane.f32.xlu0 %v7799_v5 }
 0x5c5   : > { %1940 = vmax.xlane.f32.xlu1 %v7804_v50 }
 0x5d1   : > { %2286 = vrot.lane.b32.xlu0 %v7063_v19, %s6938_s19 }
 0x5d5   : > { %2268 = vrot.lane.b32.xlu0 %v7069_v25, %s6938_s19 }
 0x5d6   : > { %2284 = vrot.lane.b32.xlu1 %v7158_v26, %s6938_s19 }
 0x5d9   : > { %2272 = vrot.lane.b32.xlu0 %v7181_v31, %s6938_s19 }
 0x5da   : > { %2270 = vrot.lane.b32.xlu1 %v7067_v22, %s6938_s19 }
 0x5dd   : > { %2276 = vrot.lane.b32.xlu0 %v7190_v33, %s6938_s19 }
 0x5de   : > { %2274 = vrot.lane.b32.xlu1 %v7077_v32, %s6938_s19 }
 0x5e1   : > { %2280 = vrot.lane.b32.xlu0 %v7198_v29, %s6938_s19 }
 0x5e2   : > { %2278 = vrot.lane.b32.xlu1 %v7087_v42, %s6938_s19 }
 0x5e5   : > { %2595 = vrot.lane.b32.xlu0 %v7132_v14, %s6938_s19 }
 0x5e6   : > { %2282 = vrot.lane.b32.xlu1 %v7103_v54, %s6938_s19 }
 0x5e9   : > { %2591 = vrot.lane.b32.xlu0 %v7140_v18, %s6938_s19 }
 0x5ea   : > { %2593 = vrot.lane.b32.xlu1 %v7137_v17, %s6938_s19 }
 0x5ed   : > { %2589 = vrot.lane.b32.xlu0 %v7146_v23, %s6938_s19 }
 0x5ee   : > { %2585 = vrot.lane.b32.xlu1 %v7162_v28, %s6938_s19 }
 0x5f1   : > { %2587 = vrot.lane.b32.xlu0 %v7152_v24, %s6938_s19 }
 0x5f2   : > { %2581 = vrot.lane.b32.xlu1 %v7174_v20, %s6938_s19 }
 0x5f5   : > { %2583 = vrot.lane.b32.xlu0 %v7168_v30, %s6938_s19 }
 0x5f6   : > { %2841 = vrot.lane.b32.xlu1 %v7083_v39, %s6939_s20 }
 0x5f9   : > { %2845 = vrot.lane.b32.xlu0 %v7093_v49, %s6939_s20  ;;  %v1919_v51 = vpop.xlane.xlu1 %1918 }
 0x5fa   : > { %v1948_v35 = vsub.f32 %v7725_v57, %v1919_v51 }
 0x5fb   : > { %v1915_v21 = vpop.xlane.xlu0 %1914 }
 0x5fc   : > { %v1946_v15 = vsub.f32 %v7730_v41, %v1915_v21  ;;  %v1966_v40 = vmul.f32 1.442695, %v1948_v35 }
 0x5fd   : > { %2843 = vrot.lane.b32.xlu0 %v7095_v52, %s6939_s20  ;;  %v1921_v13 = vpop.xlane.xlu1 %1920 }
 0x5fe   : > { %v1949_v27 = vsub.f32 %v7735_v2, %v1921_v13  ;;  %v1962_v4 = vmul.f32 1.442695, %v1946_v15 }
 0x600   : > { %v1968_v60 = vmul.f32 1.442695, %v1949_v27  ;;  %6464 = vpow2.f32 %v1962_v4 }
 0x601   : > { %2839 = vrot.lane.b32.xlu0 %v7115_v0, %s6939_s20  ;;  %v1917_v63 = vpop.xlane.xlu1 %1916  ;;  %v1927_v34 = vpop.xlane.xlu0 %1926 }
 0x602   : > { %v1947_v62 = vsub.f32 %v7744_v55, %v1917_v63  ;;  %v1952_v21 = vsub.f32 %v7740_v8, %v1927_v34  ;;  %6466 = vpow2.f32 %v1968_v60 }
 0x604   : > { %v1964_v9 = vmul.f32 1.442695, %v1947_v62  ;;  %v1974_v2 = vmul.f32 1.442695, %v1952_v21 }
 0x605   : > { %v1923_v41 = vpop.xlane.xlu1 %1922 }
 0x606   : > { %v1950_v13 = vsub.f32 %v7750_v1, %v1923_v41  ;;  %6468 = vpow2.f32 %v1964_v9 }
 0x607   : > { %v1925_v51 = vpop.xlane.xlu0 %1924  ;;  %6470 = vpow2.f32 %v1966_v40 }
 0x608   : > { %v1970_v15 = vmul.f32 1.442695, %v1950_v13  ;;  %v1951_v57 = vsub.f32 %v7755_v10, %v1925_v51 }
 0x609   : > { %v1929_v27 = vpop.xlane.xlu1 %1928 }
 0x60a   : > { %v1972_v61 = vmul.f32 1.442695, %v1951_v57  ;;  %v1953_v63 = vsub.f32 %v7760_v16, %v1929_v27  ;;  %6472 = vpow2.f32 %v1970_v15 }
 0x60c   : > { %6474 = vpow2.f32 %v1972_v61  ;;  %v1976_v62 = vmul.f32 1.442695, %v1953_v63 }
 0x60d   : > { %6476 = vpow2.f32 %v1974_v2  ;;  %v1935_v34 = vpop.xlane.xlu1 %1934  ;;  %v7865_v4 = vpop.eup %6464 }
 0x60e   : > { %6478 = vpow2.f32 %v1976_v62  ;;  %v1956_v16 = vsub.f32 %v7765_v56, %v1935_v34  ;;  %v2343_v62 = vsel %vm723_vm1, %v7837_v36, 0 }
 0x60f   : > { %v7867_v9 = vpop.eup %6466 }
 0x610   : > { %10145 = vst [vmem:[#allocation63_spill] sm:$0xff] %v7867_v9  ;;  %v1982_v27 = vmul.f32 1.442695, %v1956_v16 }
 0x611   : > { %v1931_v60 = vpop.xlane.xlu1 %1930 }
 0x612   : > { %v1954_v35 = vsub.f32 %v7770_v53, %v1931_v60  ;;  %v2346_v53 = vsel %vm723_vm1, %v7687_v11, 0 }
 0x613   : > { %v7869_v40 = vpop.eup %6468 }
 0x614   : > { %10146 = vst [vmem:[#allocation64_spill] sm:$0xff] %v7869_v40  ;;  %v7872_v55 = vpop.eup %6470  ;;  %v2026_v1 = vpack.c.bf16 %v7869_v40, %v7865_v4  ;;  %v1978_v41 = vmul.f32 1.442695, %v1954_v35 }
 0x615   : > { %10147 = vst [vmem:[#allocation65_spill] sm:$0xff] %v7872_v55  ;;  %v1937_v8 = vpop.xlane.xlu1 %1936  ;;  %v2027_v10 = vpack.c.bf16 %v7867_v9, %v7872_v55 }
 0x616   : > { %v1957_v61 = vsub.f32 %v7775_v44, %v1937_v8  ;;  %5926 = vmatprep.mubr.bf16.mxu0 %v2026_v1  ;;  %6480 = vpow2.f32 %v1978_v41 }
 0x617   : > { %v7880_v21 = vpop.eup %6472  ;;  %5927 = vmatmul.mubr.bf16.vlgmr.msra.gmra.mxu0 %v2027_v10  ;;  %v2289_v10 = vpop.permute.xlu0 %2288 }
 0x618   : > { %10148 = vst [vmem:[#allocation66_spill] sm:$0xff] %v7880_v21  ;;  %v1984_v51 = vmul.f32 1.442695, %v1957_v61  ;;  %5943 = vmatpush3.bf16.xpose.msra.mxu0 %v2346_v53  ;;  %v2331_v53 = vsel %vm723_vm1, %v2289_v10, 0 }
 0x619   : > { %v7884_v13 = vpop.eup %6474  ;;  %v1933_v15 = vpop.xlane.xlu1 %1932  ;;  %6307 = vmatprep.subr.msk.bf16.mxu0 %vm723_vm1, %v7837_v36 }
 0x61a   : > { %10149 = vst [vmem:[#allocation67_spill] sm:$0xff] %v7884_v13  ;;  %v7886_v57 = vpop.eup %6476  ;;  %v1955_v56 = vsub.f32 %v7780_v7, %v1933_v15  ;;  %v2028_v44 = vpack.c.bf16 %v7884_v13, %v7880_v21  ;;  %6482 = vpow2.f32 %v1984_v51  ;;  %v2340_v7 = vsel %vm723_vm1, %v7843_v48, 0 }
 0x61b   : > { %10150 = vst [vmem:[#allocation68_spill] sm:$0xff] %v7886_v57  ;;  %v7893_v2 = vpop.eup %6478 }
 0x61c   : > { %10151 = vst [vmem:[#allocation69_spill] sm:$0xff] %v7893_v2  ;;  %v1980_v11 = vmul.f32 1.442695, %v1955_v56  ;;  %5930 = vmatprep.mubr.bf16.mxu0 %v2028_v44  ;;  %v2029_v63 = vpack.c.bf16 %v7893_v2, %v7886_v57 }
 0x61d   : > { %v2291_v61 = vpop.permute.xlu1 %2290 }
 0x61e   : > { %6484 = vpow2.f32 %v1980_v11  ;;  %v2334_v16 = vsel %vm723_vm1, %v2291_v61, 0 }
 0x61f   : > { %6486 = vpow2.f32 %v1982_v27  ;;  %5931 = vmatmul.mubr.bf16.gmra.mxu0 %v2029_v63 }
 0x620   : > { %5945 = vmatpush3.bf16.xpose.msra.mxu0 %v2343_v62 }
 0x621   : > { %6308 = vmatprep.subr.msk.bf16.mxu0 %vm723_vm1, %v7843_v48  ;;  %v2337_v48 = vsel %vm723_vm1, %v7849_v58, 0 }
 0x623   : > { %v7903_v34 = vpop.eup %6480 }
 0x624   : > { %10152 = vst [vmem:[#allocation70_spill] sm:$0xff] %v7903_v34 }
 0x627   : > { %v7905_v60 = vpop.eup %6482 }
 0x628   : > { %5947 = vmatpush3.bf16.xpose.msra.mxu0 %v2340_v7  ;;  %10153 = vst [vmem:[#allocation71_spill] sm:$0xff] %v7905_v60 }
 0x629   : > { %6309 = vmatprep.subr.msk.bf16.mxu0 %vm723_vm1, %v7849_v58 }
 0x62b   : > { %v7909_v35 = vpop.eup %6484 }
 0x62c   : > { %10154 = vst [vmem:[#allocation72_spill] sm:$0xff] %v7909_v35  ;;  %v7911_v8 = vpop.eup %6486  ;;  %v2030_v36 = vpack.c.bf16 %v7909_v35, %v7903_v34 }
 0x62d   : > { %10155 = vst [vmem:[#allocation73_spill] sm:$0xff] %v7911_v8  ;;  %v2031_v1 = vpack.c.bf16 %v7905_v60, %v7911_v8 }
 0x62e   : > { %5934 = vmatprep.mubr.bf16.mxu0 %v2030_v36 }
 0x62f   : > { %5935 = vmatmul.mubr.bf16.gmra.mxu0 %v2031_v1 }
 0x630   : > { %5949 = vmatpush3.bf16.xpose.msra.mxu0 %v2337_v48 }
 0x631   : > { %6310 = vmatprep.subr.msk.bf16.mxu0 %vm723_vm1, %v2291_v61 }
 0x638   : > { %5951 = vmatpush3.bf16.xpose.msra.mxu0 %v2334_v16 }
 0x639   : > { %6311 = vmatprep.subr.msk.bf16.mxu0 %vm723_vm1, %v2289_v10 }
 0x63c   : > { %v1943_v41 = vpop.xlane.xlu0 %1942 }
 0x63d   : > { %v1960_v11 = vsub.f32 %v7789_v59, %v1943_v41 }
 0x63f   : > { %v1990_v48 = vmul.f32 1.442695, %v1960_v11 }
 0x640   : > { %v1939_v51 = vpop.xlane.xlu0 %1938  ;;  %5953 = vmatpush3.bf16.xpose.msra.mxu0 %v2331_v53 }
 0x641   : > { %v1958_v44 = vsub.f32 %v7794_v47, %v1939_v51 }
 0x643   : > { %v1986_v62 = vmul.f32 1.442695, %v1958_v44 }
 0x644   : > { %v1945_v15 = vpop.xlane.xlu0 %1944 }
 0x645   : > { %v1961_v27 = vsub.f32 %v7799_v5, %v1945_v15  ;;  %6488 = vpow2.f32 %v1986_v62 }
 0x647   : > { %v1992_v7 = vmul.f32 1.442695, %v1961_v27 }
 0x648   : > { %v2287_v56 = vpop.permute.xlu0 %2286 }
 0x649   : > { %6312 = vmatprep.subr.msk.bf16.mxu0 %vm723_vm1, %v2287_v56  ;;  %v2328_v58 = vsel %vm723_vm1, %v2287_v56, 0  ;;  %6490 = vpow2.f32 %v1992_v7 }
 0x64a   : > { %5955 = vmatpush3.bf16.xpose.msra.mxu0 %v2328_v58 }
 0x64c   : > { %v2269_v63 = vpop.permute.xlu0 %2268 }
 0x64e   : > { %v1941_v36 = vpop.xlane.xlu1 %1940 }
 0x64f   : > { %v1959_v1 = vsub.f32 %v7804_v50, %v1941_v36 }
 0x650   : > { %v2273_v61 = vpop.permute.xlu0 %2272 }
 0x651   : > { %v1988_v10 = vmul.f32 1.442695, %v1959_v1 }
 0x652   : > { %v2285_v47 = vpop.permute.xlu1 %2284  ;;  %v7931_v50 = vpop.eup %6488 }
 0x653   : > { %6492 = vpow2.f32 %v1988_v10  ;;  %6313 = vmatprep.subr.msk.bf16.mxu0 %vm723_vm1, %v2285_v47  ;;  %v2325_v5 = vsel %vm723_vm1, %v2285_v47, 0  ;;  %10156 = vst [vmem:[#allocation74_spill] sm:$0xff] %v7931_v50 }
 0x654   : > { %6494 = vpow2.f32 %v1990_v48  ;;  %v2277_v16 = vpop.permute.xlu0 %2276  ;;  %5957 = vmatpush3.bf16.xpose.msra.mxu0 %v2325_v5 }
 0x656   : > { %v2271_v59 = vpop.permute.xlu1 %2270  ;;  %v7933_v56 = vpop.eup %6490 }
 0x657   : > { %10157 = vst [vmem:[#allocation75_spill] sm:$0xff] %v7933_v56 }
 0x658   : > { %v2281_v41 = vpop.permute.xlu0 %2280 }
 0x65a   : > { %v2275_v53 = vpop.permute.xlu1 %2274 }
 0x65c   : > { %v2596_v51 = vpop.permute.xlu0 %2595 }
 0x65d   : > { %5974 = vmatprep.subr.bf16.mxu1 %v2596_v51 }
 0x65e   : > { %5975 = vmatpush3.bf16.msra.mxu1 %v2596_v51  ;;  %v2279_v15 = vpop.permute.xlu1 %2278 }
 0x660   : > { %v7935_v44 = vpop.eup %6492  ;;  %v2592_v7 = vpop.permute.xlu0 %2591 }
 0x661   : > { %10158 = vst [vmem:[#allocation76_spill] sm:$0xff] %v7935_v44  ;;  %v7937_v58 = vpop.eup %6494  ;;  %v2032_v27 = vpack.c.bf16 %v7935_v44, %v7931_v50 }
 0x662   : > { %10159 = vst [vmem:[#allocation77_spill] sm:$0xff] %v7937_v58  ;;  %v2283_v11 = vpop.permute.xlu1 %2282  ;;  %v2033_v62 = vpack.c.bf16 %v7933_v56, %v7937_v58 }
 0x663   : > { %5938 = vmatprep.mubr.bf16.mxu0 %v2032_v27 }
 0x664   : > { %5939 = vmatmul.mubr.bf16.gmra.mxu0 %v2033_v62  ;;  %v2590_v1 = vpop.permute.xlu0 %2589 }
 0x665   : > { %5958 = vmatprep.mubr.msk.bf16.mxu0 %vm723_vm1, %v2269_v63 }
 0x666   : > { %v2594_v36 = vpop.permute.xlu1 %2593 }
 0x667   : > { %5976 = vmatprep.subr.bf16.mxu1 %v2594_v36 }
 0x668   : > { %5977 = vmatpush3.bf16.msra.mxu1 %v2594_v36  ;;  %v2588_v48 = vpop.permute.xlu0 %2587 }
 0x669   : > { %5978 = vmatprep.subr.bf16.mxu1 %v2592_v7 }
 0x66a   : > { %v2586_v10 = vpop.permute.xlu1 %2585 }
 0x66c   : > { %5959 = vmatmul.mubr.msk.bf16.vlgmr.msra.gmra.mxu0 %vm723_vm1, %v2271_v59  ;;  %5979 = vmatpush3.bf16.msra.mxu1 %v2592_v7  ;;  %v2584_v63 = vpop.permute.xlu0 %2583 }
 0x66d   : > { %5962 = vmatprep.mubr.msk.bf16.mxu0 %vm723_vm1, %v2273_v61  ;;  %5980 = vmatprep.subr.bf16.mxu1 %v2590_v1 }
 0x66e   : > { %v2582_v47 = vpop.permute.xlu1 %2581 }
 0x670   : > { %5981 = vmatpush3.bf16.msra.mxu1 %v2590_v1  ;;  %v7950_v61 = vpop.permute.xlu0 %2845 }
 0x671   : > { %5982 = vmatprep.subr.bf16.mxu1 %v2588_v48 }
 0x674   : > { %5963 = vmatmul.mubr.msk.bf16.gmra.mxu0 %vm723_vm1, %v2275_v53  ;;  %5983 = vmatpush3.bf16.msra.mxu1 %v2588_v48 }
 0x675   : > { %5966 = vmatprep.mubr.msk.bf16.mxu0 %vm723_vm1, %v2277_v16  ;;  %5984 = vmatprep.subr.bf16.mxu1 %v2586_v10 }
 0x678   : > { %5985 = vmatpush3.bf16.msra.mxu1 %v2586_v10 }
 0x679   : > { %5986 = vmatprep.subr.bf16.mxu1 %v2584_v63 }
 0x67c   : > { %5967 = vmatmul.mubr.msk.bf16.gmra.mxu0 %vm723_vm1, %v2279_v15  ;;  %5987 = vmatpush3.bf16.msra.mxu1 %v2584_v63 }
 0x67d   : > { %5970 = vmatprep.mubr.msk.bf16.mxu0 %vm723_vm1, %v2281_v41  ;;  %5988 = vmatprep.subr.bf16.mxu1 %v2582_v47 }
 0x680   : > { %5989 = vmatpush3.bf16.msra.mxu1 %v2582_v47 }
 0x681   : > { %6314 = vmatprep.subr.msk.bf16.mxu1 %vm723_vm1, %v7950_v61 }
 0x684   : > { %5971 = vmatmul.mubr.msk.bf16.gmra.mxu0 %vm723_vm1, %v2283_v11 }
 0x6d7   : > { %v7955_v5 = vpop.f32.mrf.mxu0 }
 0x6d8   : > { %10160 = vst [vmem:[#allocation78_spill] sm:$0xff] %v7955_v5 }
 0x6d9   : > { %v7957_v16 = vpop.f32.mrf.mxu0 }
 0x6da   : > { %10161 = vst [vmem:[#allocation79_spill] sm:$0xff] %v7957_v16 }
 0x6db   : > { %v7959_v59 = vpop.f32.mrf.mxu0 }
 0x6dc   : > { %10162 = vst [vmem:[#allocation80_spill] sm:$0xff] %v7959_v59 }
 0x6dd   : > { %v7961_v53 = vpop.f32.mrf.mxu0 }
 0x6de   : > { %10163 = vst [vmem:[#allocation81_spill] sm:$0xff] %v7961_v53 }
 0x6df   : > { %v7963_v51 = vpop.f32.mrf.mxu0 }
 0x6e0   : > { %10164 = vst [vmem:[#allocation82_spill] sm:$0xff] %v7963_v51 }
 0x6e1   : > { %v7965_v41 = vpop.f32.mrf.mxu0 }
 0x6e2   : > { %10165 = vst [vmem:[#allocation83_spill] sm:$0xff] %v7965_v41 }
 0x6e3   : > { %v7967_v15 = vpop.f32.mrf.mxu0 }
 0x6e4   : > { %10166 = vst [vmem:[#allocation84_spill] sm:$0xff] %v7967_v15 }
 0x6e5   : > { %v7969_v27 = vpop.f32.mrf.mxu0 }
 0x6e6   : > { %10167 = vst [vmem:[#allocation85_spill] sm:$0xff] %v7969_v27 }
 0x6ef   : > { %v7971_v62 = vpop.f32.mrf.mxu0 }
 0x6f0   : > { %10168 = vst [vmem:[#allocation86_spill] sm:$0xff] %v7971_v62 }
 0x6f1   : > { %v7973_v7 = vpop.f32.mrf.mxu0 }
 0x6f2   : > { %10169 = vst [vmem:[#allocation87_spill] sm:$0xff] %v7973_v7 }
 0x6f3   : > { %v7975_v11 = vpop.f32.mrf.mxu0 }
 0x6f4   : > { %10170 = vst [vmem:[#allocation88_spill] sm:$0xff] %v7975_v11 }
 0x6f5   : > { %v7977_v36 = vpop.f32.mrf.mxu0 }
 0x6f6   : > { %10171 = vst [vmem:[#allocation89_spill] sm:$0xff] %v7977_v36 }
 0x724   : > { %v7979_v1 = vpop.f32.mrf.mxu0 }
 0x725   : > { %10172 = vst [vmem:[#allocation90_spill] sm:$0xff] %v7979_v1 }
 0x726   : > { %v7981_v48 = vpop.f32.mrf.mxu0 }
 0x727   : > { %10173 = vst [vmem:[#allocation91_spill] sm:$0xff] %v7981_v48 }
 0x728   : > { %v7983_v10 = vpop.f32.mrf.mxu0 }
 0x729   : > { %10174 = vst [vmem:[#allocation92_spill] sm:$0xff] %v7983_v10 }
 0x72a   : > { %v7985_v63 = vpop.f32.mrf.mxu0 }
 0x72b   : > { %10175 = vst [vmem:[#allocation93_spill] sm:$0xff] %v7985_v63 }
 0x72c   : > { %v5960_v47 = vpop.f32.mrf.mxu0 }
 0x72d   : > { %v7989_v51 = vsel %vm722_vm2, %v5960_v47, -inf }
 0x72e   : > { %2465 = vmax.xlane.f32.xlu1 %v7989_v51  ;;  %v2382_v62 = vpop.f32.mrf.mxu0 }
 0x72f   : > { %v7994_v7 = vsel %vm722_vm2, %v2382_v62, -inf }
 0x730   : > { %2461 = vmax.xlane.f32.xlu0 %v7994_v7  ;;  %v5961_v1 = vpop.f32.mrf.mxu0 }
 0x731   : > { %v7999_v48 = vsel %vm722_vm2, %v5961_v1, -inf }
 0x732   : > { %2467 = vmax.xlane.f32.xlu1 %v7999_v48  ;;  %v2385_v10 = vpop.f32.mrf.mxu0 }
 0x733   : > { %v8004_v47 = vsel %vm722_vm2, %v2385_v10, -inf }
 0x734   : > { %v5964_v63 = vpop.f32.mrf.mxu0 }
 0x735   : > { %v8008_v11 = vsel %vm722_vm2, %v5964_v63, -inf }
 0x736   : > { %2463 = vmax.xlane.f32.xlu1 %v8004_v47  ;;  %2473 = vmax.xlane.f32.xlu0 %v8008_v11  ;;  %v2398_v62 = vpop.f32.mrf.mxu0 }
 0x737   : > { %v8014_v1 = vsel %vm722_vm2, %v2398_v62, -inf }
 0x738   : > { %v5965_v36 = vpop.f32.mrf.mxu0 }
 0x739   : > { %v8024_v63 = vsel %vm722_vm2, %v5965_v36, -inf }
 0x73a   : > { %2469 = vmax.xlane.f32.xlu1 %v8014_v1  ;;  %v2401_v41 = vpop.f32.mrf.mxu0 }
 0x73b   : > { %v8019_v10 = vsel %vm722_vm2, %v2401_v41, -inf }
 0x73c   : > { %2471 = vmax.xlane.f32.xlu0 %v8019_v10  ;;  %v5968_v15 = vpop.f32.mrf.mxu0 }
 0x73d   : > { %v8029_v62 = vsel %vm722_vm2, %v5968_v15, -inf }
 0x73e   : > { %2475 = vmax.xlane.f32.xlu1 %v8024_v63  ;;  %v2414_v27 = vpop.f32.mrf.mxu0 }
 0x73f   : > { %v8034_v41 = vsel %vm722_vm2, %v2414_v27, -inf }
 0x740   : > { %v5969_v59 = vpop.f32.mrf.mxu0 }
 0x741   : > { %v8039_v36 = vsel %vm722_vm2, %v5969_v59, -inf }
 0x742   : > { %2481 = vmax.xlane.f32.xlu1 %v8029_v62  ;;  %v2417_v53 = vpop.f32.mrf.mxu0 }
 0x743   : > { %v8044_v15 = vsel %vm722_vm2, %v2417_v53, -inf }
 0x744   : > { %v5972_v27 = vpop.f32.mrf.mxu0 }
 0x745   : > { %v8053_v59 = vsel %vm722_vm2, %v5972_v27, -inf }
 0x746   : > { %2477 = vmax.xlane.f32.xlu1 %v8034_v41  ;;  %v2430_v5 = vpop.f32.mrf.mxu0 }
 0x747   : > { %v8058_v53 = vsel %vm722_vm2, %v2430_v5, -inf  ;;  %v8107_v5 = vpop.permute.xlu1 %2841 }
 0x748   : > { %v5973_v16 = vpop.f32.mrf.mxu0 }
 0x749   : > { %v8063_v58 = vsel %vm722_vm2, %v5973_v16, -inf }
 0x74a   : > { %2483 = vmax.xlane.f32.xlu1 %v8039_v36  ;;  %v2433_v50 = vpop.f32.mrf.mxu0 }
 0x74b   : > { %v8068_v27 = vsel %vm722_vm2, %v2433_v50, -inf  ;;  %v8101_v50 = vpop.permute.xlu0 %2843 }
 0x74e   : > { %2479 = vmax.xlane.f32.xlu1 %v8044_v15 }
 0x74f   : > { %v8113_v16 = vpop.permute.xlu0 %2839 }
 0x752   : > { %2835 = vrot.lane.b32.xlu0 %v7128_v12, %s6939_s20 }
 0x75f   : > { %2837 = vrot.lane.b32.xlu1 %v7121_v6, %s6939_s20 }
 0x771   : > { %2489 = vmax.xlane.f32.xlu0 %v8053_v59 }
 0x775   : > { %2485 = vmax.xlane.f32.xlu0 %v8058_v53 }
 0x779   : > { %2491 = vmax.xlane.f32.xlu0 %v8063_v58 }
 0x783   : > { %2487 = vmax.xlane.f32.xlu1 %v8068_v27 }
 0x78f   : > { %2833 = vrot.lane.b32.xlu0 %v7063_v19, %s6939_s20 }
 0x793   : > { %2815 = vrot.lane.b32.xlu0 %v7069_v25, %s6939_s20 }
 0x794   : > { %2831 = vrot.lane.b32.xlu1 %v7158_v26, %s6939_s20 }
 0x797   : > { %2819 = vrot.lane.b32.xlu0 %v7181_v31, %s6939_s20 }
 0x798   : > { %2817 = vrot.lane.b32.xlu1 %v7067_v22, %s6939_s20 }
 0x79b   : > { %2823 = vrot.lane.b32.xlu0 %v7190_v33, %s6939_s20 }
 0x79c   : > { %2821 = vrot.lane.b32.xlu1 %v7077_v32, %s6939_s20 }
 0x79f   : > { %2827 = vrot.lane.b32.xlu0 %v7198_v29, %s6939_s20 }
 0x7a0   : > { %2825 = vrot.lane.b32.xlu1 %v7087_v42, %s6939_s20 }
 0x7a3   : > { %3142 = vrot.lane.b32.xlu0 %v7132_v14, %s6939_s20 }
 0x7a4   : > { %2829 = vrot.lane.b32.xlu1 %v7103_v54, %s6939_s20 }
 0x7a7   : > { %3138 = vrot.lane.b32.xlu0 %v7140_v18, %s6939_s20 }
 0x7a8   : > { %3140 = vrot.lane.b32.xlu1 %v7137_v17, %s6939_s20 }
 0x7ab   : > { %3136 = vrot.lane.b32.xlu0 %v7146_v23, %s6939_s20 }
 0x7ac   : > { %3132 = vrot.lane.b32.xlu1 %v7162_v28, %s6939_s20 }
 0x7af   : > { %3134 = vrot.lane.b32.xlu0 %v7152_v24, %s6939_s20 }
 0x7b0   : > { %3128 = vrot.lane.b32.xlu1 %v7174_v20, %s6939_s20 }
 0x7b3   : > { %3130 = vrot.lane.b32.xlu0 %v7168_v30, %s6939_s20  ;;  %s9959_s20 = scalar_lea.vmem %s10008_s6, %s5393_s15 }
 0x7b4   : > { %3388 = vrot.lane.b32.xlu1 %v7083_v39, %s6940_s25 }
 0x7b7   : > { %3392 = vrot.lane.b32.xlu0 %v7093_v49, %s6940_s25  ;;  %v2466_v56 = vpop.xlane.xlu1 %2465 }
 0x7b8   : > { %v2495_v35 = vsub.f32 %v7989_v51, %v2466_v56 }
 0x7b9   : > { %v2462_v44 = vpop.xlane.xlu0 %2461 }
 0x7ba   : > { %v2493_v8 = vsub.f32 %v7994_v7, %v2462_v44  ;;  %v2513_v55 = vmul.f32 1.442695, %v2495_v35 }
 0x7bb   : > { %3390 = vrot.lane.b32.xlu0 %v7095_v52, %s6940_s25  ;;  %v2468_v34 = vpop.xlane.xlu1 %2467 }
 0x7bc   : > { %v2496_v60 = vsub.f32 %v7999_v48, %v2468_v34  ;;  %v2509_v57 = vmul.f32 1.442695, %v2493_v8 }
 0x7be   : > { %v2515_v2 = vmul.f32 1.442695, %v2496_v60  ;;  %6496 = vpow2.f32 %v2509_v57 }
 0x7bf   : > { %3386 = vrot.lane.b32.xlu0 %v7115_v0, %s6940_s25  ;;  %v2464_v21 = vpop.xlane.xlu1 %2463  ;;  %v2474_v13 = vpop.xlane.xlu0 %2473 }
 0x7c0   : > { %v2494_v46 = vsub.f32 %v8004_v47, %v2464_v21  ;;  %v2499_v44 = vsub.f32 %v8008_v11, %v2474_v13  ;;  %6498 = vpow2.f32 %v2515_v2 }
 0x7c2   : > { %v2511_v9 = vmul.f32 1.442695, %v2494_v46  ;;  %v2521_v48 = vmul.f32 1.442695, %v2499_v44 }
 0x7c3   : > { %v2470_v7 = vpop.xlane.xlu1 %2469 }
 0x7c4   : > { %v2497_v34 = vsub.f32 %v8014_v1, %v2470_v7  ;;  %6500 = vpow2.f32 %v2511_v9 }
 0x7c5   : > { %v2472_v56 = vpop.xlane.xlu0 %2471  ;;  %6502 = vpow2.f32 %v2513_v55 }
 0x7c6   : > { %v2517_v8 = vmul.f32 1.442695, %v2497_v34  ;;  %v2498_v51 = vsub.f32 %v8019_v10, %v2472_v56 }
 0x7c7   : > { %v2476_v60 = vpop.xlane.xlu1 %2475 }
 0x7c8   : > { %v2519_v40 = vmul.f32 1.442695, %v2498_v51  ;;  %v2500_v21 = vsub.f32 %v8024_v63, %v2476_v60  ;;  %6504 = vpow2.f32 %v2517_v8 }
 0x7ca   : > { %6506 = vpow2.f32 %v2519_v40  ;;  %v2523_v46 = vmul.f32 1.442695, %v2500_v21 }
 0x7cb   : > { %6508 = vpow2.f32 %v2521_v48  ;;  %v2482_v13 = vpop.xlane.xlu1 %2481  ;;  %v8129_v2 = vpop.eup %6496 }
 0x7cc   : > { %6510 = vpow2.f32 %v2523_v46  ;;  %10176 = vst [vmem:[#allocation94_spill] sm:$0xff] %v8129_v2  ;;  %v2503_v63 = vsub.f32 %v8029_v62, %v2482_v13  ;;  %v2890_v46 = vsel %vm723_vm1, %v8101_v50, 0 }
 0x7cd   : > { %v8131_v9 = vpop.eup %6498 }
 0x7ce   : > { %10177 = vst [vmem:[#allocation95_spill] sm:$0xff] %v8131_v9  ;;  %v2529_v60 = vmul.f32 1.442695, %v2503_v63 }
 0x7cf   : > { %v2478_v57 = vpop.xlane.xlu1 %2477 }
 0x7d0   : > { %v2501_v35 = vsub.f32 %v8034_v41, %v2478_v57  ;;  %v2893_v41 = vsel %vm723_vm1, %v7950_v61, 0 }
 0x7d1   : > { %v8133_v55 = vpop.eup %6500 }
 0x7d2   : > { %10178 = vst [vmem:[#allocation96_spill] sm:$0xff] %v8133_v55  ;;  %v8136_v11 = vpop.eup %6502  ;;  %v2573_v1 = vpack.c.bf16 %v8133_v55, %v8129_v2  ;;  %v2525_v7 = vmul.f32 1.442695, %v2501_v35 }
 0x7d3   : > { %10179 = vst [vmem:[#allocation97_spill] sm:$0xff] %v8136_v11  ;;  %v2484_v47 = vpop.xlane.xlu1 %2483  ;;  %v2574_v10 = vpack.c.bf16 %v8131_v9, %v8136_v11 }
 0x7d4   : > { %v2504_v40 = vsub.f32 %v8039_v36, %v2484_v47  ;;  %5990 = vmatprep.mubr.bf16.mxu1 %v2573_v1  ;;  %6512 = vpow2.f32 %v2525_v7 }
 0x7d5   : > { %v8144_v44 = vpop.eup %6504  ;;  %5991 = vmatmul.mubr.bf16.vlgmr.msra.gmra.mxu1 %v2574_v10  ;;  %v2836_v10 = vpop.permute.xlu0 %2835 }
 0x7d6   : > { %10180 = vst [vmem:[#allocation98_spill] sm:$0xff] %v8144_v44  ;;  %v2531_v56 = vmul.f32 1.442695, %v2504_v40  ;;  %6007 = vmatpush3.bf16.xpose.msra.mxu1 %v2893_v41  ;;  %v2878_v41 = vsel %vm723_vm1, %v2836_v10, 0 }
 0x7d7   : > { %v8148_v34 = vpop.eup %6506  ;;  %v2480_v8 = vpop.xlane.xlu1 %2479  ;;  %6315 = vmatprep.subr.msk.bf16.mxu1 %vm723_vm1, %v8101_v50 }
 0x7d8   : > { %10181 = vst [vmem:[#allocation99_spill] sm:$0xff] %v8148_v34  ;;  %v8150_v51 = vpop.eup %6508  ;;  %v2502_v62 = vsub.f32 %v8044_v15, %v2480_v8  ;;  %v2575_v36 = vpack.c.bf16 %v8148_v34, %v8144_v44  ;;  %6514 = vpow2.f32 %v2531_v56  ;;  %v2887_v15 = vsel %vm723_vm1, %v8107_v5, 0 }
 0x7d9   : > { %10182 = vst [vmem:[#allocation100_spill] sm:$0xff] %v8150_v51  ;;  %v8157_v48 = vpop.eup %6510 }
 0x7da   : > { %10183 = vst [vmem:[#allocation101_spill] sm:$0xff] %v8157_v48  ;;  %v2527_v61 = vmul.f32 1.442695, %v2502_v62  ;;  %5994 = vmatprep.mubr.bf16.mxu1 %v2575_v36  ;;  %v2576_v21 = vpack.c.bf16 %v8157_v48, %v8150_v51 }
 0x7db   : > { %v2838_v40 = vpop.permute.xlu1 %2837 }
 0x7dc   : > { %6516 = vpow2.f32 %v2527_v61  ;;  %v2881_v63 = vsel %vm723_vm1, %v2838_v40, 0 }
 0x7dd   : > { %6518 = vpow2.f32 %v2529_v60  ;;  %5995 = vmatmul.mubr.bf16.gmra.mxu1 %v2576_v21 }
 0x7de   : > { %6009 = vmatpush3.bf16.xpose.msra.mxu1 %v2890_v46 }
 0x7df   : > { %6316 = vmatprep.subr.msk.bf16.mxu1 %vm723_vm1, %v8107_v5  ;;  %v2884_v5 = vsel %vm723_vm1, %v8113_v16, 0 }
 0x7e1   : > { %v8167_v13 = vpop.eup %6512 }
 0x7e2   : > { %10184 = vst [vmem:[#allocation102_spill] sm:$0xff] %v8167_v13 }
 0x7e5   : > { %v8169_v57 = vpop.eup %6514 }
 0x7e6   : > { %6011 = vmatpush3.bf16.xpose.msra.mxu1 %v2887_v15  ;;  %10185 = vst [vmem:[#allocation103_spill] sm:$0xff] %v8169_v57 }
 0x7e7   : > { %6317 = vmatprep.subr.msk.bf16.mxu1 %vm723_vm1, %v8113_v16 }
 0x7e9   : > { %v8173_v35 = vpop.eup %6516 }
 0x7ea   : > { %10186 = vst [vmem:[#allocation104_spill] sm:$0xff] %v8173_v35  ;;  %v8175_v47 = vpop.eup %6518  ;;  %v2577_v50 = vpack.c.bf16 %v8173_v35, %v8167_v13 }
 0x7eb   : > { %10187 = vst [vmem:[#allocation105_spill] sm:$0xff] %v8175_v47  ;;  %v2578_v1 = vpack.c.bf16 %v8169_v57, %v8175_v47 }
 0x7ec   : > { %5998 = vmatprep.mubr.bf16.mxu1 %v2577_v50 }
 0x7ed   : > { %5999 = vmatmul.mubr.bf16.gmra.mxu1 %v2578_v1 }
 0x7ee   : > { %6013 = vmatpush3.bf16.xpose.msra.mxu1 %v2884_v5 }
 0x7ef   : > { %6318 = vmatprep.subr.msk.bf16.mxu1 %vm723_vm1, %v2838_v40 }
 0x7f6   : > { %6015 = vmatpush3.bf16.xpose.msra.mxu1 %v2881_v63 }
 0x7f7   : > { %6319 = vmatprep.subr.msk.bf16.mxu1 %vm723_vm1, %v2836_v10 }
 0x7fa   : > { %v2490_v7 = vpop.xlane.xlu0 %2489 }
 0x7fb   : > { %v2507_v61 = vsub.f32 %v8053_v59, %v2490_v7 }
 0x7fd   : > { %v2537_v5 = vmul.f32 1.442695, %v2507_v61 }
 0x7fe   : > { %v2486_v56 = vpop.xlane.xlu0 %2485  ;;  %6017 = vmatpush3.bf16.xpose.msra.mxu1 %v2878_v41 }
 0x7ff   : > { %v2505_v36 = vsub.f32 %v8058_v53, %v2486_v56 }
 0x801   : > { %v2533_v46 = vmul.f32 1.442695, %v2505_v36 }
 0x802   : > { %v2492_v8 = vpop.xlane.xlu0 %2491 }
 0x803   : > { %v2508_v60 = vsub.f32 %v8063_v58, %v2492_v8  ;;  %6520 = vpow2.f32 %v2533_v46 }
 0x805   : > { %v2539_v15 = vmul.f32 1.442695, %v2508_v60 }
 0x806   : > { %v2834_v62 = vpop.permute.xlu0 %2833 }
 0x807   : > { %6320 = vmatprep.subr.msk.bf16.mxu1 %vm723_vm1, %v2834_v62  ;;  %v2875_v16 = vsel %vm723_vm1, %v2834_v62, 0  ;;  %6522 = vpow2.f32 %v2539_v15 }
 0x808   : > { %6019 = vmatpush3.bf16.xpose.msra.mxu1 %v2875_v16 }
 0x80a   : > { %v2816_v21 = vpop.permute.xlu0 %2815 }
 0x80c   : > { %v2488_v50 = vpop.xlane.xlu1 %2487 }
 0x80d   : > { %v2506_v1 = vsub.f32 %v8068_v27, %v2488_v50 }
 0x80e   : > { %v2820_v40 = vpop.permute.xlu0 %2819 }
 0x80f   : > { %v2535_v10 = vmul.f32 1.442695, %v2506_v1 }
 0x810   : > { %v2832_v53 = vpop.permute.xlu1 %2831  ;;  %v8195_v27 = vpop.eup %6520 }
 0x811   : > { %6524 = vpow2.f32 %v2535_v10  ;;  %6321 = vmatprep.subr.msk.bf16.mxu1 %vm723_vm1, %v2832_v53  ;;  %v2872_v58 = vsel %vm723_vm1, %v2832_v53, 0  ;;  %10188 = vst [vmem:[#allocation106_spill] sm:$0xff] %v8195_v27 }
 0x812   : > { %6526 = vpow2.f32 %v2537_v5  ;;  %v2824_v63 = vpop.permute.xlu0 %2823  ;;  %6021 = vmatpush3.bf16.xpose.msra.mxu1 %v2872_v58 }
 0x814   : > { %v2818_v59 = vpop.permute.xlu1 %2817  ;;  %v8197_v62 = vpop.eup %6522 }
 0x815   : > { %10189 = vst [vmem:[#allocation107_spill] sm:$0xff] %v8197_v62 }
 0x816   : > { %v2828_v7 = vpop.permute.xlu0 %2827 }
 0x818   : > { %v2822_v41 = vpop.permute.xlu1 %2821 }
 0x81a   : > { %v3143_v56 = vpop.permute.xlu0 %3142 }
 0x81b   : > { %6038 = vmatprep.subr.bf16.mxu0 %v3143_v56 }
 0x81c   : > { %6039 = vmatpush3.bf16.msra.mxu0 %v3143_v56  ;;  %v2826_v8 = vpop.permute.xlu1 %2825 }
 0x81e   : > { %v8199_v36 = vpop.eup %6524  ;;  %v3139_v15 = vpop.permute.xlu0 %3138 }
 0x81f   : > { %10190 = vst [vmem:[#allocation108_spill] sm:$0xff] %v8199_v36  ;;  %v8201_v16 = vpop.eup %6526  ;;  %v2579_v60 = vpack.c.bf16 %v8199_v36, %v8195_v27 }
 0x820   : > { %10191 = vst [vmem:[#allocation109_spill] sm:$0xff] %v8201_v16  ;;  %v2830_v61 = vpop.permute.xlu1 %2829  ;;  %v2580_v46 = vpack.c.bf16 %v8197_v62, %v8201_v16 }
 0x821   : > { %6002 = vmatprep.mubr.bf16.mxu1 %v2579_v60 }
 0x822   : > { %6003 = vmatmul.mubr.bf16.gmra.mxu1 %v2580_v46  ;;  %v3137_v1 = vpop.permute.xlu0 %3136 }
 0x823   : > { %6022 = vmatprep.mubr.msk.bf16.mxu1 %vm723_vm1, %v2816_v21 }
 0x824   : > { %v3141_v50 = vpop.permute.xlu1 %3140 }
 0x825   : > { %6040 = vmatprep.subr.bf16.mxu0 %v3141_v50 }
 0x826   : > { %6041 = vmatpush3.bf16.msra.mxu0 %v3141_v50  ;;  %v3135_v5 = vpop.permute.xlu0 %3134 }
 0x827   : > { %6042 = vmatprep.subr.bf16.mxu0 %v3139_v15 }
 0x828   : > { %v3133_v10 = vpop.permute.xlu1 %3132 }
 0x82a   : > { %6023 = vmatmul.mubr.msk.bf16.vlgmr.msra.gmra.mxu1 %vm723_vm1, %v2818_v59  ;;  %6043 = vmatpush3.bf16.msra.mxu0 %v3139_v15  ;;  %v3131_v21 = vpop.permute.xlu0 %3130 }
 0x82b   : > { %6026 = vmatprep.mubr.msk.bf16.mxu1 %vm723_vm1, %v2820_v40  ;;  %6044 = vmatprep.subr.bf16.mxu0 %v3137_v1 }
 0x82c   : > { %v3129_v53 = vpop.permute.xlu1 %3128 }
 0x82e   : > { %6045 = vmatpush3.bf16.msra.mxu0 %v3137_v1  ;;  %v8214_v40 = vpop.permute.xlu0 %3392 }
 0x82f   : > { %6046 = vmatprep.subr.bf16.mxu0 %v3135_v5 }
 0x832   : > { %6027 = vmatmul.mubr.msk.bf16.gmra.mxu1 %vm723_vm1, %v2822_v41  ;;  %6047 = vmatpush3.bf16.msra.mxu0 %v3135_v5 }
 0x833   : > { %6030 = vmatprep.mubr.msk.bf16.mxu1 %vm723_vm1, %v2824_v63  ;;  %6048 = vmatprep.subr.bf16.mxu0 %v3133_v10 }
 0x836   : > { %6049 = vmatpush3.bf16.msra.mxu0 %v3133_v10 }
 0x837   : > { %6050 = vmatprep.subr.bf16.mxu0 %v3131_v21 }
 0x83a   : > { %6031 = vmatmul.mubr.msk.bf16.gmra.mxu1 %vm723_vm1, %v2826_v8  ;;  %6051 = vmatpush3.bf16.msra.mxu0 %v3131_v21 }
 0x83b   : > { %6034 = vmatprep.mubr.msk.bf16.mxu1 %vm723_vm1, %v2828_v7  ;;  %6052 = vmatprep.subr.bf16.mxu0 %v3129_v53 }
 0x83e   : > { %6053 = vmatpush3.bf16.msra.mxu0 %v3129_v53 }
 0x83f   : > { %6322 = vmatprep.subr.msk.bf16.mxu0 %vm723_vm1, %v8214_v40 }
 0x842   : > { %6035 = vmatmul.mubr.msk.bf16.gmra.mxu1 %vm723_vm1, %v2830_v61 }
 0x895   : > { %v8219_v58 = vpop.f32.mrf.mxu1 }
 0x896   : > { %10192 = vst [vmem:[#allocation110_spill] sm:$0xff] %v8219_v58 }
 0x897   : > { %v8221_v63 = vpop.f32.mrf.mxu1 }
 0x898   : > { %10193 = vst [vmem:[#allocation111_spill] sm:$0xff] %v8221_v63 }
 0x899   : > { %v8223_v59 = vpop.f32.mrf.mxu1 }
 0x89a   : > { %10194 = vst [vmem:[#allocation112_spill] sm:$0xff] %v8223_v59 }
 0x89b   : > { %v8225_v41 = vpop.f32.mrf.mxu1 }
 0x89c   : > { %10195 = vst [vmem:[#allocation113_spill] sm:$0xff] %v8225_v41 }
 0x89d   : > { %v8227_v56 = vpop.f32.mrf.mxu1 }
 0x89e   : > { %10196 = vst [vmem:[#allocation114_spill] sm:$0xff] %v8227_v56 }
 0x89f   : > { %v8229_v7 = vpop.f32.mrf.mxu1 }
 0x8a0   : > { %10197 = vst [vmem:[#allocation115_spill] sm:$0xff] %v8229_v7 }
 0x8a1   : > { %v8231_v8 = vpop.f32.mrf.mxu1 }
 0x8a2   : > { %10198 = vst [vmem:[#allocation116_spill] sm:$0xff] %v8231_v8 }
 0x8a3   : > { %v8233_v60 = vpop.f32.mrf.mxu1 }
 0x8a4   : > { %10199 = vst [vmem:[#allocation117_spill] sm:$0xff] %v8233_v60 }
 0x8ad   : > { %v8235_v46 = vpop.f32.mrf.mxu1 }
 0x8ae   : > { %10200 = vst [vmem:[#allocation118_spill] sm:$0xff] %v8235_v46 }
 0x8af   : > { %v8237_v15 = vpop.f32.mrf.mxu1 }
 0x8b0   : > { %10201 = vst [vmem:[#allocation119_spill] sm:$0xff] %v8237_v15 }
 0x8b1   : > { %v8239_v61 = vpop.f32.mrf.mxu1 }
 0x8b2   : > { %10202 = vst [vmem:[#allocation120_spill] sm:$0xff] %v8239_v61 }
 0x8b3   : > { %v8241_v50 = vpop.f32.mrf.mxu1 }
 0x8b4   : > { %10203 = vst [vmem:[#allocation121_spill] sm:$0xff] %v8241_v50 }
 0x8e2   : > { %v8243_v1 = vpop.f32.mrf.mxu1 }
 0x8e3   : > { %10204 = vst [vmem:[#allocation122_spill] sm:$0xff] %v8243_v1 }
 0x8e4   : > { %v8245_v5 = vpop.f32.mrf.mxu1 }
 0x8e5   : > { %10205 = vst [vmem:[#allocation123_spill] sm:$0xff] %v8245_v5 }
 0x8e6   : > { %v8247_v10 = vpop.f32.mrf.mxu1 }
 0x8e7   : > { %10206 = vst [vmem:[#allocation124_spill] sm:$0xff] %v8247_v10 }
 0x8e8   : > { %v8249_v21 = vpop.f32.mrf.mxu1 }
 0x8e9   : > { %10207 = vst [vmem:[#allocation125_spill] sm:$0xff] %v8249_v21 }
 0x8ea   : > { %v6024_v53 = vpop.f32.mrf.mxu1 }
 0x8eb   : > { %v8253_v56 = vsel %vm722_vm2, %v6024_v53, -inf }
 0x8ec   : > { %3012 = vmax.xlane.f32.xlu1 %v8253_v56  ;;  %v2929_v46 = vpop.f32.mrf.mxu1 }
 0x8ed   : > { %v8258_v15 = vsel %vm722_vm2, %v2929_v46, -inf }
 0x8ee   : > { %3008 = vmax.xlane.f32.xlu0 %v8258_v15  ;;  %v6025_v1 = vpop.f32.mrf.mxu1 }
 0x8ef   : > { %v8263_v10 = vsel %vm722_vm2, %v6025_v1, -inf }
 0x8f0   : > { %3014 = vmax.xlane.f32.xlu1 %v8263_v10  ;;  %v2932_v5 = vpop.f32.mrf.mxu1 }
 0x8f1   : > { %v8268_v53 = vsel %vm722_vm2, %v2932_v5, -inf }
 0x8f2   : > { %v6028_v21 = vpop.f32.mrf.mxu1 }
 0x8f3   : > { %v8272_v61 = vsel %vm722_vm2, %v6028_v21, -inf }
 0x8f4   : > { %3010 = vmax.xlane.f32.xlu1 %v8268_v53  ;;  %3020 = vmax.xlane.f32.xlu0 %v8272_v61  ;;  %v2945_v46 = vpop.f32.mrf.mxu1 }
 0x8f5   : > { %v8278_v1 = vsel %vm722_vm2, %v2945_v46, -inf }
 0x8f6   : > { %v6029_v50 = vpop.f32.mrf.mxu1 }
 0x8f7   : > { %v8288_v21 = vsel %vm722_vm2, %v6029_v50, -inf }
 0x8f8   : > { %3016 = vmax.xlane.f32.xlu1 %v8278_v1  ;;  %v2948_v7 = vpop.f32.mrf.mxu1 }
 0x8f9   : > { %v8283_v5 = vsel %vm722_vm2, %v2948_v7, -inf }
 0x8fa   : > { %3018 = vmax.xlane.f32.xlu0 %v8283_v5  ;;  %v6032_v8 = vpop.f32.mrf.mxu1 }
 0x8fb   : > { %v8293_v46 = vsel %vm722_vm2, %v6032_v8, -inf }
 0x8fc   : > { %3022 = vmax.xlane.f32.xlu1 %v8288_v21  ;;  %v2961_v60 = vpop.f32.mrf.mxu1 }
 0x8fd   : > { %v8298_v7 = vsel %vm722_vm2, %v2961_v60, -inf }
 0x8fe   : > { %v6033_v59 = vpop.f32.mrf.mxu1 }
 0x8ff   : > { %v8303_v50 = vsel %vm722_vm2, %v6033_v59, -inf }
 0x900   : > { %3028 = vmax.xlane.f32.xlu1 %v8293_v46  ;;  %v2964_v41 = vpop.f32.mrf.mxu1 }
 0x901   : > { %v8308_v8 = vsel %vm722_vm2, %v2964_v41, -inf }
 0x902   : > { %v6036_v60 = vpop.f32.mrf.mxu1 }
 0x903   : > { %v8317_v59 = vsel %vm722_vm2, %v6036_v60, -inf }
 0x904   : > { %3024 = vmax.xlane.f32.xlu1 %v8298_v7  ;;  %v2977_v58 = vpop.f32.mrf.mxu1 }
 0x905   : > { %v8322_v41 = vsel %vm722_vm2, %v2977_v58, -inf  ;;  %v8371_v58 = vpop.permute.xlu1 %3388 }
 0x906   : > { %v6037_v63 = vpop.f32.mrf.mxu1 }
 0x907   : > { %v8327_v16 = vsel %vm722_vm2, %v6037_v63, -inf }
 0x908   : > { %3030 = vmax.xlane.f32.xlu1 %v8303_v50  ;;  %v2980_v27 = vpop.f32.mrf.mxu1 }
 0x909   : > { %v8332_v60 = vsel %vm722_vm2, %v2980_v27, -inf  ;;  %v8365_v27 = vpop.permute.xlu0 %3390 }
 0x90c   : > { %3026 = vmax.xlane.f32.xlu1 %v8308_v8 }
 0x90d   : > { %v8377_v63 = vpop.permute.xlu0 %3386 }
 0x910   : > { %3382 = vrot.lane.b32.xlu0 %v7128_v12, %s6940_s25 }
 0x91d   : > { %3384 = vrot.lane.b32.xlu1 %v7121_v6, %s6940_s25 }
 0x92f   : > { %3036 = vmax.xlane.f32.xlu0 %v8317_v59 }
 0x933   : > { %3032 = vmax.xlane.f32.xlu0 %v8322_v41 }
 0x937   : > { %3038 = vmax.xlane.f32.xlu0 %v8327_v16 }
 0x941   : > { %3034 = vmax.xlane.f32.xlu1 %v8332_v60 }
 0x94d   : > { %3380 = vrot.lane.b32.xlu0 %v7063_v19, %s6940_s25 }
 0x951   : > { %3362 = vrot.lane.b32.xlu0 %v7069_v25, %s6940_s25 }
 0x952   : > { %3378 = vrot.lane.b32.xlu1 %v7158_v26, %s6940_s25 }
 0x955   : > { %3366 = vrot.lane.b32.xlu0 %v7181_v31, %s6940_s25 }
 0x956   : > { %3364 = vrot.lane.b32.xlu1 %v7067_v22, %s6940_s25 }
 0x959   : > { %3370 = vrot.lane.b32.xlu0 %v7190_v33, %s6940_s25 }
 0x95a   : > { %3368 = vrot.lane.b32.xlu1 %v7077_v32, %s6940_s25 }
 0x95d   : > { %3374 = vrot.lane.b32.xlu0 %v7198_v29, %s6940_s25 }
 0x95e   : > { %3372 = vrot.lane.b32.xlu1 %v7087_v42, %s6940_s25 }
 0x961   : > { %3689 = vrot.lane.b32.xlu0 %v7132_v14, %s6940_s25 }
 0x962   : > { %3376 = vrot.lane.b32.xlu1 %v7103_v54, %s6940_s25 }
 0x965   : > { %3685 = vrot.lane.b32.xlu0 %v7140_v18, %s6940_s25 }
 0x966   : > { %3687 = vrot.lane.b32.xlu1 %v7137_v17, %s6940_s25 }
 0x969   : > { %3683 = vrot.lane.b32.xlu0 %v7146_v23, %s6940_s25 }
 0x96a   : > { %3679 = vrot.lane.b32.xlu1 %v7162_v28, %s6940_s25 }
 0x96d   : > { %3681 = vrot.lane.b32.xlu0 %v7152_v24, %s6940_s25 }
 0x96e   : > { %3675 = vrot.lane.b32.xlu1 %v7174_v20, %s6940_s25 }
 0x971   : > { %3677 = vrot.lane.b32.xlu0 %v7168_v30, %s6940_s25 }
 0x972   : > { %3935 = vrot.lane.b32.xlu1 %v7083_v39, %s6941_s26 }
 0x975   : > { %3939 = vrot.lane.b32.xlu0 %v7093_v49, %s6941_s26  ;;  %v3013_v62 = vpop.xlane.xlu1 %3012 }
 0x976   : > { %v3042_v35 = vsub.f32 %v8253_v56, %v3013_v62 }
 0x977   : > { %v3009_v36 = vpop.xlane.xlu0 %3008 }
 0x978   : > { %v3040_v47 = vsub.f32 %v8258_v15, %v3009_v36  ;;  %v3060_v2 = vmul.f32 1.442695, %v3042_v35 }
 0x979   : > { %3937 = vrot.lane.b32.xlu0 %v7095_v52, %s6941_s26  ;;  %v3015_v13 = vpop.xlane.xlu1 %3014 }
 0x97a   : > { %v3043_v57 = vsub.f32 %v8263_v10, %v3015_v13  ;;  %v3056_v51 = vmul.f32 1.442695, %v3040_v47 }
 0x97c   : > { %v3062_v48 = vmul.f32 1.442695, %v3043_v57  ;;  %6528 = vpow2.f32 %v3056_v51 }
 0x97d   : > { %3933 = vrot.lane.b32.xlu0 %v7115_v0, %s6941_s26  ;;  %v3011_v44 = vpop.xlane.xlu1 %3010  ;;  %v3021_v34 = vpop.xlane.xlu0 %3020 }
 0x97e   : > { %v3041_v11 = vsub.f32 %v8268_v53, %v3011_v44  ;;  %v3046_v36 = vsub.f32 %v8272_v61, %v3021_v34  ;;  %6530 = vpow2.f32 %v3062_v48 }
 0x980   : > { %v3058_v9 = vmul.f32 1.442695, %v3041_v11  ;;  %v3068_v10 = vmul.f32 1.442695, %v3046_v36 }
 0x981   : > { %v3017_v15 = vpop.xlane.xlu1 %3016 }
 0x982   : > { %v3044_v13 = vsub.f32 %v8278_v1, %v3017_v15  ;;  %6532 = vpow2.f32 %v3058_v9 }
 0x983   : > { %v3019_v62 = vpop.xlane.xlu0 %3018  ;;  %6534 = vpow2.f32 %v3060_v2 }
 0x984   : > { %v3064_v47 = vmul.f32 1.442695, %v3044_v13  ;;  %v3045_v56 = vsub.f32 %v8283_v5, %v3019_v62 }
 0x985   : > { %v3023_v57 = vpop.xlane.xlu1 %3022 }
 0x986   : > { %v3066_v55 = vmul.f32 1.442695, %v3045_v56  ;;  %v3047_v44 = vsub.f32 %v8288_v21, %v3023_v57  ;;  %6536 = vpow2.f32 %v3064_v47 }
 0x988   : > { %6538 = vpow2.f32 %v3066_v55  ;;  %v3070_v11 = vmul.f32 1.442695, %v3047_v44 }
 0x989   : > { %6540 = vpow2.f32 %v3068_v10  ;;  %v3029_v34 = vpop.xlane.xlu1 %3028  ;;  %v8393_v48 = vpop.eup %6528 }
 0x98a   : > { %6542 = vpow2.f32 %v3070_v11  ;;  %v3050_v21 = vsub.f32 %v8293_v46, %v3029_v34  ;;  %v3437_v11 = vsel %vm723_vm1, %v8365_v27, 0 }
 0x98b   : > { %v8395_v9 = vpop.eup %6530 }
 0x98c   : > { %v3076_v57 = vmul.f32 1.442695, %v3050_v21 }
 0x98d   : > { %v3025_v51 = vpop.xlane.xlu1 %3024 }
 0x98e   : > { %v3048_v35 = vsub.f32 %v8298_v7, %v3025_v51  ;;  %v3440_v7 = vsel %vm723_vm1, %v8214_v40, 0 }
 0x98f   : > { %v8397_v2 = vpop.eup %6532 }
 0x990   : > { %v8400_v61 = vpop.eup %6534  ;;  %v3120_v1 = vpack.c.bf16 %v8397_v2, %v8393_v48  ;;  %v3072_v15 = vmul.f32 1.442695, %v3048_v35 }
 0x991   : > { %v3031_v53 = vpop.xlane.xlu1 %3030  ;;  %v3121_v5 = vpack.c.bf16 %v8395_v9, %v8400_v61 }
 0x992   : > { %v3051_v55 = vsub.f32 %v8303_v50, %v3031_v53  ;;  %6054 = vmatprep.mubr.bf16.mxu0 %v3120_v1  ;;  %6544 = vpow2.f32 %v3072_v15 }
 0x993   : > { %v8408_v36 = vpop.eup %6536  ;;  %6055 = vmatmul.mubr.bf16.vlgmr.msra.gmra.mxu0 %v3121_v5  ;;  %v3383_v5 = vpop.permute.xlu0 %3382 }
 0x994   : > { %v3078_v62 = vmul.f32 1.442695, %v3051_v55  ;;  %6071 = vmatpush3.bf16.xpose.msra.mxu0 %v3440_v7  ;;  %v3425_v7 = vsel %vm723_vm1, %v3383_v5, 0 }
 0x995   : > { %v8412_v13 = vpop.eup %6538  ;;  %v3027_v47 = vpop.xlane.xlu1 %3026  ;;  %6323 = vmatprep.subr.msk.bf16.mxu0 %vm723_vm1, %v8365_v27 }
 0x996   : > { %v8414_v56 = vpop.eup %6540  ;;  %v3049_v46 = vsub.f32 %v8308_v8, %v3027_v47  ;;  %v3122_v50 = vpack.c.bf16 %v8412_v13, %v8408_v36  ;;  %6546 = vpow2.f32 %v3078_v62  ;;  %v3434_v8 = vsel %vm723_vm1, %v8371_v58, 0 }
 0x997   : > { %10208 = vst [vmem:[#allocation126_spill] sm:$0xff] %v8414_v56  ;;  %v8421_v10 = vpop.eup %6542 }
 0x998   : > { %v3074_v40 = vmul.f32 1.442695, %v3049_v46  ;;  %6058 = vmatprep.mubr.bf16.mxu0 %v3122_v50  ;;  %v3123_v44 = vpack.c.bf16 %v8421_v10, %v8414_v56 }
 0x999   : > { %v3385_v55 = vpop.permute.xlu1 %3384 }
 0x99a   : > { %6548 = vpow2.f32 %v3074_v40  ;;  %v3428_v21 = vsel %vm723_vm1, %v3385_v55, 0 }
 0x99b   : > { %6550 = vpow2.f32 %v3076_v57  ;;  %6059 = vmatmul.mubr.bf16.gmra.mxu0 %v3123_v44 }
 0x99c   : > { %6073 = vmatpush3.bf16.xpose.msra.mxu0 %v3437_v11 }
 0x99d   : > { %6324 = vmatprep.subr.msk.bf16.mxu0 %vm723_vm1, %v8371_v58  ;;  %v3431_v58 = vsel %vm723_vm1, %v8377_v63, 0 }
 0x99f   : > { %v8431_v34 = vpop.eup %6544 }
 0x9a0   : > { %10209 = vst [vmem:[#allocation127_spill] sm:$0xff] %v8431_v34 }
 0x9a3   : > { %v8433_v51 = vpop.eup %6546 }
 0x9a4   : > { %6075 = vmatpush3.bf16.xpose.msra.mxu0 %v3434_v8  ;;  %10210 = vst [vmem:[#allocation128_spill] sm:$0xff] %v8433_v51 }
 0x9a5   : > { %6325 = vmatprep.subr.msk.bf16.mxu0 %vm723_vm1, %v8377_v63 }
 0x9a7   : > { %v8437_v35 = vpop.eup %6548 }
 0x9a8   : > { %10211 = vst [vmem:[#allocation129_spill] sm:$0xff] %v8437_v35  ;;  %v8439_v53 = vpop.eup %6550  ;;  %v3124_v27 = vpack.c.bf16 %v8437_v35, %v8431_v34 }
 0x9a9   : > { %10212 = vst [vmem:[#allocation130_spill] sm:$0xff] %v8439_v53  ;;  %v3125_v1 = vpack.c.bf16 %v8433_v51, %v8439_v53 }
 0x9aa   : > { %6062 = vmatprep.mubr.bf16.mxu0 %v3124_v27 }
 0x9ab   : > { %6063 = vmatmul.mubr.bf16.gmra.mxu0 %v3125_v1 }
 0x9ac   : > { %6077 = vmatpush3.bf16.xpose.msra.mxu0 %v3431_v58 }
 0x9ad   : > { %6326 = vmatprep.subr.msk.bf16.mxu0 %vm723_vm1, %v3385_v55 }
 0x9b4   : > { %6079 = vmatpush3.bf16.xpose.msra.mxu0 %v3428_v21 }
 0x9b5   : > { %6327 = vmatprep.subr.msk.bf16.mxu0 %vm723_vm1, %v3383_v5 }
 0x9b8   : > { %v3037_v15 = vpop.xlane.xlu0 %3036 }
 0x9b9   : > { %v3054_v40 = vsub.f32 %v8317_v59, %v3037_v15 }
 0x9bb   : > { %v3084_v58 = vmul.f32 1.442695, %v3054_v40 }
 0x9bc   : > { %v3033_v62 = vpop.xlane.xlu0 %3032  ;;  %6081 = vmatpush3.bf16.xpose.msra.mxu0 %v3425_v7 }
 0x9bd   : > { %v3052_v50 = vsub.f32 %v8322_v41, %v3033_v62 }
 0x9bf   : > { %v3080_v11 = vmul.f32 1.442695, %v3052_v50 }
 0x9c0   : > { %v3039_v47 = vpop.xlane.xlu0 %3038 }
 0x9c1   : > { %v3055_v57 = vsub.f32 %v8327_v16, %v3039_v47  ;;  %6552 = vpow2.f32 %v3080_v11 }
 0x9c3   : > { %v3086_v8 = vmul.f32 1.442695, %v3055_v57 }
 0x9c4   : > { %v3381_v46 = vpop.permute.xlu0 %3380 }
 0x9c5   : > { %6328 = vmatprep.subr.msk.bf16.mxu0 %vm723_vm1, %v3381_v46  ;;  %v3422_v63 = vsel %vm723_vm1, %v3381_v46, 0  ;;  %6554 = vpow2.f32 %v3086_v8 }
 0x9c6   : > { %6083 = vmatpush3.bf16.xpose.msra.mxu0 %v3422_v63 }
 0x9c8   : > { %v3363_v44 = vpop.permute.xlu0 %3362 }
 0x9ca   : > { %v3035_v27 = vpop.xlane.xlu1 %3034 }
 0x9cb   : > { %v3053_v1 = vsub.f32 %v8332_v60, %v3035_v27 }
 0x9cc   : > { %v3367_v55 = vpop.permute.xlu0 %3366 }
 0x9cd   : > { %v3082_v5 = vmul.f32 1.442695, %v3053_v1 }
 0x9ce   : > { %v3379_v41 = vpop.permute.xlu1 %3378  ;;  %v8459_v60 = vpop.eup %6552 }
 0x9cf   : > { %6556 = vpow2.f32 %v3082_v5  ;;  %6329 = vmatprep.subr.msk.bf16.mxu0 %vm723_vm1, %v3379_v41  ;;  %v3419_v16 = vsel %vm723_vm1, %v3379_v41, 0  ;;  %10213 = vst [vmem:[#allocation131_spill] sm:$0xff] %v8459_v60 }
 0x9d0   : > { %6558 = vpow2.f32 %v3084_v58  ;;  %v3371_v21 = vpop.permute.xlu0 %3370  ;;  %6085 = vmatpush3.bf16.xpose.msra.mxu0 %v3419_v16 }
 0x9d2   : > { %v3365_v59 = vpop.permute.xlu1 %3364  ;;  %v8461_v46 = vpop.eup %6554 }
 0x9d3   : > { %10214 = vst [vmem:[#allocation132_spill] sm:$0xff] %v8461_v46 }
 0x9d4   : > { %v3375_v15 = vpop.permute.xlu0 %3374 }
 0x9d6   : > { %v3369_v7 = vpop.permute.xlu1 %3368 }
 0x9d8   : > { %v3690_v62 = vpop.permute.xlu0 %3689 }
 0x9d9   : > { %6102 = vmatprep.subr.bf16.mxu1 %v3690_v62 }
 0x9da   : > { %6103 = vmatpush3.bf16.msra.mxu1 %v3690_v62  ;;  %v3373_v47 = vpop.permute.xlu1 %3372 }
 0x9dc   : > { %v8463_v50 = vpop.eup %6556  ;;  %v3686_v8 = vpop.permute.xlu0 %3685 }
 0x9dd   : > { %10215 = vst [vmem:[#allocation133_spill] sm:$0xff] %v8463_v50  ;;  %v8465_v63 = vpop.eup %6558  ;;  %v3126_v57 = vpack.c.bf16 %v8463_v50, %v8459_v60 }
 0x9de   : > { %10216 = vst [vmem:[#allocation134_spill] sm:$0xff] %v8465_v63  ;;  %v3377_v40 = vpop.permute.xlu1 %3376  ;;  %v3127_v11 = vpack.c.bf16 %v8461_v46, %v8465_v63 }
 0x9df   : > { %6066 = vmatprep.mubr.bf16.mxu0 %v3126_v57 }
 0x9e0   : > { %6067 = vmatmul.mubr.bf16.gmra.mxu0 %v3127_v11  ;;  %v3684_v1 = vpop.permute.xlu0 %3683 }
 0x9e1   : > { %6086 = vmatprep.mubr.msk.bf16.mxu0 %vm723_vm1, %v3363_v44 }
 0x9e2   : > { %v3688_v27 = vpop.permute.xlu1 %3687 }
 0x9e3   : > { %6104 = vmatprep.subr.bf16.mxu1 %v3688_v27 }
 0x9e4   : > { %6105 = vmatpush3.bf16.msra.mxu1 %v3688_v27  ;;  %v3682_v58 = vpop.permute.xlu0 %3681 }
 0x9e5   : > { %6106 = vmatprep.subr.bf16.mxu1 %v3686_v8 }
 0x9e6   : > { %v3680_v5 = vpop.permute.xlu1 %3679 }
 0x9e8   : > { %6087 = vmatmul.mubr.msk.bf16.vlgmr.msra.gmra.mxu0 %vm723_vm1, %v3365_v59  ;;  %6107 = vmatpush3.bf16.msra.mxu1 %v3686_v8  ;;  %v3678_v44 = vpop.permute.xlu0 %3677 }
 0x9e9   : > { %6090 = vmatprep.mubr.msk.bf16.mxu0 %vm723_vm1, %v3367_v55  ;;  %6108 = vmatprep.subr.bf16.mxu1 %v3684_v1 }
 0x9ea   : > { %v3676_v41 = vpop.permute.xlu1 %3675 }
 0x9ec   : > { %6109 = vmatpush3.bf16.msra.mxu1 %v3684_v1  ;;  %v8478_v55 = vpop.permute.xlu0 %3939 }
 0x9ed   : > { %6110 = vmatprep.subr.bf16.mxu1 %v3682_v58 }
 0x9f0   : > { %6091 = vmatmul.mubr.msk.bf16.gmra.mxu0 %vm723_vm1, %v3369_v7  ;;  %6111 = vmatpush3.bf16.msra.mxu1 %v3682_v58 }
 0x9f1   : > { %6094 = vmatprep.mubr.msk.bf16.mxu0 %vm723_vm1, %v3371_v21  ;;  %6112 = vmatprep.subr.bf16.mxu1 %v3680_v5 }
 0x9f4   : > { %6113 = vmatpush3.bf16.msra.mxu1 %v3680_v5 }
 0x9f5   : > { %6114 = vmatprep.subr.bf16.mxu1 %v3678_v44 }
 0x9f8   : > { %6095 = vmatmul.mubr.msk.bf16.gmra.mxu0 %vm723_vm1, %v3373_v47  ;;  %6115 = vmatpush3.bf16.msra.mxu1 %v3678_v44 }
 0x9f9   : > { %6098 = vmatprep.mubr.msk.bf16.mxu0 %vm723_vm1, %v3375_v15  ;;  %6116 = vmatprep.subr.bf16.mxu1 %v3676_v41 }
 0x9fc   : > { %6117 = vmatpush3.bf16.msra.mxu1 %v3676_v41 }
 0x9fd   : > { %6330 = vmatprep.subr.msk.bf16.mxu1 %vm723_vm1, %v8478_v55 }
 0xa00   : > { %6099 = vmatmul.mubr.msk.bf16.gmra.mxu0 %vm723_vm1, %v3377_v40 }
 0xa53   : > { %v8483_v16 = vpop.f32.mrf.mxu0 }
 0xa54   : > { %10217 = vst [vmem:[#allocation135_spill] sm:$0xff] %v8483_v16 }
 0xa55   : > { %v8485_v21 = vpop.f32.mrf.mxu0 }
 0xa56   : > { %10218 = vst [vmem:[#allocation136_spill] sm:$0xff] %v8485_v21 }
 0xa57   : > { %v8487_v59 = vpop.f32.mrf.mxu0 }
 0xa58   : > { %10219 = vst [vmem:[#allocation137_spill] sm:$0xff] %v8487_v59 }
 0xa59   : > { %v8489_v7 = vpop.f32.mrf.mxu0 }
 0xa5a   : > { %10220 = vst [vmem:[#allocation138_spill] sm:$0xff] %v8489_v7 }
 0xa5b   : > { %v8491_v62 = vpop.f32.mrf.mxu0 }
 0xa5c   : > { %10221 = vst [vmem:[#allocation139_spill] sm:$0xff] %v8491_v62 }
 0xa5d   : > { %v8493_v15 = vpop.f32.mrf.mxu0 }
 0xa5e   : > { %10222 = vst [vmem:[#allocation140_spill] sm:$0xff] %v8493_v15 }
 0xa5f   : > { %v8495_v47 = vpop.f32.mrf.mxu0 }
 0xa60   : > { %10223 = vst [vmem:[#allocation141_spill] sm:$0xff] %v8495_v47 }
 0xa61   : > { %v8497_v57 = vpop.f32.mrf.mxu0 }
 0xa62   : > { %10224 = vst [vmem:[#allocation142_spill] sm:$0xff] %v8497_v57 }
 0xa6b   : > { %v8499_v11 = vpop.f32.mrf.mxu0 }
 0xa6c   : > { %10225 = vst [vmem:[#allocation143_spill] sm:$0xff] %v8499_v11 }
 0xa6d   : > { %v8501_v8 = vpop.f32.mrf.mxu0 }
 0xa6e   : > { %10226 = vst [vmem:[#allocation144_spill] sm:$0xff] %v8501_v8 }
 0xa6f   : > { %v8503_v40 = vpop.f32.mrf.mxu0 }
 0xa70   : > { %10227 = vst [vmem:[#allocation145_spill] sm:$0xff] %v8503_v40 }
 0xa71   : > { %v8505_v27 = vpop.f32.mrf.mxu0 }
 0xa72   : > { %10228 = vst [vmem:[#allocation146_spill] sm:$0xff] %v8505_v27 }
 0xaa0   : > { %v8507_v1 = vpop.f32.mrf.mxu0 }
 0xaa1   : > { %10229 = vst [vmem:[#allocation147_spill] sm:$0xff] %v8507_v1 }
 0xaa2   : > { %v8509_v58 = vpop.f32.mrf.mxu0 }
 0xaa3   : > { %10230 = vst [vmem:[#allocation148_spill] sm:$0xff] %v8509_v58 }
 0xaa4   : > { %v8511_v5 = vpop.f32.mrf.mxu0 }
 0xaa5   : > { %10231 = vst [vmem:[#allocation149_spill] sm:$0xff] %v8511_v5 }
 0xaa6   : > { %v8513_v44 = vpop.f32.mrf.mxu0 }
 0xaa7   : > { %10232 = vst [vmem:[#allocation150_spill] sm:$0xff] %v8513_v44 }
 0xaa8   : > { %v6088_v41 = vpop.f32.mrf.mxu0 }
 0xaa9   : > { %v8517_v62 = vsel %vm722_vm2, %v6088_v41, -inf }
 0xaaa   : > { %3559 = vmax.xlane.f32.xlu1 %v8517_v62  ;;  %v3476_v11 = vpop.f32.mrf.mxu0 }
 0xaab   : > { %v8522_v8 = vsel %vm722_vm2, %v3476_v11, -inf }
 0xaac   : > { %3555 = vmax.xlane.f32.xlu0 %v8522_v8  ;;  %v6089_v1 = vpop.f32.mrf.mxu0 }
 0xaad   : > { %v8527_v58 = vsel %vm722_vm2, %v6089_v1, -inf }
 0xaae   : > { %3561 = vmax.xlane.f32.xlu1 %v8527_v58  ;;  %v3479_v5 = vpop.f32.mrf.mxu0 }
 0xaaf   : > { %v8532_v41 = vsel %vm722_vm2, %v3479_v5, -inf }
 0xab0   : > { %v6092_v44 = vpop.f32.mrf.mxu0 }
 0xab1   : > { %v8536_v40 = vsel %vm722_vm2, %v6092_v44, -inf }
 0xab2   : > { %3557 = vmax.xlane.f32.xlu1 %v8532_v41  ;;  %3567 = vmax.xlane.f32.xlu0 %v8536_v40  ;;  %v3492_v11 = vpop.f32.mrf.mxu0 }
 0xab3   : > { %v8542_v1 = vsel %vm722_vm2, %v3492_v11, -inf }
 0xab4   : > { %v6093_v27 = vpop.f32.mrf.mxu0 }
 0xab5   : > { %v8552_v44 = vsel %vm722_vm2, %v6093_v27, -inf }
 0xab6   : > { %3563 = vmax.xlane.f32.xlu1 %v8542_v1  ;;  %v3495_v15 = vpop.f32.mrf.mxu0 }
 0xab7   : > { %v8547_v5 = vsel %vm722_vm2, %v3495_v15, -inf }
 0xab8   : > { %3565 = vmax.xlane.f32.xlu0 %v8547_v5  ;;  %v6096_v47 = vpop.f32.mrf.mxu0 }
 0xab9   : > { %v8557_v11 = vsel %vm722_vm2, %v6096_v47, -inf }
 0xaba   : > { %3569 = vmax.xlane.f32.xlu1 %v8552_v44  ;;  %v3508_v57 = vpop.f32.mrf.mxu0 }
 0xabb   : > { %v8562_v15 = vsel %vm722_vm2, %v3508_v57, -inf }
 0xabc   : > { %v6097_v59 = vpop.f32.mrf.mxu0 }
 0xabd   : > { %v8567_v27 = vsel %vm722_vm2, %v6097_v59, -inf }
 0xabe   : > { %3575 = vmax.xlane.f32.xlu1 %v8557_v11  ;;  %v3511_v7 = vpop.f32.mrf.mxu0 }
 0xabf   : > { %v8572_v47 = vsel %vm722_vm2, %v3511_v7, -inf }
 0xac0   : > { %v6100_v57 = vpop.f32.mrf.mxu0 }
 0xac1   : > { %v8581_v59 = vsel %vm722_vm2, %v6100_v57, -inf }
 0xac2   : > { %3571 = vmax.xlane.f32.xlu1 %v8562_v15  ;;  %v3524_v16 = vpop.f32.mrf.mxu0 }
 0xac3   : > { %v8586_v7 = vsel %vm722_vm2, %v3524_v16, -inf  ;;  %v8635_v16 = vpop.permute.xlu1 %3935 }
 0xac4   : > { %v6101_v21 = vpop.f32.mrf.mxu0 }
 0xac5   : > { %v8591_v63 = vsel %vm722_vm2, %v6101_v21, -inf }
 0xac6   : > { %3577 = vmax.xlane.f32.xlu1 %v8567_v27  ;;  %v3527_v60 = vpop.f32.mrf.mxu0 }
 0xac7   : > { %v8596_v57 = vsel %vm722_vm2, %v3527_v60, -inf  ;;  %v8629_v60 = vpop.permute.xlu0 %3937 }
 0xaca   : > { %3573 = vmax.xlane.f32.xlu1 %v8572_v47 }
 0xacb   : > { %v8641_v21 = vpop.permute.xlu0 %3933 }
 0xace   : > { %3929 = vrot.lane.b32.xlu0 %v7128_v12, %s6941_s26 }
 0xadb   : > { %3931 = vrot.lane.b32.xlu1 %v7121_v6, %s6941_s26 }
 0xaed   : > { %3583 = vmax.xlane.f32.xlu0 %v8581_v59 }
 0xaf1   : > { %3579 = vmax.xlane.f32.xlu0 %v8586_v7 }
 0xaf5   : > { %3585 = vmax.xlane.f32.xlu0 %v8591_v63 }
 0xaff   : > { %3581 = vmax.xlane.f32.xlu1 %v8596_v57 }
 0xb0b   : > { %3927 = vrot.lane.b32.xlu0 %v7063_v19, %s6941_s26 }
 0xb0f   : > { %3909 = vrot.lane.b32.xlu0 %v7069_v25, %s6941_s26 }
 0xb10   : > { %3925 = vrot.lane.b32.xlu1 %v7158_v26, %s6941_s26 }
 0xb13   : > { %3913 = vrot.lane.b32.xlu0 %v7181_v31, %s6941_s26 }
 0xb14   : > { %3911 = vrot.lane.b32.xlu1 %v7067_v22, %s6941_s26 }
 0xb17   : > { %3917 = vrot.lane.b32.xlu0 %v7190_v33, %s6941_s26 }
 0xb18   : > { %3915 = vrot.lane.b32.xlu1 %v7077_v32, %s6941_s26 }
 0xb1b   : > { %3921 = vrot.lane.b32.xlu0 %v7198_v29, %s6941_s26 }
 0xb1c   : > { %3919 = vrot.lane.b32.xlu1 %v7087_v42, %s6941_s26 }
 0xb1f   : > { %4236 = vrot.lane.b32.xlu0 %v7132_v14, %s6941_s26 }
 0xb20   : > { %3923 = vrot.lane.b32.xlu1 %v7103_v54, %s6941_s26 }
 0xb23   : > { %4232 = vrot.lane.b32.xlu0 %v7140_v18, %s6941_s26 }
 0xb24   : > { %4234 = vrot.lane.b32.xlu1 %v7137_v17, %s6941_s26 }
 0xb27   : > { %4230 = vrot.lane.b32.xlu0 %v7146_v23, %s6941_s26 }
 0xb28   : > { %4226 = vrot.lane.b32.xlu1 %v7162_v28, %s6941_s26 }
 0xb2b   : > { %4228 = vrot.lane.b32.xlu0 %v7152_v24, %s6941_s26 }
 0xb2c   : > { %4222 = vrot.lane.b32.xlu1 %v7174_v20, %s6941_s26 }
 0xb2f   : > { %4224 = vrot.lane.b32.xlu0 %v7168_v30, %s6941_s26 }
 0xb30   : > { %4482 = vrot.lane.b32.xlu1 %v7083_v39, %s6942_s27 }
 0xb33   : > { %4486 = vrot.lane.b32.xlu0 %v7093_v49, %s6942_s27  ;;  %v3560_v46 = vpop.xlane.xlu1 %3559 }
 0xb34   : > { %4478 = vrot.lane.b32.xlu1 %v7121_v6, %s6942_s27  ;;  %v3589_v39 = vsub.f32 %v8517_v62, %v3560_v46 }
 0xb35   : > { %v3556_v50 = vpop.xlane.xlu0 %3555 }
 0xb36   : > { %v3587_v53 = vsub.f32 %v8522_v8, %v3556_v50 }
 0xb37   : > { %4484 = vrot.lane.b32.xlu0 %v7095_v52, %s6942_s27  ;;  %v3562_v34 = vpop.xlane.xlu1 %3561  ;;  %v3607_v52 = vmul.f32 1.442695, %v3589_v39 }
 0xb38   : > { %v3590_v51 = vsub.f32 %v8527_v58, %v3562_v34  ;;  %4472 = vrot.lane.b32.xlu1 %v7158_v26, %s6942_s27  ;;  %v3603_v35 = vmul.f32 1.442695, %v3587_v53 }
 0xb3a   : > { %v3609_v6 = vmul.f32 1.442695, %v3590_v51  ;;  %6560 = vpow2.f32 %v3603_v35 }
 0xb3b   : > { %4480 = vrot.lane.b32.xlu0 %v7115_v0, %s6942_s27  ;;  %v3558_v49 = vpop.xlane.xlu1 %3557  ;;  %v3568_v56 = vpop.xlane.xlu0 %3567 }
 0xb3c   : > { %v3588_v50 = vsub.f32 %v8532_v41, %v3558_v49  ;;  %4458 = vrot.lane.b32.xlu1 %v7067_v22, %s6942_s27  ;;  %v3593_v34 = vsub.f32 %v8536_v40, %v3568_v56  ;;  %6562 = vpow2.f32 %v3609_v6 }
 0xb3e   : > { %v3605_v8 = vmul.f32 1.442695, %v3588_v50  ;;  %v3615_v46 = vmul.f32 1.442695, %v3593_v34 }
 0xb3f   : > { %4476 = vrot.lane.b32.xlu0 %v7128_v12, %s6942_s27  ;;  %v3564_v26 = vpop.xlane.xlu1 %3563 }
 0xb40   : > { %v3591_v0 = vsub.f32 %v8542_v1, %v3564_v26  ;;  %4462 = vrot.lane.b32.xlu1 %v7077_v32, %s6942_s27  ;;  %6564 = vpow2.f32 %v3605_v8 }
 0xb41   : > { %v3566_v51 = vpop.xlane.xlu0 %3565  ;;  %6566 = vpow2.f32 %v3607_v52 }
 0xb42   : > { %v3611_v53 = vmul.f32 1.442695, %v3591_v0  ;;  %v3592_v22 = vsub.f32 %v8547_v5, %v3566_v51 }
 0xb43   : > { %4474 = vrot.lane.b32.xlu0 %v7063_v19, %s6942_s27  ;;  %v3570_v56 = vpop.xlane.xlu1 %3569 }
 0xb44   : > { %v3613_v35 = vmul.f32 1.442695, %v3592_v22  ;;  %v3594_v12 = vsub.f32 %v8552_v44, %v3570_v56  ;;  %4466 = vrot.lane.b32.xlu1 %v7087_v42, %s6942_s27  ;;  %6568 = vpow2.f32 %v3611_v53 }
 0xb45   : > { %v3930_v0 = vpop.permute.xlu0 %3929 }
 0xb46   : > { %6570 = vpow2.f32 %v3613_v35  ;;  %v3617_v32 = vmul.f32 1.442695, %v3594_v12  ;;  %v3972_v22 = vsel %vm723_vm1, %v3930_v0, 0 }
 0xb47   : > { %6572 = vpow2.f32 %v3615_v46  ;;  %4456 = vrot.lane.b32.xlu0 %v7069_v25, %s6942_s27  ;;  %v3576_v62 = vpop.xlane.xlu1 %3575  ;;  %v8677_v40 = vpop.eup %6560 }
 0xb48   : > { %6574 = vpow2.f32 %v3617_v32  ;;  %4470 = vrot.lane.b32.xlu1 %v7103_v54, %s6942_s27  ;;  %v3597_v5 = vsub.f32 %v8557_v11, %v3576_v62 }
 0xb49   : > { %v8681_v42 = vpop.eup %6562 }
 0xb4a   : > { %v3623_v50 = vmul.f32 1.442695, %v3597_v5 }
 0xb4b   : > { %4460 = vrot.lane.b32.xlu0 %v7181_v31, %s6942_s27  ;;  %v3572_v19 = vpop.xlane.xlu1 %3571 }
 0xb4c   : > { %4783 = vrot.lane.b32.xlu1 %v7132_v14, %s6942_s27  ;;  %v3595_v25 = vsub.f32 %v8562_v15, %v3572_v19 }
 0xb4d   : > { %v8683_v58 = vpop.eup %6564 }
 0xb4e   : > { %v8686_v41 = vpop.eup %6566  ;;  %v3667_v31 = vpack.c.bf16 %v8683_v58, %v8677_v40  ;;  %v3619_v15 = vmul.f32 1.442695, %v3595_v25 }
 0xb4f   : > { %4464 = vrot.lane.b32.xlu0 %v7190_v33, %s6942_s27  ;;  %v3578_v54 = vpop.xlane.xlu1 %3577  ;;  %v3668_v14 = vpack.c.bf16 %v8681_v42, %v8686_v41  ;;  %v3987_v33 = vsel %vm723_vm1, %v8478_v55, 0 }
 0xb50   : > { %v3598_v1 = vsub.f32 %v8567_v27, %v3578_v54  ;;  %4779 = vrot.lane.b32.xlu1 %v7140_v18, %s6942_s27  ;;  %6118 = vmatprep.mubr.bf16.mxu1 %v3667_v31  ;;  %6576 = vpow2.f32 %v3619_v15 }
 0xb51   : > { %v8698_v44 = vpop.eup %6568  ;;  %6119 = vmatmul.mubr.bf16.vlgmr.msra.gmra.mxu1 %v3668_v14 }
 0xb52   : > { %v3625_v49 = vmul.f32 1.442695, %v3598_v1  ;;  %6135 = vmatpush3.bf16.xpose.msra.mxu1 %v3987_v33 }
 0xb53   : > { %v8702_v39 = vpop.eup %6570  ;;  %4468 = vrot.lane.b32.xlu0 %v7198_v29, %s6942_s27  ;;  %v3574_v18 = vpop.xlane.xlu1 %3573  ;;  %6331 = vmatprep.subr.msk.bf16.mxu1 %vm723_vm1, %v8629_v60 }
 0xb54   : > { %v8706_v27 = vpop.eup %6572  ;;  %v3596_v11 = vsub.f32 %v8572_v47, %v3574_v18  ;;  %4775 = vrot.lane.b32.xlu1 %v7152_v24, %s6942_s27  ;;  %v3669_v55 = vpack.c.bf16 %v8702_v39, %v8698_v44  ;;  %6578 = vpow2.f32 %v3625_v49  ;;  %v3984_v24 = vsel %vm723_vm1, %v8629_v60, 0 }
 0xb55   : > { %v8715_v6 = vpop.eup %6574  ;;  %v3981_v47 = vsel %vm723_vm1, %v8635_v16, 0 }
 0xb56   : > { %v3621_v52 = vmul.f32 1.442695, %v3596_v11  ;;  %6122 = vmatprep.mubr.bf16.mxu1 %v3669_v55  ;;  %v3670_v29 = vpack.c.bf16 %v8715_v6, %v8706_v27 }
 0xb57   : > { %4781 = vrot.lane.b32.xlu0 %v7137_v17, %s6942_s27  ;;  %v3932_v26 = vpop.permute.xlu1 %3931 }
 0xb58   : > { %6580 = vpow2.f32 %v3621_v52  ;;  %v3975_v51 = vsel %vm723_vm1, %v3932_v26, 0 }
 0xb59   : > { %6582 = vpow2.f32 %v3623_v50  ;;  %6123 = vmatmul.mubr.bf16.gmra.mxu1 %v3670_v29 }
 0xb5a   : > { %6137 = vmatpush3.bf16.xpose.msra.mxu1 %v3984_v24 }
 0xb5b   : > { %4777 = vrot.lane.b32.xlu0 %v7146_v23, %s6942_s27  ;;  %6332 = vmatprep.subr.msk.bf16.mxu1 %vm723_vm1, %v8635_v16  ;;  %v3978_v16 = vsel %vm723_vm1, %v8641_v21, 0 }
 0xb5d   : > { %v8731_v17 = vpop.eup %6576 }
 0xb5f   : > { %4773 = vrot.lane.b32.xlu0 %v7162_v28, %s6942_s27 }
 0xb61   : > { %v8733_v8 = vpop.eup %6578 }
 0xb62   : > { %6139 = vmatpush3.bf16.xpose.msra.mxu1 %v3981_v47 }
 0xb63   : > { %6333 = vmatprep.subr.msk.bf16.mxu1 %vm723_vm1, %v8641_v21 }
 0xb65   : > { %v8737_v60 = vpop.eup %6580 }
 0xb66   : > { %v8739_v23 = vpop.eup %6582  ;;  %v3671_v34 = vpack.c.bf16 %v8737_v60, %v8731_v17 }
 0xb67   : > { %v3672_v28 = vpack.c.bf16 %v8733_v8, %v8739_v23 }
 0xb68   : > { %6126 = vmatprep.mubr.bf16.mxu1 %v3671_v34 }
 0xb69   : > { %6127 = vmatmul.mubr.bf16.gmra.mxu1 %v3672_v28 }
 0xb6a   : > { %6141 = vmatpush3.bf16.xpose.msra.mxu1 %v3978_v16 }
 0xb6b   : > { %6334 = vmatprep.subr.msk.bf16.mxu1 %vm723_vm1, %v3932_v26 }
 0xb72   : > { %6143 = vmatpush3.bf16.xpose.msra.mxu1 %v3975_v51 }
 0xb73   : > { %6335 = vmatprep.subr.msk.bf16.mxu1 %vm723_vm1, %v3930_v0 }
 0xb76   : > { %v3584_v53 = vpop.xlane.xlu0 %3583 }
 0xb77   : > { %v3601_v62 = vsub.f32 %v8581_v59, %v3584_v53 }
 0xb79   : > { %v3631_v14 = vmul.f32 1.442695, %v3601_v62 }
 0xb7a   : > { %v3580_v46 = vpop.xlane.xlu0 %3579  ;;  %6145 = vmatpush3.bf16.xpose.msra.mxu1 %v3972_v22 }
 0xb7b   : > { %v3599_v12 = vsub.f32 %v8586_v7, %v3580_v46 }
 0xb7d   : > { %v3627_v25 = vmul.f32 1.442695, %v3599_v12 }
 0xb7e   : > { %v3586_v56 = vpop.xlane.xlu0 %3585 }
 0xb7f   : > { %v3602_v32 = vsub.f32 %v8591_v63, %v3586_v56  ;;  %6584 = vpow2.f32 %v3627_v25 }
 0xb81   : > { %v3633_v54 = vmul.f32 1.442695, %v3602_v32 }
 0xb82   : > { %v3928_v35 = vpop.permute.xlu0 %3927 }
 0xb83   : > { %6336 = vmatprep.subr.msk.bf16.mxu1 %vm723_vm1, %v3928_v35  ;;  %v3969_v21 = vsel %vm723_vm1, %v3928_v35, 0  ;;  %6586 = vpow2.f32 %v3633_v54 }
 0xb84   : > { %6147 = vmatpush3.bf16.xpose.msra.mxu1 %v3969_v21 }
 0xb86   : > { %v3910_v19 = vpop.permute.xlu0 %3909 }
 0xb88   : > { %v3582_v31 = vpop.xlane.xlu1 %3581 }
 0xb89   : > { %v3600_v1 = vsub.f32 %v8596_v57, %v3582_v31 }
 0xb8a   : > { %v3914_v5 = vpop.permute.xlu0 %3913 }
 0xb8b   : > { %v3629_v15 = vmul.f32 1.442695, %v3600_v1 }
 0xb8c   : > { %v3926_v7 = vpop.permute.xlu1 %3925  ;;  %v8759_v57 = vpop.eup %6584 }
 0xb8d   : > { %6588 = vpow2.f32 %v3629_v15  ;;  %6337 = vmatprep.subr.msk.bf16.mxu1 %vm723_vm1, %v3926_v7  ;;  %v3966_v63 = vsel %vm723_vm1, %v3926_v7, 0 }
 0xb8e   : > { %6590 = vpow2.f32 %v3631_v14  ;;  %v3918_v33 = vpop.permute.xlu0 %3917  ;;  %6149 = vmatpush3.bf16.xpose.msra.mxu1 %v3966_v63 }
 0xb90   : > { %v3912_v59 = vpop.permute.xlu1 %3911  ;;  %v8761_v50 = vpop.eup %6586 }
 0xb92   : > { %v3922_v49 = vpop.permute.xlu0 %3921 }
 0xb94   : > { %v3916_v18 = vpop.permute.xlu1 %3915 }
 0xb96   : > { %v4237_v11 = vpop.permute.xlu0 %4236 }
 0xb97   : > { %6166 = vmatprep.subr.bf16.mxu0 %v4237_v11 }
 0xb98   : > { %6167 = vmatpush3.bf16.msra.mxu0 %v4237_v11  ;;  %v3920_v55 = vpop.permute.xlu1 %3919 }
 0xb9a   : > { %v8763_v52 = vpop.eup %6588  ;;  %v4233_v29 = vpop.permute.xlu0 %4232 }
 0xb9b   : > { %v8765_v24 = vpop.eup %6590  ;;  %v3673_v47 = vpack.c.bf16 %v8763_v52, %v8759_v57 }
 0xb9c   : > { %v3924_v34 = vpop.permute.xlu1 %3923  ;;  %v3674_v28 = vpack.c.bf16 %v8761_v50, %v8765_v24 }
 0xb9d   : > { %6130 = vmatprep.mubr.bf16.mxu1 %v3673_v47 }
 0xb9e   : > { %v4231_v16 = vpop.permute.xlu0 %4230  ;;  %6131 = vmatmul.mubr.bf16.gmra.mxu1 %v3674_v28 }
 0xb9f   : > { %6150 = vmatprep.mubr.msk.bf16.mxu1 %vm723_vm1, %v3910_v19 }
 0xba0   : > { %v4235_v26 = vpop.permute.xlu1 %4234 }
 0xba1   : > { %6168 = vmatprep.subr.bf16.mxu0 %v4235_v26 }
 0xba2   : > { %v4229_v0 = vpop.permute.xlu0 %4228  ;;  %6169 = vmatpush3.bf16.msra.mxu0 %v4235_v26 }
 0xba3   : > { %6170 = vmatprep.subr.bf16.mxu0 %v4233_v29 }
 0xba4   : > { %v4227_v51 = vpop.permute.xlu1 %4226 }
 0xba6   : > { %v4225_v53 = vpop.permute.xlu0 %4224  ;;  %6151 = vmatmul.mubr.msk.bf16.vlgmr.msra.gmra.mxu1 %vm723_vm1, %v3912_v59  ;;  %6171 = vmatpush3.bf16.msra.mxu0 %v4233_v29 }
 0xba7   : > { %6154 = vmatprep.mubr.msk.bf16.mxu1 %vm723_vm1, %v3914_v5  ;;  %6172 = vmatprep.subr.bf16.mxu0 %v4231_v16 }
 0xba8   : > { %v4223_v22 = vpop.permute.xlu1 %4222 }
 0xbaa   : > { %v8774_v46 = vpop.permute.xlu0 %4486  ;;  %6173 = vmatpush3.bf16.msra.mxu0 %v4231_v16 }
 0xbab   : > { %6174 = vmatprep.subr.bf16.mxu0 %v4229_v0 }
 0xbac   : > { %v8776_v56 = vpop.permute.xlu1 %4482 }
 0xbae   : > { %v8778_v35 = vpop.permute.xlu0 %4484  ;;  %6155 = vmatmul.mubr.msk.bf16.gmra.mxu1 %vm723_vm1, %v3916_v18  ;;  %6175 = vmatpush3.bf16.msra.mxu0 %v4229_v0 }
 0xbaf   : > { %6158 = vmatprep.mubr.msk.bf16.mxu1 %vm723_vm1, %v3918_v33  ;;  %6176 = vmatprep.subr.bf16.mxu0 %v4227_v51 }
 0xbb0   : > { %v8782_v12 = vpop.permute.xlu1 %4478 }
 0xbb2   : > { %v8784_v21 = vpop.permute.xlu0 %4480  ;;  %6177 = vmatpush3.bf16.msra.mxu0 %v4227_v51 }
 0xbb3   : > { %6178 = vmatprep.subr.bf16.mxu0 %v4225_v53 }
 0xbb4   : > { %v8786_v32 = vpop.permute.xlu1 %4472 }
 0xbb6   : > { %v8788_v62 = vpop.permute.xlu0 %4476  ;;  %6159 = vmatmul.mubr.msk.bf16.gmra.mxu1 %vm723_vm1, %v3920_v55  ;;  %6179 = vmatpush3.bf16.msra.mxu0 %v4225_v53 }
 0xbb7   : > { %6162 = vmatprep.mubr.msk.bf16.mxu1 %vm723_vm1, %v3922_v49  ;;  %6180 = vmatprep.subr.bf16.mxu0 %v4223_v22 }
 0xbb8   : > { %v8792_v19 = vpop.permute.xlu1 %4458 }
 0xbba   : > { %v8794_v25 = vpop.permute.xlu0 %4474  ;;  %6181 = vmatpush3.bf16.msra.mxu0 %v4223_v22 }
 0xbbb   : > { %6338 = vmatprep.subr.msk.bf16.mxu0 %vm723_vm1, %v8774_v46 }
 0xbbc   : > { %v8798_v54 = vpop.permute.xlu1 %4462 }
 0xbbe   : > { %v8800_v31 = vpop.permute.xlu0 %4456  ;;  %6163 = vmatmul.mubr.msk.bf16.gmra.mxu1 %vm723_vm1, %v3924_v34 }
 0xbc0   : > { %v8803_v1 = vpop.permute.xlu1 %4466 }
 0xbc2   : > { %v8805_v14 = vpop.permute.xlu0 %4460 }
 0xbc4   : > { %v8807_v5 = vpop.permute.xlu1 %4470 }
 0xbc6   : > { %v8809_v15 = vpop.permute.xlu0 %4464 }
 0xbc8   : > { %v4784_v7 = vpop.permute.xlu1 %4783 }
 0xbc9   : > { %6230 = vmatprep.subr.bf16.mxu1 %v4784_v7 }
 0xbca   : > { %v8811_v63 = vpop.permute.xlu0 %4468  ;;  %6231 = vmatpush3.bf16.msra.mxu1 %v4784_v7 }
 0xbcc   : > { %v4780_v59 = vpop.permute.xlu1 %4779 }
 0xbce   : > { %v4782_v33 = vpop.permute.xlu0 %4781 }
 0xbcf   : > { %6232 = vmatprep.subr.bf16.mxu1 %v4782_v33 }
 0xbd0   : > { %6233 = vmatpush3.bf16.msra.mxu1 %v4782_v33  ;;  %v4776_v18 = vpop.permute.xlu1 %4775 }
 0xbd1   : > { %6234 = vmatprep.subr.bf16.mxu1 %v4780_v59 }
 0xbd2   : > { %v4778_v49 = vpop.permute.xlu0 %4777 }
 0xbd4   : > { %6235 = vmatpush3.bf16.msra.mxu1 %v4780_v59 }
 0xbd5   : > { %6236 = vmatprep.subr.bf16.mxu1 %v4778_v49 }
 0xbd6   : > { %v4774_v11 = vpop.permute.xlu0 %4773 }
 0xbd8   : > { %6237 = vmatpush3.bf16.msra.mxu1 %v4778_v49 }
 0xbd9   : > { %6238 = vmatprep.subr.bf16.mxu1 %v4776_v18 }
 0xbdc   : > { %6239 = vmatpush3.bf16.msra.mxu1 %v4776_v18 }
 0xbdd   : > { %6240 = vmatprep.subr.bf16.mxu1 %v4774_v11 }
 0xbe0   : > { %6241 = vmatpush3.bf16.msra.mxu1 %v4774_v11 }
 0xc11   : > { %v8813_v55 = vpop.f32.mrf.mxu1 }
 0xc12   : > { %10233 = vst [vmem:[#allocation151_spill] sm:$0xff] %v8813_v55 }
 0xc13   : > { %v8815_v29 = vpop.f32.mrf.mxu1 }
 0xc14   : > { %10234 = vst [vmem:[#allocation152_spill] sm:$0xff] %v8815_v29  ;;  %v10251_v29 = vld [vmem:[#allocation65_spill] sm:$0xff] }
 0xc15   : > { %v8817_v47 = vpop.f32.mrf.mxu1 }
 0xc17   : > { %v8819_v34 = vpop.f32.mrf.mxu1 }
 0xc19   : > { %v8821_v28 = vpop.f32.mrf.mxu1 }
 0xc1a   : > { %10235 = vst [vmem:[#allocation153_spill] sm:$0xff] %v8821_v28 }
 0xc1b   : > { %v8823_v16 = vpop.f32.mrf.mxu1 }
 0xc1c   : > { %10236 = vst [vmem:[#allocation154_spill] sm:$0xff] %v8823_v16 }
 0xc1d   : > { %v8825_v26 = vpop.f32.mrf.mxu1 }
 0xc1e   : > { %10237 = vst [vmem:[#allocation155_spill] sm:$0xff] %v8825_v26 }
 0xc1f   : > { %v8827_v0 = vpop.f32.mrf.mxu1 }
 0xc20   : > { %10238 = vst [vmem:[#allocation156_spill] sm:$0xff] %v8827_v0  ;;  %v10249_v0 = vld [vmem:[#allocation96_spill] sm:$0xff] }
 0xc29   : > { %v8829_v51 = vpop.f32.mrf.mxu1 }
 0xc2a   : > { %10239 = vst [vmem:[#allocation157_spill] sm:$0xff] %v8829_v51 }
 0xc2b   : > { %v8831_v53 = vpop.f32.mrf.mxu1 }
 0xc2c   : > { %10240 = vst [vmem:[#allocation158_spill] sm:$0xff] %v8831_v53 }
 0xc2d   : > { %v8833_v22 = vpop.f32.mrf.mxu1 }
 0xc2e   : > { %10241 = vst [vmem:[#allocation159_spill] sm:$0xff] %v8833_v22 }
 0xc2f   : > { %v8835_v7 = vpop.f32.mrf.mxu1 }
 0xc30   : > { %10242 = vst [vmem:[#allocation160_spill] sm:$0xff] %v8835_v7 }
 0xc5e   : > { %v8837_v33 = vpop.f32.mrf.mxu1 }
 0xc5f   : > { %10243 = vst [vmem:[#allocation161_spill] sm:$0xff] %v8837_v33 }
 0xc60   : > { %v8839_v59 = vpop.f32.mrf.mxu1 }
 0xc61   : > { %10244 = vst [vmem:[#allocation162_spill] sm:$0xff] %v8839_v59 }
 0xc62   : > { %v8841_v49 = vpop.f32.mrf.mxu1 }
 0xc63   : > { %10245 = vst [vmem:[#allocation163_spill] sm:$0xff] %v8841_v49 }
 0xc64   : > { %v8843_v18 = vpop.f32.mrf.mxu1 }
 0xc65   : > { %10246 = vst [vmem:[#allocation164_spill] sm:$0xff] %v8843_v18 }
 0xc66   : > { %v6152_v11 = vpop.f32.mrf.mxu1 }
 0xc67   : > { %v8847_v28 = vsel %vm722_vm2, %v6152_v11, -inf }
 0xc68   : > { %4106 = vmax.xlane.f32.xlu1 %v8847_v28  ;;  %v4023_v51 = vpop.f32.mrf.mxu1 }
 0xc69   : > { %v8852_v53 = vsel %vm722_vm2, %v4023_v51, -inf }
 0xc6a   : > { %4102 = vmax.xlane.f32.xlu0 %v8852_v53  ;;  %v6153_v33 = vpop.f32.mrf.mxu1 }
 0xc6b   : > { %v8857_v59 = vsel %vm722_vm2, %v6153_v33, -inf }
 0xc6c   : > { %4108 = vmax.xlane.f32.xlu1 %v8857_v59  ;;  %v4026_v49 = vpop.f32.mrf.mxu1 }
 0xc6d   : > { %v8862_v11 = vsel %vm722_vm2, %v4026_v49, -inf }
 0xc6e   : > { %v6156_v51 = vpop.f32.mrf.mxu1 }
 0xc6f   : > { %v8874_v49 = vsel %vm722_vm2, %v6156_v51, -inf }
 0xc70   : > { %4104 = vmax.xlane.f32.xlu1 %v8862_v11  ;;  %v4039_v18 = vpop.f32.mrf.mxu1 }
 0xc72   : > { %v6157_v22 = vpop.f32.mrf.mxu1 }
 0xc74   : > { %v4042_v33 = vpop.f32.mrf.mxu1 }
 0xc76   : > { %v6160_v7 = vpop.f32.mrf.mxu1 }
 0xc78   : > { %v4055_v16 = vpop.f32.mrf.mxu1 }
 0xc80   : > { %4769 = vrot.lane.b32.xlu0 %v7174_v20, %s6942_s27  ;;  %v6161_v20 = vpop.f32.mrf.mxu1 }
 0xc81   : > { %4771 = vrot.lane.b32.xlu1 %v7168_v30, %s6942_s27  ;;  %v8880_v30 = vsel %vm722_vm2, %v4042_v33, -inf  ;;  %v8897_v33 = vsel %vm722_vm2, %v6157_v22, -inf  ;;  %v8917_v22 = vsel %vm722_vm2, %v4055_v16, -inf  ;;  %v10250_v16 = vld [vmem:[#allocation95_spill] sm:$0xff] }
 0xc82   : > { %v4058_v26 = vpop.f32.mrf.mxu1 }
 0xc9f   : > { %1441 = vadd.xlane.f32.xlu0 %v7601_v3  ;;  %v8887_v3 = vsel %vm722_vm2, %v4039_v18, -inf }
 0xca3   : > { %1445 = vadd.xlane.f32.xlu0 %v7599_v38  ;;  %v6164_v38 = vpop.f32.mrf.mxu1 }
 0xca5   : > { %1439 = vadd.xlane.f32.xlu1 %v7595_v43  ;;  %v10247_v43 = vld [vmem:[#allocation64_spill] sm:$0xff]  ;;  %v4071_v51 = vpop.f32.mrf.mxu1 }
 0xca7   : > { %4114 = vmax.xlane.f32.xlu0 %v8874_v49  ;;  %v6165_v18 = vpop.f32.mrf.mxu1 }
 0xca9   : > { %1443 = vadd.xlane.f32.xlu1 %v7603_v45  ;;  %v8892_v45 = vsel %vm722_vm2, %v6164_v38, -inf  ;;  %v8907_v38 = vsel %vm722_vm2, %v6160_v7, -inf  ;;  %v8923_v7 = vsel %vm722_vm2, %v6161_v20, -inf  ;;  %v4074_v55 = vpop.f32.mrf.mxu1 }
 0xcaa   : > { %v8937_v20 = vsel %vm722_vm2, %v4074_v55, -inf  ;;  %v10256_v55 = vld [vmem:[#allocation67_spill] sm:$0xff] }
 0xcab   : > { %4112 = vmax.xlane.f32.xlu0 %v8880_v30 }
 0xcad   : > { %1994 = vadd.xlane.f32.xlu1 %v7865_v4  ;;  %v8902_v4 = vsel %vm722_vm2, %v4071_v51, -inf  ;;  %v10248_v51 = vld [vmem:[#allocation63_spill] sm:$0xff] }
 0xcaf   : > { %1996 = vadd.xlane.f32.xlu0 %v10247_v43  ;;  %v8912_v43 = vsel %vm722_vm2, %v6165_v18, -inf  ;;  %v8929_v18 = vsel %vm722_vm2, %v4058_v26, -inf  ;;  %v10253_v26 = vld [vmem:[#allocation97_spill] sm:$0xff] }
 0xcb1   : > { %4110 = vmax.xlane.f32.xlu1 %v8887_v3 }
 0xcb3   : > { %4130 = vmax.xlane.f32.xlu0 %v8892_v45 }
 0xcb5   : > { %4116 = vmax.xlane.f32.xlu1 %v8897_v33 }
 0xcb7   : > { %4126 = vmax.xlane.f32.xlu0 %v8902_v4 }
 0xcb9   : > { %4122 = vmax.xlane.f32.xlu1 %v8907_v38 }
 0xcbb   : > { %4132 = vmax.xlane.f32.xlu0 %v8912_v43 }
 0xcbd   : > { %4118 = vmax.xlane.f32.xlu1 %v8917_v22 }
 0xcbf   : > { %2000 = vadd.xlane.f32.xlu0 %v10248_v51  ;;  %v10259_v51 = vld [vmem:[#allocation99_spill] sm:$0xff] }
 0xcc1   : > { %4124 = vmax.xlane.f32.xlu1 %v8923_v7 }
 0xcc3   : > { %2543 = vadd.xlane.f32.xlu0 %v10249_v0  ;;  %v10252_v0 = vld [vmem:[#allocation94_spill] sm:$0xff] }
 0xcc5   : > { %4120 = vmax.xlane.f32.xlu1 %v8929_v18 }
 0xcc7   : > { %2547 = vadd.xlane.f32.xlu0 %v10250_v16  ;;  %v10262_v16 = vld [vmem:[#allocation66_spill] sm:$0xff] }
 0xcc9   : > { %1998 = vadd.xlane.f32.xlu1 %v10251_v29  ;;  %v10254_v29 = vld [vmem:[#allocation37_spill] sm:$0xff] }
 0xccb   : > { %3090 = vadd.xlane.f32.xlu0 %v8397_v2  ;;  %v10255_v2 = vld [vmem:[#allocation36_spill] sm:$0xff] }
 0xccd   : > { %4128 = vmax.xlane.f32.xlu1 %v8937_v20 }
 0xccf   : > { %3094 = vadd.xlane.f32.xlu0 %v8395_v9  ;;  %v10257_v9 = vld [vmem:[#allocation69_spill] sm:$0xff] }
 0xcd1   : > { %2541 = vadd.xlane.f32.xlu1 %v10252_v0 }
 0xcd3   : > { %3637 = vadd.xlane.f32.xlu0 %v8683_v58  ;;  %v10258_v58 = vld [vmem:[#allocation35_spill] sm:$0xff] }
 0xcd5   : > { %2545 = vadd.xlane.f32.xlu1 %v10253_v26  ;;  %v10263_v26 = vld [vmem:[#allocation68_spill] sm:$0xff] }
 0xcd7   : > { %3641 = vadd.xlane.f32.xlu0 %v8681_v42  ;;  %v10260_v42 = vld [vmem:[#allocation38_spill] sm:$0xff] }
 0xcd9   : > { %3088 = vadd.xlane.f32.xlu1 %v8393_v48  ;;  %v10261_v48 = vld [vmem:[#allocation101_spill] sm:$0xff] }
 0xcdb   : > { %1449 = vadd.xlane.f32.xlu0 %v10254_v29 }
 0xcdd   : > { %3092 = vadd.xlane.f32.xlu1 %v8400_v61 }
 0xcdf   : > { %1453 = vadd.xlane.f32.xlu0 %v10255_v2 }
 0xce1   : > { %3635 = vadd.xlane.f32.xlu1 %v8677_v40 }
 0xce3   : > { %2004 = vadd.xlane.f32.xlu0 %v10256_v55 }
 0xce5   : > { %3639 = vadd.xlane.f32.xlu1 %v8686_v41 }
 0xce7   : > { %2008 = vadd.xlane.f32.xlu0 %v10257_v9 }
 0xce9   : > { %1447 = vadd.xlane.f32.xlu1 %v10258_v58  ;;  %v10264_v58 = vld [vmem:[#allocation98_spill] sm:$0xff] }
 0xceb   : > { %2551 = vadd.xlane.f32.xlu0 %v10259_v51 }
 0xced   : > { %1451 = vadd.xlane.f32.xlu1 %v10260_v42 }
 0xcef   : > { %2555 = vadd.xlane.f32.xlu0 %v10261_v48 }
 0xcf1   : > { %2002 = vadd.xlane.f32.xlu1 %v10262_v16  ;;  %v4107_v61 = vpop.xlane.xlu1 %4106 }
 0xcf2   : > { %v4136_v2 = vsub.f32 %v8847_v28, %v4107_v61  ;;  %v10266_v28 = vld [vmem:[#allocation41_spill] sm:$0xff] }
 0xcf3   : > { %v4103_v0 = vpop.xlane.xlu0 %4102  ;;  %3098 = vadd.xlane.f32.xlu0 %v8412_v13 }
 0xcf4   : > { %v4134_v40 = vsub.f32 %v8852_v53, %v4103_v0  ;;  %v4154_v48 = vmul.f32 1.442695, %v4136_v2  ;;  %v10265_v53 = vld [vmem:[#allocation100_spill] sm:$0xff] }
 0xcf5   : > { %2006 = vadd.xlane.f32.xlu1 %v10263_v26  ;;  %v4109_v41 = vpop.xlane.xlu1 %4108  ;;  %v10272_v2 = vld [vmem:[#allocation104_spill] sm:$0xff] }
 0xcf6   : > { %v4137_v29 = vsub.f32 %v8857_v59, %v4109_v41  ;;  %v4150_v55 = vmul.f32 1.442695, %v4134_v40  ;;  %v10270_v41 = vld [vmem:[#allocation71_spill] sm:$0xff] }
 0xcf7   : > { %3102 = vadd.xlane.f32.xlu0 %v8421_v10  ;;  %v4770_v10 = vpop.permute.xlu0 %4769 }
 0xcf8   : > { %v4156_v9 = vmul.f32 1.442695, %v4137_v29  ;;  %6592 = vpow2.f32 %v4150_v55  ;;  %v10271_v29 = vld [vmem:[#allocation39_spill] sm:$0xff]  ;;  %v10273_v55 = vld [vmem:[#allocation42_spill] sm:$0xff] }
 0xcf9   : > { %2549 = vadd.xlane.f32.xlu1 %v10264_v58  ;;  %v4105_v51 = vpop.xlane.xlu1 %4104  ;;  %v10276_v58 = vld [vmem:[#allocation129_spill] sm:$0xff] }
 0xcfa   : > { %v4135_v42 = vsub.f32 %v8862_v11, %v4105_v51  ;;  %6594 = vpow2.f32 %v4156_v9  ;;  %v10268_v11 = vld [vmem:[#allocation40_spill] sm:$0xff]  ;;  %v10274_v9 = vld [vmem:[#allocation103_spill] sm:$0xff]  ;;  %v10277_v51 = vld [vmem:[#allocation73_spill] sm:$0xff] }
 0xcfb   : > { %3645 = vadd.xlane.f32.xlu0 %v8702_v39  ;;  %v10267_v39 = vld [vmem:[#allocation126_spill] sm:$0xff] }
 0xcfc   : > { %v4152_v13 = vmul.f32 1.442695, %v4135_v42  ;;  %v10278_v42 = vld [vmem:[#allocation128_spill] sm:$0xff] }
 0xcfd   : > { %2553 = vadd.xlane.f32.xlu1 %v10265_v53  ;;  %v4772_v59 = vpop.permute.xlu1 %4771  ;;  %v4525_v53 = vsel %vm723_vm1, %v8784_v21, 0 }
 0xcfe   : > { %6596 = vpow2.f32 %v4152_v13  ;;  %6242 = vmatprep.subr.bf16.mxu1 %v4772_v59  ;;  %v10280_v13 = vld [vmem:[#allocation105_spill] sm:$0xff] }
 0xcff   : > { %6598 = vpow2.f32 %v4154_v48  ;;  %3649 = vadd.xlane.f32.xlu0 %v8715_v6  ;;  %6243 = vmatpush3.bf16.msra.mxu1 %v4772_v59  ;;  %v10269_v6 = vld [vmem:[#allocation72_spill] sm:$0xff]  ;;  %v4528_v48 = vsel %vm723_vm1, %v8776_v56, 0 }
 0xd00   : > { %6244 = vmatprep.subr.bf16.mxu1 %v4770_v10 }
 0xd01   : > { %3096 = vadd.xlane.f32.xlu1 %v8408_v36 }
 0xd03   : > { %1457 = vadd.xlane.f32.xlu0 %v10266_v28  ;;  %6245 = vmatpush3.bf16.msra.mxu1 %v4770_v10  ;;  %v10282_v10 = vld [vmem:[#allocation43_spill] sm:$0xff] }
 0xd05   : > { %3100 = vadd.xlane.f32.xlu1 %v10267_v39  ;;  %v8973_v16 = vpop.eup %6592 }
 0xd07   : > { %1461 = vadd.xlane.f32.xlu0 %v10268_v11  ;;  %v8976_v61 = vpop.eup %6594 }
 0xd09   : > { %3643 = vadd.xlane.f32.xlu1 %v8698_v44  ;;  %v4534_v44 = vsel %vm723_vm1, %v8774_v46, 0  ;;  %v10275_v46 = vld [vmem:[#allocation70_spill] sm:$0xff] }
 0xd0b   : > { %v8978_v0 = vpop.eup %6596  ;;  %2012 = vadd.xlane.f32.xlu0 %v10269_v6 }
 0xd0c   : > { %v8981_v40 = vpop.eup %6598  ;;  %v4214_v36 = vpack.c.bf16 %v8978_v0, %v8973_v16 }
 0xd0d   : > { %v4215_v26 = vpack.c.bf16 %v8976_v61, %v8981_v40  ;;  %3647 = vadd.xlane.f32.xlu1 %v8706_v27  ;;  %v4531_v27 = vsel %vm723_vm1, %v8778_v35, 0 }
 0xd0e   : > { %6182 = vmatprep.mubr.bf16.mxu0 %v4214_v36  ;;  %v10285_v36 = vld [vmem:[#allocation76_spill] sm:$0xff] }
 0xd0f   : > { %2016 = vadd.xlane.f32.xlu0 %v10270_v41  ;;  %6183 = vmatmul.mubr.bf16.vlgmr.msra.gmra.mxu0 %v4215_v26 }
 0xd10   : > { %6199 = vmatpush3.bf16.xpose.msra.mxu0 %v4534_v44 }
 0xd11   : > { %6339 = vmatprep.subr.msk.bf16.mxu0 %vm723_vm1, %v8778_v35  ;;  %1455 = vadd.xlane.f32.xlu1 %v10271_v29  ;;  %v10279_v35 = vld [vmem:[#allocation102_spill] sm:$0xff]  ;;  %v10286_v29 = vld [vmem:[#allocation75_spill] sm:$0xff] }
 0xd13   : > { %2559 = vadd.xlane.f32.xlu0 %v10272_v2 }
 0xd15   : > { %1459 = vadd.xlane.f32.xlu1 %v10273_v55 }
 0xd17   : > { %2563 = vadd.xlane.f32.xlu0 %v10274_v9 }
 0xd18   : > { %6201 = vmatpush3.bf16.xpose.msra.mxu0 %v4531_v27  ;;  %v10288_v27 = vld [vmem:[#allocation108_spill] sm:$0xff] }
 0xd19   : > { %6340 = vmatprep.subr.msk.bf16.mxu0 %vm723_vm1, %v8776_v56  ;;  %2010 = vadd.xlane.f32.xlu1 %v10275_v46  ;;  %v10281_v56 = vld [vmem:[#allocation127_spill] sm:$0xff] }
 0xd1b   : > { %3106 = vadd.xlane.f32.xlu0 %v10276_v58 }
 0xd1d   : > { %2014 = vadd.xlane.f32.xlu1 %v10277_v51 }
 0xd1f   : > { %3110 = vadd.xlane.f32.xlu0 %v10278_v42 }
 0xd20   : > { %6203 = vmatpush3.bf16.xpose.msra.mxu0 %v4528_v48 }
 0xd21   : > { %6341 = vmatprep.subr.msk.bf16.mxu0 %vm723_vm1, %v8784_v21  ;;  %2557 = vadd.xlane.f32.xlu1 %v10279_v35  ;;  %v4522_v21 = vsel %vm723_vm1, %v8782_v12, 0  ;;  %v10290_v35 = vld [vmem:[#allocation107_spill] sm:$0xff] }
 0xd23   : > { %3653 = vadd.xlane.f32.xlu0 %v8737_v60  ;;  %v10283_v60 = vld [vmem:[#allocation130_spill] sm:$0xff] }
 0xd25   : > { %2561 = vadd.xlane.f32.xlu1 %v10280_v13 }
 0xd27   : > { %3657 = vadd.xlane.f32.xlu0 %v8733_v8  ;;  %v10284_v8 = vld [vmem:[#allocation46_spill] sm:$0xff] }
 0xd28   : > { %6205 = vmatpush3.bf16.xpose.msra.mxu0 %v4525_v53  ;;  %v9015_v59 = vpop.xlane.xlu0 %1441  ;;  %v10291_v53 = vld [vmem:[#allocation74_spill] sm:$0xff] }
 0xd29   : > { %6342 = vmatprep.subr.msk.bf16.mxu0 %vm723_vm1, %v8782_v12  ;;  %3104 = vadd.xlane.f32.xlu1 %v10281_v56  ;;  %v4519_v12 = vsel %vm723_vm1, %v8788_v62, 0 }
 0xd2b   : > { %1465 = vadd.xlane.f32.xlu0 %v10282_v10  ;;  %v10292_v10 = vld [vmem:[#allocation133_spill] sm:$0xff] }
 0xd2c   : > { %v9021_v28 = vpop.xlane.xlu0 %1445 }
 0xd2d   : > { %3108 = vadd.xlane.f32.xlu1 %v10283_v60 }
 0xd2e   : > { %v9024_v39 = vpop.xlane.xlu1 %1439 }
 0xd2f   : > { %1469 = vadd.xlane.f32.xlu0 %v10284_v8 }
 0xd30   : > { %6207 = vmatpush3.bf16.xpose.msra.mxu0 %v4522_v21  ;;  %v4115_v11 = vpop.xlane.xlu0 %4114  ;;  %v10294_v21 = vld [vmem:[#allocation132_spill] sm:$0xff] }
 0xd31   : > { %6343 = vmatprep.subr.msk.bf16.mxu0 %vm723_vm1, %v8788_v62  ;;  %3651 = vadd.xlane.f32.xlu1 %v8731_v17  ;;  %v10287_v17 = vld [vmem:[#allocation44_spill] sm:$0xff]  ;;  %v4140_v55 = vsub.f32 %v8874_v49, %v4115_v11  ;;  %v10289_v62 = vld [vmem:[#allocation45_spill] sm:$0xff]  ;;  %v4516_v49 = vsel %vm723_vm1, %v8794_v25, 0 }
 0xd32   : > { %v9032_v6 = vpop.xlane.xlu1 %1443 }
 0xd33   : > { %2020 = vadd.xlane.f32.xlu0 %v10285_v36  ;;  %v4162_v51 = vmul.f32 1.442695, %v4140_v55 }
 0xd34   : > { %v4113_v26 = vpop.xlane.xlu0 %4112 }
 0xd35   : > { %3655 = vadd.xlane.f32.xlu1 %v8739_v23  ;;  %v4139_v41 = vsub.f32 %v8880_v30, %v4113_v26  ;;  %v10295_v26 = vld [vmem:[#allocation106_spill] sm:$0xff] }
 0xd36   : > { %v9037_v44 = vpop.xlane.xlu1 %1994 }
 0xd37   : > { %2024 = vadd.xlane.f32.xlu0 %v10286_v29  ;;  %v4160_v23 = vmul.f32 1.442695, %v4139_v41 }
 0xd38   : > { %6209 = vmatpush3.bf16.xpose.msra.mxu0 %v4519_v12  ;;  %v9042_v2 = vpop.xlane.xlu0 %1996 }
 0xd39   : > { %6344 = vmatprep.subr.msk.bf16.mxu0 %vm723_vm1, %v8794_v25  ;;  %1463 = vadd.xlane.f32.xlu1 %v10287_v17  ;;  %6600 = vpow2.f32 %v4160_v23  ;;  %v4513_v25 = vsel %vm723_vm1, %v8786_v32, 0 }
 0xd3a   : > { %v4111_v9 = vpop.xlane.xlu1 %4110 }
 0xd3b   : > { %v4138_v30 = vsub.f32 %v8887_v3, %v4111_v9  ;;  %2567 = vadd.xlane.f32.xlu0 %v10288_v27  ;;  %v10296_v9 = vld [vmem:[#allocation109_spill] sm:$0xff] }
 0xd3c   : > { %v9050_v46 = vpop.xlane.xlu0 %4130 }
 0xd3d   : > { %v4158_v58 = vmul.f32 1.442695, %v4138_v30  ;;  %1467 = vadd.xlane.f32.xlu1 %v10289_v62 }
 0xd3e   : > { %v4117_v42 = vpop.xlane.xlu1 %4116 }
 0xd3f   : > { %6602 = vpow2.f32 %v4158_v58  ;;  %v4141_v48 = vsub.f32 %v8897_v33, %v4117_v42  ;;  %2571 = vadd.xlane.f32.xlu0 %v10290_v35  ;;  %v10293_v33 = vld [vmem:[#allocation77_spill] sm:$0xff] }
 0xd40   : > { %6211 = vmatpush3.bf16.xpose.msra.mxu0 %v4516_v49  ;;  %v4127_v3 = vpop.xlane.xlu0 %4126  ;;  %6604 = vpow2.f32 %v4162_v51 }
 0xd41   : > { %v4164_v13 = vmul.f32 1.442695, %v4141_v48  ;;  %6345 = vmatprep.subr.msk.bf16.mxu0 %vm723_vm1, %v8786_v32  ;;  %2018 = vadd.xlane.f32.xlu1 %v10291_v53  ;;  %v4146_v51 = vsub.f32 %v8902_v4, %v4127_v3  ;;  %v10297_v48 = vld [vmem:[#allocation131_spill] sm:$0xff]  ;;  %v10299_v53 = vld [vmem:[#allocation134_spill] sm:$0xff] }
 0xd42   : > { %v4123_v56 = vpop.xlane.xlu1 %4122 }
 0xd43   : > { %6606 = vpow2.f32 %v4164_v13  ;;  %3114 = vadd.xlane.f32.xlu0 %v10292_v10  ;;  %v4144_v55 = vsub.f32 %v8907_v38, %v4123_v56  ;;  %v4148_v13 = vsub.f32 %v8892_v45, %v9050_v46  ;;  %v4174_v3 = vmul.f32 1.442695, %v4146_v51  ;;  %v10301_v46 = vld [vmem:[#allocation9_spill] sm:$0xff] }
 0xd44   : > { %v4133_v60 = vpop.xlane.xlu0 %4132 }
 0xd45   : > { %2022 = vadd.xlane.f32.xlu1 %v10293_v33  ;;  %v4170_v38 = vmul.f32 1.442695, %v4144_v55  ;;  %v4149_v49 = vsub.f32 %v8912_v43, %v4133_v60  ;;  %v10300_v60 = vld [vmem:[#allocation4_spill] sm:$0xff]  ;;  %v4178_v33 = vmul.f32 1.442695, %v4148_v13  ;;  %v10307_v13 = vld [vmem:[#allocation7_spill] sm:$0xff] }
 0xd46   : > { %v4119_v8 = vpop.xlane.xlu1 %4118  ;;  %v9069_v29 = vpop.eup %6600 }
 0xd47   : > { %3118 = vadd.xlane.f32.xlu0 %v10294_v21  ;;  %v4142_v36 = vsub.f32 %v8917_v22, %v4119_v8  ;;  %v4180_v56 = vmul.f32 1.442695, %v4149_v49 }
 0xd48   : > { %6213 = vmatpush3.bf16.xpose.msra.mxu0 %v4513_v25  ;;  %v9065_v11 = vpop.xlane.xlu0 %2000 }
 0xd49   : > { %2565 = vadd.xlane.f32.xlu1 %v10295_v26  ;;  %v4166_v32 = vmul.f32 1.442695, %v4142_v36 }
 0xd4a   : > { %v4125_v41 = vpop.xlane.xlu1 %4124 }
 0xd4b   : > { %v4145_v12 = vsub.f32 %v8923_v7, %v4125_v41  ;;  %3661 = vadd.xlane.f32.xlu0 %v8763_v52  ;;  %6608 = vpow2.f32 %v4166_v32  ;;  %v10302_v41 = vld [vmem:[#allocation8_spill] sm:$0xff]  ;;  %v10303_v32 = vld [vmem:[#allocation3_spill] sm:$0xff] }
 0xd4c   : > { %v9073_v17 = vpop.eup %6602  ;;  %v9076_v23 = vpop.xlane.xlu0 %2543 }
 0xd4d   : > { %2569 = vadd.xlane.f32.xlu1 %v10296_v9  ;;  %v4216_v22 = vpack.c.bf16 %v9069_v29, %v9073_v17  ;;  %v4172_v30 = vmul.f32 1.442695, %v4145_v12  ;;  %v9081_v58 = vpop.eup %6604 }
 0xd4e   : > { %v4121_v27 = vpop.xlane.xlu1 %4120 }
 0xd4f   : > { %v4143_v7 = vsub.f32 %v8929_v18, %v4121_v27  ;;  %3665 = vadd.xlane.f32.xlu0 %v8761_v50  ;;  %6186 = vmatprep.mubr.bf16.mxu0 %v4216_v22  ;;  %6610 = vpow2.f32 %v4172_v30  ;;  %v10298_v50 = vld [vmem:[#allocation5_spill] sm:$0xff]  ;;  %v10304_v30 = vld [vmem:[#allocation11_spill] sm:$0xff] }
 0xd50   : > { %v9085_v52 = vpop.eup %6606  ;;  %v9087_v62 = vpop.xlane.xlu0 %2547 }
 0xd51   : > { %v4168_v42 = vmul.f32 1.442695, %v4143_v7  ;;  %3112 = vadd.xlane.f32.xlu1 %v10297_v48  ;;  %v4217_v35 = vpack.c.bf16 %v9085_v52, %v9081_v58  ;;  %v10305_v7 = vld [vmem:[#allocation6_spill] sm:$0xff]  ;;  %v10306_v48 = vld [vmem:[#allocation15_spill] sm:$0xff] }
 0xd52   : > { %v9094_v18 = vpop.xlane.xlu1 %1998 }
 0xd53   : > { %6612 = vpow2.f32 %v4168_v42  ;;  %967 = vadd.xlane.f32.xlu0 %v10298_v50  ;;  %6187 = vmatmul.mubr.bf16.gmra.mxu0 %v4217_v35 }
 0xd54   : > { %6614 = vpow2.f32 %v4170_v38  ;;  %v9099_v4 = vpop.xlane.xlu0 %3090 }
 0xd55   : > { %3116 = vadd.xlane.f32.xlu1 %v10299_v53  ;;  %6616 = vpow2.f32 %v4174_v3 }
 0xd56   : > { %v4129_v10 = vpop.xlane.xlu1 %4128  ;;  %6618 = vpow2.f32 %v4180_v56 }
 0xd57   : > { %v4147_v43 = vsub.f32 %v8937_v20, %v4129_v10  ;;  %971 = vadd.xlane.f32.xlu0 %v10300_v60  ;;  %v10308_v10 = vld [vmem:[#allocation13_spill] sm:$0xff]  ;;  %v10309_v60 = vld [vmem:[#allocation10_spill] sm:$0xff] }
 0xd58   : > { %v9104_v8 = vpop.xlane.xlu0 %3094  ;;  %v9111_v20 = vpop.eup %6608 }
 0xd59   : > { %v4176_v21 = vmul.f32 1.442695, %v4147_v43  ;;  %3659 = vadd.xlane.f32.xlu1 %v8759_v57 }
 0xd5a   : > { %v2542_v45 = vpop.xlane.xlu1 %2541 }
 0xd5b   : > { %6620 = vpow2.f32 %v4176_v21  ;;  %975 = vadd.xlane.f32.xlu0 %v10301_v46  ;;  %v10310_v21 = vld [vmem:[#allocation17_spill] sm:$0xff] }
 0xd5c   : > { %6622 = vpow2.f32 %v4178_v33  ;;  %v9108_v25 = vpop.xlane.xlu0 %3637  ;;  %v9113_v26 = vpop.eup %6610 }
 0xd5d   : > { %3663 = vadd.xlane.f32.xlu1 %v8765_v24  ;;  %6624 = vrcp.f32 %v9015_v59 }
 0xd5e   : > { %v2546_v36 = vpop.xlane.xlu1 %2545  ;;  %6626 = vrcp.f32 %v9037_v44 }
 0xd5f   : > { %979 = vadd.xlane.f32.xlu0 %v10302_v41  ;;  %v10311_v41 = vld [vmem:[#allocation12_spill] sm:$0xff]  ;;  %6628 = vrcp.f32 %v9094_v18 }
 0xd60   : > { %v9116_v12 = vpop.eup %6612  ;;  %v9118_v57 = vpop.xlane.xlu0 %3641  ;;  %6630 = vrcp.f32 %v9024_v39  ;;  %v10315_v39 = vld [vmem:[#allocation50_spill] sm:$0xff] }
 0xd61   : > { %v9120_v55 = vpop.eup %6614  ;;  %965 = vadd.xlane.f32.xlu1 %v10303_v32  ;;  %v4218_v9 = vpack.c.bf16 %v9116_v12, %v9111_v20  ;;  %6632 = vrcp.f32 %v2542_v45 }
 0xd62   : > { %v3089_v22 = vpop.xlane.xlu1 %3088  ;;  %v4219_v24 = vpack.c.bf16 %v9113_v26, %v9120_v55  ;;  %v9131_v38 = vpop.eup %6616  ;;  %6634 = vrcp.f32 %v9032_v6  ;;  %v10316_v6 = vld [vmem:[#allocation79_spill] sm:$0xff] }
 0xd63   : > { %983 = vadd.xlane.f32.xlu0 %v10304_v30  ;;  %6190 = vmatprep.mubr.bf16.mxu0 %v4218_v9  ;;  %v9133_v42 = vpop.eup %6618  ;;  %6636 = vrcp.f32 %v2546_v36 }
 0xd64   : > { %v9128_v27 = vpop.xlane.xlu0 %1449  ;;  %6191 = vmatmul.mubr.bf16.gmra.mxu0 %v4219_v24  ;;  %v10312_v24 = vld [vmem:[#allocation14_spill] sm:$0xff]  ;;  %6638 = vrcp.f32 %v9021_v28 }
 0xd65   : > { %969 = vadd.xlane.f32.xlu1 %v10305_v7  ;;  %v10313_v7 = vld [vmem:[#allocation16_spill] sm:$0xff]  ;;  %6640 = vrcp.f32 %v3089_v22 }
 0xd66   : > { %v3093_v51 = vpop.xlane.xlu1 %3092  ;;  %6642 = vrcp.f32 %v9042_v2  ;;  %v10318_v2 = vld [vmem:[#allocation48_spill] sm:$0xff] }
 0xd67   : > { %987 = vadd.xlane.f32.xlu0 %v10306_v48  ;;  %6644 = vrcp.f32 %v3093_v51  ;;  %v10319_v51 = vld [vmem:[#allocation111_spill] sm:$0xff] }
 0xd68   : > { %v9136_v35 = vpop.eup %6620  ;;  %v9138_v49 = vpop.xlane.xlu0 %1453  ;;  %6646 = vrcp.f32 %v9065_v11 }
 0xd69   : > { %v9140_v50 = vpop.eup %6622  ;;  %973 = vadd.xlane.f32.xlu1 %v10307_v13  ;;  %v4220_v3 = vpack.c.bf16 %v9136_v35, %v9131_v38  ;;  %6648 = vrcp.f32 %v9076_v23  ;;  %v10322_v23 = vld [vmem:[#allocation49_spill] sm:$0xff] }
 0xd6a   : > { %v9145_v53 = vpop.xlane.xlu1 %3635  ;;  %v4221_v56 = vpack.c.bf16 %v9133_v42, %v9140_v50  ;;  %v6625_v44 = vpop.eup %6624  ;;  %6650 = vrcp.f32 %v9087_v62 }
 0xd6b   : > { %991 = vadd.xlane.f32.xlu0 %v10308_v10  ;;  %6194 = vmatprep.mubr.bf16.mxu0 %v4220_v3  ;;  %v1625_v3 = vmul.f32 %v6625_v44, %v10315_v39  ;;  %v10320_v39 = vld [vmem:[#allocation47_spill] sm:$0xff]  ;;  %6652 = vrcp.f32 %v9099_v4 }
 0xd6c   : > { %v9150_v43 = vpop.xlane.xlu0 %2004  ;;  %6195 = vmatmul.mubr.bf16.gmra.mxu0 %v4221_v56  ;;  %v6627_v56 = vpop.eup %6626  ;;  %6654 = vrcp.f32 %v9104_v8 }
 0xd6d   : > { %977 = vadd.xlane.f32.xlu1 %v10309_v60  ;;  %6214 = vmatprep.mubr.msk.bf16.mxu0 %vm723_vm1, %v8800_v31  ;;  %v2171_v45 = vmul.f32 %v6627_v56, %v10316_v6  ;;  %v6629_v36 = vpop.eup %6628  ;;  %v10317_v60 = vld [vmem:[#allocation78_spill] sm:$0xff] }
 0xd6e   : > { %v9155_v33 = vpop.xlane.xlu1 %3639  ;;  %v6631_v10 = vpop.eup %6630  ;;  %v10321_v6 = vld [vmem:[#allocation110_spill] sm:$0xff] }
 0xd6f   : > { %995 = vadd.xlane.f32.xlu0 %v10310_v21  ;;  %v2173_v21 = vmul.f32 %v6629_v36, %v10317_v60 }
 0xd70   : > { %v9158_v46 = vpop.xlane.xlu0 %2008 }
 0xd71   : > { %981 = vadd.xlane.f32.xlu1 %v10311_v41  ;;  %v1624_v41 = vmul.f32 %v6631_v10, %v10318_v2  ;;  %v10323_v2 = vld [vmem:[#allocation136_spill] sm:$0xff] }
 0xd72   : > { %v9161_v32 = vpop.xlane.xlu1 %1447 }
 0xd74   : > { %v9164_v9 = vpop.xlane.xlu0 %2551  ;;  %6215 = vmatmul.mubr.msk.bf16.vlgmr.msra.gmra.mxu0 %vm723_vm1, %v8792_v19 }
 0xd75   : > { %985 = vadd.xlane.f32.xlu1 %v10312_v24  ;;  %6218 = vmatprep.mubr.msk.bf16.mxu0 %vm723_vm1, %v8805_v14  ;;  %v10314_v14 = vld [vmem:[#allocation18_spill] sm:$0xff] }
 0xd76   : > { %v9171_v31 = vpop.xlane.xlu1 %1451 }
 0xd78   : > { %v9174_v30 = vpop.xlane.xlu0 %2555 }
 0xd79   : > { %989 = vadd.xlane.f32.xlu1 %v10313_v7 }
 0xd7a   : > { %v9177_v48 = vpop.xlane.xlu1 %2002 }
 0xd7c   : > { %v9181_v19 = vpop.xlane.xlu0 %3098  ;;  %6219 = vmatmul.mubr.msk.bf16.gmra.mxu0 %vm723_vm1, %v8798_v54 }
 0xd7d   : > { %993 = vadd.xlane.f32.xlu1 %v10314_v14  ;;  %6222 = vmatprep.mubr.msk.bf16.mxu0 %vm723_vm1, %v8809_v15 }
 0xd7e   : > { %v9188_v59 = vpop.xlane.xlu1 %2006 }
 0xd80   : > { %v9191_v13 = vpop.xlane.xlu0 %3102 }
 0xd82   : > { %v9193_v18 = vpop.xlane.xlu1 %2549 }
 0xd84   : > { %v9197_v54 = vpop.xlane.xlu0 %3645  ;;  %6223 = vmatmul.mubr.msk.bf16.gmra.mxu0 %vm723_vm1, %v8803_v1 }
 0xd85   : > { %1658 = vrot.lane.b32.xlu0 %v1625_v3, %s6943_s28  ;;  %6226 = vmatprep.mubr.msk.bf16.mxu0 %vm723_vm1, %v8811_v63  ;;  %v6633_v63 = vpop.eup %6632 }
 0xd86   : > { %v9204_v15 = vpop.xlane.xlu1 %2553  ;;  %v6635_v24 = vpop.eup %6634  ;;  %v2718_v14 = vmul.f32 %v6633_v63, %v10319_v51 }
 0xd87   : > { %v6637_v44 = vpop.eup %6636  ;;  %v1626_v3 = vmul.f32 %v6635_v24, %v10320_v39 }
 0xd88   : > { %v9208_v28 = vpop.xlane.xlu0 %3649  ;;  %v6639_v56 = vpop.eup %6638 }
 0xd89   : > { %2203 = vrot.lane.b32.xlu0 %v2171_v45, %s6944_s29  ;;  %v2720_v45 = vmul.f32 %v6637_v44, %v10321_v6  ;;  %v6641_v36 = vpop.eup %6640  ;;  %v1627_v60 = vmul.f32 %v6639_v56, %v10322_v23 }
 0xd8a   : > { %v9211_v1 = vpop.xlane.xlu1 %3096 }
 0xd8c   : > { %v9215_v22 = vpop.xlane.xlu0 %1457  ;;  %6227 = vmatmul.mubr.msk.bf16.gmra.mxu0 %vm723_vm1, %v8807_v5 }
 0xd8d   : > { %2207 = vrot.lane.b32.xlu0 %v2173_v21, %s6944_s29  ;;  %v6643_v21 = vpop.eup %6642 }
 0xd8e   : > { %1656 = vrot.lane.b32.xlu1 %v1624_v41, %s6943_s28  ;;  %v9222_v7 = vpop.xlane.xlu1 %3100  ;;  %v3265_v41 = vmul.f32 %v6641_v36, %v10323_v2  ;;  %v6645_v24 = vpop.eup %6644 }
 0xd8f   : > { %v6647_v44 = vpop.eup %6646 }
 0xd90   : > { %v9226_v11 = vpop.xlane.xlu0 %1461  ;;  %v6649_v36 = vpop.eup %6648 }
 0xd91   : > { %2750 = vrot.lane.b32.xlu0 %v2718_v14, %s6945_s30  ;;  %v10324_v14 = vld [vmem:[#allocation81_spill] sm:$0xff] }
 0xd92   : > { %1660 = vrot.lane.b32.xlu1 %v1626_v3, %s6943_s28  ;;  %v9231_v5 = vpop.xlane.xlu1 %3643  ;;  %v2172_v62 = vmul.f32 %v6643_v21, %v10324_v14  ;;  %v10325_v3 = vld [vmem:[#allocation135_spill] sm:$0xff]  ;;  %v10328_v21 = vld [vmem:[#allocation113_spill] sm:$0xff]  ;;  %v10330_v14 = vld [vmem:[#allocation112_spill] sm:$0xff] }
 0xd93   : > { %v3267_v56 = vmul.f32 %v6645_v24, %v10325_v3  ;;  %v2719_v2 = vmul.f32 %v6649_v36, %v10328_v21 }
 0xd94   : > { %v9235_v10 = vpop.xlane.xlu0 %2012 }
 0xd95   : > { %2754 = vrot.lane.b32.xlu0 %v2720_v45, %s6945_s30  ;;  %v10326_v45 = vld [vmem:[#allocation80_spill] sm:$0xff] }
 0xd96   : > { %1662 = vrot.lane.b32.xlu1 %v1627_v60, %s6943_s28  ;;  %v9240_v63 = vpop.xlane.xlu1 %3647  ;;  %v2174_v4 = vmul.f32 %v6647_v44, %v10326_v45  ;;  %v10332_v45 = vld [vmem:[#allocation138_spill] sm:$0xff] }
 0xd98   : > { %v9244_v51 = vpop.xlane.xlu0 %2016 }
 0xd99   : > { %3297 = vrot.lane.b32.xlu0 %v3265_v41, %s6946_s7  ;;  %v6651_v41 = vpop.eup %6650 }
 0xd9a   : > { %2205 = vrot.lane.b32.xlu1 %v2172_v62, %s6944_s29  ;;  %v9249_v39 = vpop.xlane.xlu1 %1455  ;;  %v2721_v62 = vmul.f32 %v6651_v41, %v10330_v14  ;;  %v6653_v44 = vpop.eup %6652 }
 0xd9c   : > { %v9253_v6 = vpop.xlane.xlu0 %2559 }
 0xd9d   : > { %3301 = vrot.lane.b32.xlu0 %v3267_v56, %s6946_s7 }
 0xd9e   : > { %2209 = vrot.lane.b32.xlu1 %v2174_v4, %s6944_s29  ;;  %v9258_v23 = vpop.xlane.xlu1 %1459  ;;  %v3266_v4 = vmul.f32 %v6653_v44, %v10332_v45 }
 0xda0   : > { %v9260_v60 = vpop.xlane.xlu0 %2563 }
 0xda1   : > { %10327 = vst [vmem:[#allocation64_spill] sm:$0xff] %v9260_v60  ;;  %v6655_v60 = vpop.eup %6654 }
 0xda2   : > { %2752 = vrot.lane.b32.xlu1 %v2719_v2, %s6945_s30  ;;  %v9264_v24 = vpop.xlane.xlu1 %2010  ;;  %v10334_v2 = vld [vmem:[#allocation137_spill] sm:$0xff] }
 0xda4   : > { %v9266_v8 = vpop.xlane.xlu0 %3106 }
 0xda5   : > { %10329 = vst [vmem:[#allocation63_spill] sm:$0xff] %v9266_v8  ;;  %v3268_v8 = vmul.f32 %v6655_v60, %v10334_v2 }
 0xda6   : > { %2756 = vrot.lane.b32.xlu1 %v2721_v62, %s6945_s30  ;;  %v9270_v3 = vpop.xlane.xlu1 %2014 }
 0xda8   : > { %v9272_v56 = vpop.xlane.xlu0 %3110 }
 0xda9   : > { %10331 = vst [vmem:[#allocation96_spill] sm:$0xff] %v9272_v56 }
 0xdaa   : > { %3299 = vrot.lane.b32.xlu1 %v3266_v4, %s6946_s7  ;;  %v9276_v36 = vpop.xlane.xlu1 %2557 }
 0xdab   : > { %10333 = vst [vmem:[#allocation95_spill] sm:$0xff] %v9276_v36 }
 0xdac   : > { %v9278_v21 = vpop.xlane.xlu0 %3653 }
 0xdae   : > { %3303 = vrot.lane.b32.xlu1 %v3268_v8, %s6946_s7  ;;  %v9282_v41 = vpop.xlane.xlu1 %2561 }
 0xdb0   : > { %v9284_v14 = vpop.xlane.xlu0 %3657 }
 0xdb1   : > { %10335 = vst [vmem:[#allocation65_spill] sm:$0xff] %v9284_v14 }
 0xdb2   : > { %v9286_v62 = vpop.xlane.xlu1 %3104 }
 0xdb4   : > { %v9288_v56 = vpop.xlane.xlu0 %1465 }
 0xdb5   : > { %10336 = vst [vmem:[#allocation94_spill] sm:$0xff] %v9288_v56 }
 0xdb6   : > { %v9290_v44 = vpop.xlane.xlu1 %3108 }
 0xdb8   : > { %v9292_v45 = vpop.xlane.xlu0 %1469 }
 0xdb9   : > { %10337 = vst [vmem:[#allocation97_spill] sm:$0xff] %v9292_v45 }
 0xdba   : > { %v9294_v4 = vpop.xlane.xlu1 %3651 }
 0xdbc   : > { %v9296_v36 = vpop.xlane.xlu0 %2020  ;;  %4188 = vadd.xlane.f32.xlu0 %v8976_v61 }
 0xdbd   : > { %10338 = vst [vmem:[#allocation37_spill] sm:$0xff] %v9296_v36 }
 0xdbe   : > { %v9299_v60 = vpop.xlane.xlu1 %3655 }
 0xdc0   : > { %v9301_v8 = vpop.xlane.xlu0 %2024  ;;  %4184 = vadd.xlane.f32.xlu0 %v8978_v0 }
 0xdc1   : > { %10339 = vst [vmem:[#allocation36_spill] sm:$0xff] %v9301_v8 }
 0xdc2   : > { %v9304_v2 = vpop.xlane.xlu1 %1463 }
 0xdc4   : > { %v9306_v14 = vpop.xlane.xlu0 %2567  ;;  %4196 = vadd.xlane.f32.xlu0 %v9085_v52 }
 0xdc5   : > { %10340 = vst [vmem:[#allocation67_spill] sm:$0xff] %v9306_v14 }
 0xdc6   : > { %v9309_v56 = vpop.xlane.xlu1 %1467 }
 0xdc7   : > { %10341 = vst [vmem:[#allocation69_spill] sm:$0xff] %v9309_v56 }
 0xdc8   : > { %v9311_v45 = vpop.xlane.xlu0 %2571  ;;  %4192 = vadd.xlane.f32.xlu0 %v9069_v29 }
 0xdc9   : > { %10342 = vst [vmem:[#allocation35_spill] sm:$0xff] %v9311_v45 }
 0xdca   : > { %v9314_v36 = vpop.xlane.xlu1 %2018 }
 0xdcb   : > { %10343 = vst [vmem:[#allocation99_spill] sm:$0xff] %v9314_v36 }
 0xdcc   : > { %v9316_v61 = vpop.xlane.xlu0 %3114  ;;  %4204 = vadd.xlane.f32.xlu0 %v9113_v26 }
 0xdcd   : > { %10344 = vst [vmem:[#allocation38_spill] sm:$0xff] %v9316_v61 }
 0xdce   : > { %v9319_v8 = vpop.xlane.xlu1 %2022 }
 0xdcf   : > { %10345 = vst [vmem:[#allocation101_spill] sm:$0xff] %v9319_v8 }
 0xdd0   : > { %v9321_v0 = vpop.xlane.xlu0 %3118  ;;  %4200 = vadd.xlane.f32.xlu0 %v9116_v12 }
 0xdd1   : > { %10346 = vst [vmem:[#allocation66_spill] sm:$0xff] %v9321_v0 }
 0xdd2   : > { %4186 = vadd.xlane.f32.xlu1 %v8981_v40  ;;  %v9325_v52 = vpop.xlane.xlu1 %2565 }
 0xdd3   : > { %10347 = vst [vmem:[#allocation68_spill] sm:$0xff] %v9325_v52 }
 0xdd4   : > { %v9327_v14 = vpop.xlane.xlu0 %3661  ;;  %4212 = vadd.xlane.f32.xlu0 %v9133_v42 }
 0xdd5   : > { %10348 = vst [vmem:[#allocation98_spill] sm:$0xff] %v9327_v14 }
 0xdd6   : > { %4182 = vadd.xlane.f32.xlu1 %v8973_v16  ;;  %v9331_v29 = vpop.xlane.xlu1 %2569 }
 0xdd7   : > { %10349 = vst [vmem:[#allocation100_spill] sm:$0xff] %v9331_v29 }
 0xdd8   : > { %v9333_v61 = vpop.xlane.xlu0 %3665  ;;  %4208 = vadd.xlane.f32.xlu0 %v9136_v35 }
 0xdd9   : > { %10350 = vst [vmem:[#allocation41_spill] sm:$0xff] %v9333_v61 }
 0xdda   : > { %4194 = vadd.xlane.f32.xlu1 %v9081_v58  ;;  %v9337_v26 = vpop.xlane.xlu1 %3112 }
 0xddb   : > { %10351 = vst [vmem:[#allocation126_spill] sm:$0xff] %v9337_v26 }
 0xddc   : > { %v968_v12 = vpop.xlane.xlu0 %967 }
 0xddd   : > { %6656 = vrcp.f32 %v968_v12  ;;  %v10355_v12 = vld [vmem:[#allocation22_spill] sm:$0xff] }
 0xdde   : > { %4190 = vadd.xlane.f32.xlu1 %v9073_v17  ;;  %v9340_v40 = vpop.xlane.xlu1 %3116 }
 0xddf   : > { %10352 = vst [vmem:[#allocation40_spill] sm:$0xff] %v9340_v40 }
 0xde0   : > { %v972_v14 = vpop.xlane.xlu0 %971 }
 0xde1   : > { %6658 = vrcp.f32 %v972_v14 }
 0xde2   : > { %4202 = vadd.xlane.f32.xlu1 %v9120_v55  ;;  %v9343_v16 = vpop.xlane.xlu1 %3659 }
 0xde3   : > { %10353 = vst [vmem:[#allocation72_spill] sm:$0xff] %v9343_v16 }
 0xde4   : > { %v976_v42 = vpop.xlane.xlu0 %975 }
 0xde5   : > { %6660 = vrcp.f32 %v976_v42 }
 0xde6   : > { %4198 = vadd.xlane.f32.xlu1 %v9111_v20  ;;  %v9346_v35 = vpop.xlane.xlu1 %3663  ;;  %v10356_v20 = vld [vmem:[#allocation21_spill] sm:$0xff] }
 0xde7   : > { %10354 = vst [vmem:[#allocation71_spill] sm:$0xff] %v9346_v35 }
 0xde8   : > { %v980_v58 = vpop.xlane.xlu0 %979 }
 0xde9   : > { %6662 = vrcp.f32 %v980_v58 }
 0xdea   : > { %v6657_v61 = vpop.eup %6656  ;;  %4210 = vadd.xlane.f32.xlu1 %v9140_v50  ;;  %v966_v17 = vpop.xlane.xlu1 %965 }
 0xdeb   : > { %6664 = vrcp.f32 %v966_v17  ;;  %v1119_v40 = vmul.f32 %v6657_v61, %v10355_v12  ;;  %v10357_v17 = vld [vmem:[#allocation26_spill] sm:$0xff] }
 0xdec   : > { %v984_v14 = vpop.xlane.xlu0 %983 }
 0xded   : > { %6666 = vrcp.f32 %v984_v14  ;;  %1135 = vst.msk [vmem:[#allocation2 + $0x8] sm:$0xff] %vm723_vm1, %v1119_v40 }
 0xdee   : > { %v6659_v55 = vpop.eup %6658  ;;  %4206 = vadd.xlane.f32.xlu1 %v9131_v38  ;;  %v970_v42 = vpop.xlane.xlu1 %969  ;;  %v10358_v38 = vld [vmem:[#allocation25_spill] sm:$0xff] }
 0xdef   : > { %6668 = vrcp.f32 %v970_v42  ;;  %v1121_v35 = vmul.f32 %v6659_v55, %v10356_v20 }
 0xdf0   : > { %v988_v16 = vpop.xlane.xlu0 %987 }
 0xdf1   : > { %6670 = vrcp.f32 %v988_v16  ;;  %1137 = vst.msk [vmem:[#allocation2 + $0x18] sm:$0xff] %vm723_vm1, %v1121_v35  ;;  %v10359_v16 = vld [vmem:[#allocation20_spill] sm:$0xff] }
 0xdf2   : > { %v6661_v50 = vpop.eup %6660  ;;  %v974_v58 = vpop.xlane.xlu1 %973 }
 0xdf3   : > { %6672 = vrcp.f32 %v974_v58  ;;  %v1123_v61 = vmul.f32 %v6661_v50, %v10357_v17  ;;  %v10360_v50 = vld [vmem:[#allocation30_spill] sm:$0xff] }
 0xdf4   : > { %v992_v12 = vpop.xlane.xlu0 %991 }
 0xdf5   : > { %6674 = vrcp.f32 %v992_v12  ;;  %1139 = vst.msk [vmem:[#allocation2 + $0x28] sm:$0xff] %vm723_vm1, %v1123_v61 }
 0xdf6   : > { %v6663_v40 = vpop.eup %6662  ;;  %v978_v14 = vpop.xlane.xlu1 %977 }
 0xdf7   : > { %6676 = vrcp.f32 %v978_v14  ;;  %v1125_v42 = vmul.f32 %v6663_v40, %v10358_v38  ;;  %v10361_v40 = vld [vmem:[#allocation19_spill] sm:$0xff] }
 0xdf8   : > { %v6665_v26 = vpop.eup %6664  ;;  %v996_v55 = vpop.xlane.xlu0 %995 }
 0xdf9   : > { %6678 = vrcp.f32 %v996_v55  ;;  %v1118_v20 = vmul.f32 %v6665_v26, %v10359_v16  ;;  %1141 = vst.msk [vmem:[#allocation2 + $0x38] sm:$0xff] %vm723_vm1, %v1125_v42  ;;  %v10362_v42 = vld [vmem:[#allocation29_spill] sm:$0xff] }
 0xdfa   : > { %v6667_v35 = vpop.eup %6666  ;;  %v982_v58 = vpop.xlane.xlu1 %981 }
 0xdfb   : > { %6680 = vrcp.f32 %v982_v58  ;;  %1134 = vst.msk [vmem:[#allocation2] sm:$0xff] %vm723_vm1, %v1118_v20  ;;  %v1127_v17 = vmul.f32 %v6667_v35, %v10360_v50  ;;  %v10363_v20 = vld [vmem:[#allocation24_spill] sm:$0xff] }
 0xdfc   : > { %v6669_v61 = vpop.eup %6668  ;;  %v1659_v12 = vpop.permute.xlu0 %1658 }
 0xdfd   : > { %1706 = vst.msk [vmem:[#allocation2 + $0x8] sm:$0xff] %vm1704_vm3, %v1659_v12  ;;  %v1120_v14 = vmul.f32 %v6669_v61, %v10361_v40  ;;  %v10364_v61 = vld [vmem:[#allocation34_spill] sm:$0xff] }
 0xdfe   : > { %1143 = vst.msk [vmem:[#allocation2 + $0x48] sm:$0xff] %vm723_vm1, %v1127_v17  ;;  %v6671_v38 = vpop.eup %6670  ;;  %v986_v26 = vpop.xlane.xlu1 %985 }
 0xdff   : > { %6682 = vrcp.f32 %v986_v26  ;;  %1136 = vst.msk [vmem:[#allocation2 + $0x10] sm:$0xff] %vm723_vm1, %v1120_v14  ;;  %v1129_v55 = vmul.f32 %v6671_v38, %v10362_v42  ;;  %v10365_v26 = vld [vmem:[#allocation23_spill] sm:$0xff]  ;;  %v10366_v42 = vld [vmem:[#allocation33_spill] sm:$0xff] }
 0xe00   : > { %v6673_v16 = vpop.eup %6672  ;;  %v2204_v58 = vpop.permute.xlu0 %2203 }
 0xe01   : > { %v1122_v0 = vmul.f32 %v6673_v16, %v10363_v20  ;;  %1145 = vst.msk [vmem:[#allocation2 + $0x58] sm:$0xff] %vm723_vm1, %v1129_v55  ;;  %v9374_v20 = vpop.f32.mrf.mxu0 }
 0xe02   : > { %v6675_v35 = vpop.eup %6674  ;;  %v990_v50 = vpop.xlane.xlu1 %989 }
 0xe03   : > { %6684 = vrcp.f32 %v990_v50  ;;  %1138 = vst.msk [vmem:[#allocation2 + $0x20] sm:$0xff] %vm723_vm1, %v1122_v0  ;;  %v1131_v17 = vmul.f32 %v6675_v35, %v10364_v61  ;;  %v10367_v0 = vld [vmem:[#allocation28_spill] sm:$0xff] }
 0xe04   : > { %v6677_v12 = vpop.eup %6676  ;;  %v2208_v40 = vpop.permute.xlu0 %2207 }
 0xe05   : > { %v1124_v29 = vmul.f32 %v6677_v12, %v10365_v26  ;;  %1147 = vst.msk [vmem:[#allocation2 + $0x68] sm:$0xff] %vm723_vm1, %v1131_v17  ;;  %v9380_v12 = vpop.f32.mrf.mxu0  ;;  %v10368_v26 = vld [vmem:[#allocation27_spill] sm:$0xff] }
 0xe06   : > { %v6679_v14 = vpop.eup %6678  ;;  %v994_v38 = vpop.xlane.xlu1 %993 }
 0xe07   : > { %6686 = vrcp.f32 %v994_v38  ;;  %1140 = vst.msk [vmem:[#allocation2 + $0x30] sm:$0xff] %vm723_vm1, %v1124_v29  ;;  %v1133_v55 = vmul.f32 %v6679_v14, %v10366_v42 }
 0xe08   : > { %v6681_v16 = vpop.eup %6680  ;;  %v2751_v50 = vpop.permute.xlu0 %2750  ;;  %6688 = vrcp.f32 %v9108_v25 }
 0xe09   : > { %v1126_v35 = vmul.f32 %v6681_v16, %v10367_v0  ;;  %1149 = vst.msk [vmem:[#allocation2 + $0x78] sm:$0xff] %vm723_vm1, %v1133_v55  ;;  %v9387_v55 = vpop.f32.mrf.mxu0  ;;  %6690 = vrcp.f32 %v9118_v57 }
 0xe0a   : > { %v1657_v61 = vpop.permute.xlu1 %1656  ;;  %6692 = vrcp.f32 %v9145_v53 }
 0xe0b   : > { %1705 = vst.msk [vmem:[#allocation2] sm:$0xff] %vm1704_vm3, %v1657_v61  ;;  %v9395_v61 = vpop.f32.mrf.mxu0 }
 0xe0c   : > { %1142 = vst.msk [vmem:[#allocation2 + $0x40] sm:$0xff] %vm723_vm1, %v1126_v35  ;;  %v6683_v17 = vpop.eup %6682  ;;  %v2755_v29 = vpop.permute.xlu0 %2754 }
 0xe0d   : > { %2252 = vst.msk [vmem:[#allocation2] sm:$0xff] %vm2251_vm4, %v2204_v58  ;;  %v1128_v14 = vmul.f32 %v6683_v17, %v10368_v26  ;;  %v10369_v58 = vld [vmem:[#allocation32_spill] sm:$0xff]  ;;  %v10370_v26 = vld [vmem:[#allocation31_spill] sm:$0xff] }
 0xe0e   : > { %2799 = vst.msk [vmem:[#allocation2] sm:$0xff] %vm2798_vm5, %v2751_v50  ;;  %v1661_v38 = vpop.permute.xlu1 %1660 }
 0xe0f   : > { %1707 = vst.msk [vmem:[#allocation2 + $0x10] sm:$0xff] %vm1704_vm3, %v1661_v38 }
 0xe10   : > { %1144 = vst.msk [vmem:[#allocation2 + $0x50] sm:$0xff] %vm723_vm1, %v1128_v14  ;;  %v6685_v42 = vpop.eup %6684  ;;  %v3298_v16 = vpop.permute.xlu0 %3297 }
 0xe11   : > { %2254 = vst.msk [vmem:[#allocation2 + $0x10] sm:$0xff] %vm2251_vm4, %v2208_v40  ;;  %v1130_v50 = vmul.f32 %v6685_v42, %v10369_v58 }
 0xe12   : > { %3346 = vst.msk [vmem:[#allocation2] sm:$0xff] %vm3345_vm6, %v3298_v16  ;;  %v1663_v0 = vpop.permute.xlu1 %1662 }
 0xe13   : > { %2801 = vst.msk [vmem:[#allocation2 + $0x10] sm:$0xff] %vm2798_vm5, %v2755_v29  ;;  %v9399_v14 = vpop.f32.mrf.mxu0 }
 0xe14   : > { %1708 = vst.msk [vmem:[#allocation2 + $0x18] sm:$0xff] %vm1704_vm3, %v1663_v0  ;;  %v6687_v35 = vpop.eup %6686  ;;  %v3302_v17 = vpop.permute.xlu0 %3301 }
 0xe15   : > { %1146 = vst.msk [vmem:[#allocation2 + $0x60] sm:$0xff] %vm723_vm1, %v1130_v50  ;;  %v1132_v40 = vmul.f32 %v6687_v35, %v10370_v26  ;;  %v9403_v29 = vpop.f32.mrf.mxu0 }
 0xe16   : > { %3348 = vst.msk [vmem:[#allocation2 + $0x10] sm:$0xff] %vm3345_vm6, %v3302_v17  ;;  %v2206_v38 = vpop.permute.xlu1 %2205 }
 0xe17   : > { %2253 = vst.msk [vmem:[#allocation2 + $0x8] sm:$0xff] %vm2251_vm4, %v2206_v38  ;;  %v9406_v16 = vpop.f32.mrf.mxu0 }
 0xe18   : > { %1148 = vst.msk [vmem:[#allocation2 + $0x70] sm:$0xff] %vm723_vm1, %v1132_v40 }
 0xe19   : > { %v9409_v50 = vpop.f32.mrf.mxu0 }
 0xe1a   : > { %v2210_v42 = vpop.permute.xlu1 %2209 }
 0xe1b   : > { %2255 = vst.msk [vmem:[#allocation2 + $0x18] sm:$0xff] %vm2251_vm4, %v2210_v42 }
 0xe1e   : > { %v2753_v58 = vpop.permute.xlu1 %2752 }
 0xe1f   : > { %2800 = vst.msk [vmem:[#allocation2 + $0x8] sm:$0xff] %vm2798_vm5, %v2753_v58 }
 0xe22   : > { %v2757_v0 = vpop.permute.xlu1 %2756 }
 0xe23   : > { %2802 = vst.msk [vmem:[#allocation2 + $0x18] sm:$0xff] %vm2798_vm5, %v2757_v0 }
 0xe24   : > { %v9412_v35 = vpop.f32.mrf.mxu0 }
 0xe25   : > { %10371 = vst [vmem:[#allocation39_spill] sm:$0xff] %v9412_v35 }
 0xe26   : > { %v9414_v17 = vpop.f32.mrf.mxu0  ;;  %v3300_v26 = vpop.permute.xlu1 %3299 }
 0xe27   : > { %10372 = vst [vmem:[#allocation104_spill] sm:$0xff] %v9414_v17  ;;  %3347 = vst.msk [vmem:[#allocation2 + $0x8] sm:$0xff] %vm3345_vm6, %v3300_v26 }
 0xe28   : > { %v9417_v40 = vpop.f32.mrf.mxu0 }
 0xe29   : > { %10373 = vst [vmem:[#allocation42_spill] sm:$0xff] %v9417_v40 }
 0xe2a   : > { %v9419_v38 = vpop.f32.mrf.mxu0  ;;  %v3304_v42 = vpop.permute.xlu1 %3303 }
 0xe2b   : > { %10374 = vst [vmem:[#allocation103_spill] sm:$0xff] %v9419_v38  ;;  %3349 = vst.msk [vmem:[#allocation2 + $0x18] sm:$0xff] %vm3345_vm6, %v3304_v42 }
 0xe2c   : > { %v9422_v58 = vpop.f32.mrf.mxu0 }
 0xe2d   : > { %10375 = vst [vmem:[#allocation70_spill] sm:$0xff] %v9422_v58 }
 0xe2e   : > { %v9424_v45 = vpop.f32.mrf.mxu0 }
 0xe2f   : > { %10376 = vst [vmem:[#allocation129_spill] sm:$0xff] %v9424_v45 }
 0xe30   : > { %v9426_v52 = vpop.f32.mrf.mxu0 }
 0xe31   : > { %10377 = vst [vmem:[#allocation73_spill] sm:$0xff] %v9426_v52 }
 0xe32   : > { %v9428_v0 = vpop.f32.mrf.mxu0 }
 0xe33   : > { %10378 = vst [vmem:[#allocation128_spill] sm:$0xff] %v9428_v0 }
 0xe34   : > { %v6216_v35 = vpop.f32.mrf.mxu0 }
 0xe35   : > { %v9432_v8 = vsel %vm722_vm2, %v6216_v35, -inf }
 0xe36   : > { %v4570_v26 = vpop.f32.mrf.mxu0  ;;  %4653 = vmax.xlane.f32.xlu0 %v9432_v8 }
 0xe37   : > { %v9437_v42 = vsel %vm722_vm2, %v4570_v26, -inf }
 0xe38   : > { %v6217_v17 = vpop.f32.mrf.mxu0 }
 0xe39   : > { %v9447_v35 = vsel %vm722_vm2, %v6217_v17, -inf }
 0xe3a   : > { %v4573_v58 = vpop.f32.mrf.mxu0  ;;  %4649 = vmax.xlane.f32.xlu0 %v9437_v42 }
 0xe3b   : > { %v9442_v52 = vsel %vm722_vm2, %v4573_v58, -inf }
 0xe3c   : > { %v6220_v45 = vpop.f32.mrf.mxu0  ;;  %4651 = vmax.xlane.f32.xlu1 %v9442_v52 }
 0xe3d   : > { %v9452_v26 = vsel %vm722_vm2, %v6220_v45, -inf }
 0xe3e   : > { %v4586_v0 = vpop.f32.mrf.mxu0  ;;  %4655 = vmax.xlane.f32.xlu0 %v9447_v35  ;;  %10379 = vst [vmem:[#allocation102_spill] sm:$0xff] %v9452_v26 }
 0xe3f   : > { %v9462_v17 = vsel %vm722_vm2, %v4586_v0, -inf }
 0xe40   : > { %v6221_v36 = vpop.f32.mrf.mxu0  ;;  %4661 = vmax.xlane.f32.xlu1 %v9452_v26  ;;  %10381 = vst [vmem:[#allocation127_spill] sm:$0xff] %v9462_v17 }
 0xe41   : > { %v9457_v58 = vsel %vm722_vm2, %v6221_v36, -inf }
 0xe42   : > { %10380 = vst [vmem:[#allocation105_spill] sm:$0xff] %v9457_v58  ;;  %v4589_v40 = vpop.f32.mrf.mxu0  ;;  %4663 = vmax.xlane.f32.xlu0 %v9457_v58 }
 0xe43   : > { %v9467_v45 = vsel %vm722_vm2, %v4589_v40, -inf }
 0xe44   : > { %v6224_v56 = vpop.f32.mrf.mxu0  ;;  %4657 = vmax.xlane.f32.xlu1 %v9462_v17  ;;  %10382 = vst [vmem:[#allocation43_spill] sm:$0xff] %v9467_v45 }
 0xe45   : > { %v9472_v36 = vsel %vm722_vm2, %v6224_v56, -inf }
 0xe46   : > { %v4602_v38 = vpop.f32.mrf.mxu0  ;;  %4659 = vmax.xlane.f32.xlu0 %v9467_v45  ;;  %10383 = vst [vmem:[#allocation130_spill] sm:$0xff] %v9472_v36 }
 0xe47   : > { %v9482_v40 = vsel %vm722_vm2, %v4602_v38, -inf }
 0xe48   : > { %v6225_v26 = vpop.f32.mrf.mxu0  ;;  %4669 = vmax.xlane.f32.xlu1 %v9472_v36  ;;  %10385 = vst [vmem:[#allocation76_spill] sm:$0xff] %v9482_v40 }
 0xe49   : > { %v9477_v0 = vsel %vm722_vm2, %v6225_v26, -inf }
 0xe4a   : > { %10384 = vst [vmem:[#allocation46_spill] sm:$0xff] %v9477_v0  ;;  %v4605_v58 = vpop.f32.mrf.mxu0  ;;  %4671 = vmax.xlane.f32.xlu0 %v9477_v0  ;;  %v4189_v0 = vpop.xlane.xlu0 %4188 }
 0xe4b   : > { %v9487_v56 = vsel %vm722_vm2, %v4605_v58, -inf }
 0xe4c   : > { %v6228_v17 = vpop.f32.mrf.mxu0  ;;  %4665 = vmax.xlane.f32.xlu1 %v9482_v40 }
 0xe4d   : > { %v9492_v26 = vsel %vm722_vm2, %v6228_v17, -inf }
 0xe4e   : > { %v4618_v45 = vpop.f32.mrf.mxu0  ;;  %4667 = vmax.xlane.f32.xlu0 %v9487_v56  ;;  %10386 = vst [vmem:[#allocation75_spill] sm:$0xff] %v9492_v26 }
 0xe4f   : > { %v9503_v58 = vsel %vm722_vm2, %v4618_v45, -inf  ;;  %v6689_v45 = vpop.eup %6688 }
 0xe50   : > { %v6229_v36 = vpop.f32.mrf.mxu0  ;;  %4677 = vmax.xlane.f32.xlu1 %v9492_v26  ;;  %v3813_v37 = vmul.f32 %v6689_v45, %v8819_v34 }
 0xe51   : > { %v9497_v38 = vsel %vm722_vm2, %v6229_v36, -inf  ;;  %v4185_v36 = vpop.xlane.xlu0 %4184 }
 0xe52   : > { %v4621_v40 = vpop.f32.mrf.mxu0  ;;  %4679 = vmax.xlane.f32.xlu0 %v9497_v38  ;;  %6694 = vrcp.f32 %v4185_v36 }
 0xe53   : > { %v9508_v17 = vsel %vm722_vm2, %v4621_v40, -inf  ;;  %6696 = vrcp.f32 %v9155_v33  ;;  %v6691_v40 = vpop.eup %6690  ;;  %v10387_v33 = vld [vmem:[#allocation152_spill] sm:$0xff] }
 0xe54   : > { %4673 = vmax.xlane.f32.xlu1 %v9503_v58  ;;  %6698 = vrcp.f32 %v4189_v0  ;;  %v6693_v57 = vpop.eup %6692  ;;  %v3815_v53 = vmul.f32 %v6691_v40, %v8817_v47  ;;  %v10388_v47 = vld [vmem:[#allocation151_spill] sm:$0xff] }
 0xe55   : > { %v3812_v0 = vmul.f32 %v6693_v57, %v10387_v33 }
 0xe56   : > { %4675 = vmax.xlane.f32.xlu0 %v9508_v17 }
 0xe5b   : > { %v4187_v26 = vpop.xlane.xlu1 %4186 }
 0xe5f   : > { %v4183_v25 = vpop.xlane.xlu1 %4182  ;;  %v6695_v36 = vpop.eup %6694 }
 0xe60   : > { %6700 = vrcp.f32 %v4183_v25  ;;  %v4360_v34 = vmul.f32 %v6695_v36, %v9395_v61 }
 0xe61   : > { %6702 = vrcp.f32 %v9128_v27  ;;  %v6697_v27 = vpop.eup %6696 }
 0xe62   : > { %6704 = vrcp.f32 %v4187_v26  ;;  %v6699_v25 = vpop.eup %6698 }
 0xe63   : > { %6706 = vrcp.f32 %v9138_v49  ;;  %v3814_v49 = vmul.f32 %v6697_v27, %v10388_v47  ;;  %v10395_v47 = vld [vmem:[#allocation83_spill] sm:$0xff] }
 0xe64   : > { %6708 = vrcp.f32 %v9161_v32  ;;  %v4362_v32 = vmul.f32 %v6699_v25, %v9387_v55 }
 0xe65   : > { %3846 = vrot.lane.b32.xlu1 %v3813_v37, %s6947_s8  ;;  %6710 = vrcp.f32 %v9150_v43 }
 0xe66   : > { %6712 = vrcp.f32 %v9171_v31  ;;  %v10389_v31 = vld [vmem:[#allocation54_spill] sm:$0xff] }
 0xe67   : > { %6714 = vrcp.f32 %v9158_v46 }
 0xe68   : > { %6716 = vrcp.f32 %v9177_v48  ;;  %v10390_v48 = vld [vmem:[#allocation53_spill] sm:$0xff] }
 0xe69   : > { %3850 = vrot.lane.b32.xlu1 %v3815_v53, %s6947_s8  ;;  %6718 = vrcp.f32 %v9164_v9  ;;  %v10391_v9 = vld [vmem:[#allocation52_spill] sm:$0xff] }
 0xe6a   : > { %6720 = vrcp.f32 %v9188_v59  ;;  %v10392_v59 = vld [vmem:[#allocation85_spill] sm:$0xff] }
 0xe6b   : > { %6722 = vrcp.f32 %v9174_v30  ;;  %v10393_v30 = vld [vmem:[#allocation51_spill] sm:$0xff] }
 0xe6c   : > { %3844 = vrot.lane.b32.xlu0 %v3812_v0, %s6947_s8  ;;  %6724 = vrcp.f32 %v9193_v18  ;;  %v10394_v18 = vld [vmem:[#allocation84_spill] sm:$0xff] }
 0xe6d   : > { %4393 = vrot.lane.b32.xlu1 %v4360_v34, %s6948_s9  ;;  %v6701_v26 = vpop.eup %6700  ;;  %6726 = vrcp.f32 %v9181_v19  ;;  %v4197_v19 = vpop.xlane.xlu0 %4196 }
 0xe6e   : > { %v6703_v45 = vpop.eup %6702  ;;  %v4359_v43 = vmul.f32 %v6701_v26, %v9380_v12  ;;  %6728 = vrcp.f32 %v9204_v15  ;;  %v10396_v15 = vld [vmem:[#allocation117_spill] sm:$0xff] }
 0xe6f   : > { %v6705_v61 = vpop.eup %6704  ;;  %v1629_v37 = vmul.f32 %v6703_v45, %v10389_v31  ;;  %6730 = vrcp.f32 %v9191_v13  ;;  %v10397_v13 = vld [vmem:[#allocation82_spill] sm:$0xff] }
 0xe70   : > { %3848 = vrot.lane.b32.xlu0 %v3814_v49, %s6947_s8  ;;  %v6707_v40 = vpop.eup %6706  ;;  %v4361_v46 = vmul.f32 %v6705_v61, %v9374_v20  ;;  %6732 = vrcp.f32 %v9211_v1  ;;  %v10398_v1 = vld [vmem:[#allocation116_spill] sm:$0xff] }
 0xe71   : > { %4397 = vrot.lane.b32.xlu1 %v4362_v32, %s6948_s9  ;;  %v6709_v55 = vpop.eup %6708  ;;  %v1631_v57 = vmul.f32 %v6707_v40, %v10390_v48  ;;  %6734 = vrcp.f32 %v9197_v54  ;;  %v4193_v40 = vpop.xlane.xlu0 %4192 }
 0xe72   : > { %v6711_v12 = vpop.eup %6710  ;;  %v1628_v53 = vmul.f32 %v6709_v55, %v10391_v9  ;;  %6736 = vrcp.f32 %v9222_v7  ;;  %v4195_v54 = vpop.xlane.xlu1 %4194  ;;  %v10400_v7 = vld [vmem:[#allocation142_spill] sm:$0xff] }
 0xe73   : > { %v6713_v36 = vpop.eup %6712  ;;  %v2176_v33 = vmul.f32 %v6711_v12, %v10392_v59  ;;  %6738 = vrcp.f32 %v9208_v28  ;;  %v10401_v28 = vld [vmem:[#allocation114_spill] sm:$0xff]  ;;  %v10402_v59 = vld [vmem:[#allocation141_spill] sm:$0xff] }
 0xe74   : > { %4391 = vrot.lane.b32.xlu0 %v4359_v43, %s6948_s9  ;;  %v6715_v20 = vpop.eup %6714  ;;  %v1630_v0 = vmul.f32 %v6713_v36, %v10393_v30  ;;  %6740 = vrcp.f32 %v9231_v5 }
 0xe75   : > { %1666 = vrot.lane.b32.xlu1 %v1629_v37, %s6943_s28  ;;  %v6717_v27 = vpop.eup %6716  ;;  %v2178_v34 = vmul.f32 %v6715_v20, %v10394_v18  ;;  %6742 = vrcp.f32 %v4193_v40  ;;  %v10403_v20 = vld [vmem:[#allocation140_spill] sm:$0xff] }
 0xe76   : > { %v6719_v25 = vpop.eup %6718  ;;  %v2175_v49 = vmul.f32 %v6717_v27, %v10395_v47  ;;  %6744 = vrcp.f32 %v9240_v63  ;;  %v4191_v36 = vpop.xlane.xlu1 %4190  ;;  %v10404_v27 = vld [vmem:[#allocation156_spill] sm:$0xff]  ;;  %v10406_v47 = vld [vmem:[#allocation155_spill] sm:$0xff] }
 0xe77   : > { %v6721_v26 = vpop.eup %6720  ;;  %v2723_v32 = vmul.f32 %v6719_v25, %v10396_v15  ;;  %6746 = vrcp.f32 %v4197_v19  ;;  %v10410_v40 = vld [vmem:[#allocation64_spill] sm:$0xff] }
 0xe78   : > { %4395 = vrot.lane.b32.xlu0 %v4361_v46, %s6948_s9  ;;  %v6723_v45 = vpop.eup %6722  ;;  %v2177_v43 = vmul.f32 %v6721_v26, %v10397_v13  ;;  %v10399_v46 = vld [vmem:[#allocation115_spill] sm:$0xff]  ;;  %6748 = vrcp.f32 %v4191_v36  ;;  %v10417_v36 = vld [vmem:[#allocation96_spill] sm:$0xff] }
 0xe79   : > { %1670 = vrot.lane.b32.xlu1 %v1631_v57, %s6943_s28  ;;  %v6725_v61 = vpop.eup %6724  ;;  %v2725_v31 = vmul.f32 %v6723_v45, %v10398_v1  ;;  %6750 = vrcp.f32 %v9215_v22  ;;  %v10407_v22 = vld [vmem:[#allocation154_spill] sm:$0xff] }
 0xe7a   : > { %v6727_v37 = vpop.eup %6726  ;;  %v2722_v55 = vmul.f32 %v6725_v61, %v10399_v46  ;;  %6752 = vrcp.f32 %v4195_v54  ;;  %v10412_v46 = vld [vmem:[#allocation95_spill] sm:$0xff] }
 0xe7b   : > { %v6729_v48 = vpop.eup %6728  ;;  %v3270_v57 = vmul.f32 %v6727_v37, %v10400_v7  ;;  %6754 = vrcp.f32 %v9226_v11  ;;  %v10408_v11 = vld [vmem:[#allocation153_spill] sm:$0xff] }
 0xe7c   : > { %1664 = vrot.lane.b32.xlu0 %v1628_v53, %s6943_s28  ;;  %v6731_v12 = vpop.eup %6730  ;;  %v2724_v9 = vmul.f32 %v6729_v48, %v10401_v28  ;;  %6756 = vrcp.f32 %v9249_v39  ;;  %v10416_v28 = vld [vmem:[#allocation55_spill] sm:$0xff] }
 0xe7d   : > { %2213 = vrot.lane.b32.xlu1 %v2176_v33, %s6944_s29  ;;  %v6733_v53 = vpop.eup %6732  ;;  %v3272_v5 = vmul.f32 %v6731_v12, %v10402_v59  ;;  %6758 = vrcp.f32 %v9235_v10 }
 0xe7e   : > { %v6735_v33 = vpop.eup %6734  ;;  %v3269_v30 = vmul.f32 %v6733_v53, %v10403_v20  ;;  %6760 = vrcp.f32 %v9258_v23  ;;  %v10409_v23 = vld [vmem:[#allocation58_spill] sm:$0xff] }
 0xe7f   : > { %v3817_v63 = vmul.f32 %v6735_v33, %v10404_v27  ;;  %6762 = vrcp.f32 %v9244_v51  ;;  %v10418_v33 = vld [vmem:[#allocation88_spill] sm:$0xff] }
 0xe80   : > { %1668 = vrot.lane.b32.xlu0 %v1630_v0, %s6943_s28  ;;  %v6737_v0 = vpop.eup %6736  ;;  %6764 = vrcp.f32 %v9264_v24  ;;  %v10411_v24 = vld [vmem:[#allocation57_spill] sm:$0xff] }
 0xe81   : > { %2217 = vrot.lane.b32.xlu1 %v2178_v34, %s6944_s29  ;;  %v6739_v18 = vpop.eup %6738  ;;  %v10405_v34 = vld [vmem:[#allocation139_spill] sm:$0xff]  ;;  %6766 = vrcp.f32 %v9253_v6  ;;  %v4205_v6 = vpop.xlane.xlu0 %4204 }
 0xe82   : > { %v3271_v25 = vmul.f32 %v6737_v0, %v10405_v34  ;;  %v6741_v19 = vpop.eup %6740  ;;  %6768 = vrcp.f32 %v9270_v3  ;;  %v10415_v3 = vld [vmem:[#allocation89_spill] sm:$0xff]  ;;  %v10419_v0 = vld [vmem:[#allocation87_spill] sm:$0xff] }
 0xe83   : > { %v6743_v26 = vpop.eup %6742  ;;  %v3816_v15 = vmul.f32 %v6741_v19, %v10407_v22  ;;  %6770 = vrcp.f32 %v10410_v40  ;;  %v10423_v22 = vld [vmem:[#allocation120_spill] sm:$0xff] }
 0xe84   : > { %2211 = vrot.lane.b32.xlu0 %v2175_v49, %s6944_s29  ;;  %v3819_v49 = vmul.f32 %v6739_v18, %v10406_v47  ;;  %v4364_v45 = vmul.f32 %v6743_v26, %v9409_v50  ;;  %6772 = vrcp.f32 %v10412_v46  ;;  %v10421_v47 = vld [vmem:[#allocation86_spill] sm:$0xff]  ;;  %v10422_v26 = vld [vmem:[#allocation65_spill] sm:$0xff] }
 0xe85   : > { %2760 = vrot.lane.b32.xlu1 %v2723_v32, %s6945_s30  ;;  %v6745_v32 = vpop.eup %6744  ;;  %v4201_v59 = vpop.xlane.xlu0 %4200 }
 0xe86   : > { %v6747_v13 = vpop.eup %6746 }
 0xe87   : > { %v6749_v61 = vpop.eup %6748  ;;  %v4366_v39 = vmul.f32 %v6747_v13, %v9406_v16 }
 0xe88   : > { %2215 = vrot.lane.b32.xlu0 %v2177_v43, %s6944_s29  ;;  %v3818_v43 = vmul.f32 %v6745_v32, %v10408_v11  ;;  %v6751_v1 = vpop.eup %6750  ;;  %v4363_v10 = vmul.f32 %v6749_v61, %v9403_v29  ;;  %v10424_v32 = vld [vmem:[#allocation119_spill] sm:$0xff] }
 0xe89   : > { %2764 = vrot.lane.b32.xlu1 %v2725_v31, %s6945_s30  ;;  %v6753_v50 = vpop.eup %6752  ;;  %v1633_v31 = vmul.f32 %v6751_v1, %v10409_v23  ;;  %v10426_v1 = vld [vmem:[#allocation118_spill] sm:$0xff]  ;;  %v10427_v23 = vld [vmem:[#allocation145_spill] sm:$0xff] }
 0xe8a   : > { %v6755_v37 = vpop.eup %6754  ;;  %v4365_v51 = vmul.f32 %v6753_v50, %v9399_v14 }
 0xe8b   : > { %v6757_v16 = vpop.eup %6756  ;;  %v1635_v54 = vmul.f32 %v6755_v37, %v10411_v24 }
 0xe8c   : > { %2758 = vrot.lane.b32.xlu0 %v2722_v55, %s6945_s30  ;;  %v6759_v29 = vpop.eup %6758  ;;  %v10413_v55 = vld [vmem:[#allocation56_spill] sm:$0xff] }
 0xe8d   : > { %3307 = vrot.lane.b32.xlu1 %v3270_v57, %s6946_s7  ;;  %v1632_v48 = vmul.f32 %v6757_v16, %v10413_v55  ;;  %v6761_v7 = vpop.eup %6760  ;;  %v10414_v57 = vld [vmem:[#allocation63_spill] sm:$0xff]  ;;  %v2180_v14 = vmul.f32 %v6759_v29, %v10415_v3  ;;  %v10428_v16 = vld [vmem:[#allocation144_spill] sm:$0xff] }
 0xe8e   : > { %6774 = vrcp.f32 %v10414_v57  ;;  %v6763_v12 = vpop.eup %6762 }
 0xe8f   : > { %6776 = vrcp.f32 %v9282_v41  ;;  %v6765_v53 = vpop.eup %6764  ;;  %v2182_v20 = vmul.f32 %v6763_v12, %v10418_v33  ;;  %v10420_v41 = vld [vmem:[#allocation121_spill] sm:$0xff]  ;;  %v10432_v12 = vld [vmem:[#allocation143_spill] sm:$0xff] }
 0xe90   : > { %2762 = vrot.lane.b32.xlu0 %v2724_v9, %s6945_s30  ;;  %v1634_v9 = vmul.f32 %v6761_v7, %v10416_v28  ;;  %6778 = vrcp.f32 %v10417_v36  ;;  %v2179_v27 = vmul.f32 %v6765_v53, %v10419_v0  ;;  %v10431_v7 = vld [vmem:[#allocation97_spill] sm:$0xff]  ;;  %v10435_v0 = vld [vmem:[#allocation158_spill] sm:$0xff] }
 0xe91   : > { %3311 = vrot.lane.b32.xlu1 %v3272_v5, %s6946_s7  ;;  %v4203_v5 = vpop.xlane.xlu1 %4202  ;;  %6780 = vrcp.f32 %v9286_v62 }
 0xe92   : > { %6782 = vrcp.f32 %v9278_v21 }
 0xe93   : > { %6784 = vrcp.f32 %v9290_v44 }
 0xe94   : > { %3305 = vrot.lane.b32.xlu0 %v3269_v30, %s6946_s7  ;;  %v6767_v30 = vpop.eup %6766  ;;  %6786 = vrcp.f32 %v10422_v26  ;;  %v10439_v26 = vld [vmem:[#allocation69_spill] sm:$0xff] }
 0xe95   : > { %3854 = vrot.lane.b32.xlu1 %v3817_v63, %s6947_s8  ;;  %v6769_v63 = vpop.eup %6768  ;;  %v2727_v18 = vmul.f32 %v6767_v30, %v10420_v41  ;;  %v4199_v19 = vpop.xlane.xlu1 %4198  ;;  %6788 = vrcp.f32 %v9294_v4 }
 0xe96   : > { %v6771_v34 = vpop.eup %6770  ;;  %6790 = vrcp.f32 %v4201_v59  ;;  %v10434_v59 = vld [vmem:[#allocation159_spill] sm:$0xff] }
 0xe97   : > { %v6773_v62 = vpop.eup %6772  ;;  %6792 = vrcp.f32 %v9299_v60 }
 0xe98   : > { %3309 = vrot.lane.b32.xlu0 %v3271_v25, %s6946_s7  ;;  %v9629_v25 = vpop.xlane.xlu0 %4212  ;;  %6794 = vrcp.f32 %v4205_v6  ;;  %v10430_v6 = vld [vmem:[#allocation160_spill] sm:$0xff] }
 0xe99   : > { %3858 = vrot.lane.b32.xlu1 %v3819_v49, %s6947_s8  ;;  %v2181_v49 = vmul.f32 %v6769_v63, %v10421_v47  ;;  %v9642_v44 = vpop.xlane.xlu1 %4210  ;;  %6796 = vrcp.f32 %v4199_v19 }
 0xe9b   : > { %v6775_v21 = vpop.eup %6774 }
 0xe9c   : > { %3852 = vrot.lane.b32.xlu0 %v3816_v15, %s6947_s8  ;;  %v2729_v15 = vmul.f32 %v6771_v34, %v10423_v22  ;;  %v6777_v13 = vpop.eup %6776  ;;  %v9640_v11 = vpop.xlane.xlu0 %4208 }
 0xe9d   : > { %4401 = vrot.lane.b32.xlu1 %v4364_v45, %s6948_s9  ;;  %v2726_v45 = vmul.f32 %v6773_v62, %v10424_v32  ;;  %v10441_v32 = vld [vmem:[#allocation157_spill] sm:$0xff] }
 0xea0   : > { %3856 = vrot.lane.b32.xlu0 %v3818_v43, %s6947_s8  ;;  %v10425_v43 = vld [vmem:[#allocation146_spill] sm:$0xff] }
 0xea1   : > { %4405 = vrot.lane.b32.xlu1 %v4366_v39, %s6948_s9  ;;  %v3274_v61 = vmul.f32 %v6775_v21, %v10425_v43  ;;  %v6779_v39 = vpop.eup %6778  ;;  %v10442_v43 = vld [vmem:[#allocation36_spill] sm:$0xff] }
 0xea2   : > { %v6781_v4 = vpop.eup %6780 }
 0xea3   : > { %v6783_v37 = vpop.eup %6782  ;;  %v3273_v40 = vmul.f32 %v6781_v4, %v10428_v16  ;;  %v10444_v4 = vld [vmem:[#allocation67_spill] sm:$0xff] }
 0xea4   : > { %4399 = vrot.lane.b32.xlu0 %v4363_v10, %s6948_s9  ;;  %v2728_v10 = vmul.f32 %v6777_v13, %v10426_v1  ;;  %v6785_v24 = vpop.eup %6784  ;;  %v3821_v46 = vmul.f32 %v6783_v37, %v10430_v6  ;;  %v10446_v37 = vld [vmem:[#allocation99_spill] sm:$0xff] }
 0xea5   : > { %1674 = vrot.lane.b32.xlu1 %v1633_v31, %s6943_s28  ;;  %v3276_v31 = vmul.f32 %v6779_v39, %v10427_v23  ;;  %v6787_v55 = vpop.eup %6786  ;;  %v3275_v28 = vmul.f32 %v6785_v24, %v10432_v12  ;;  %v10443_v39 = vld [vmem:[#allocation42_spill] sm:$0xff]  ;;  %v10445_v23 = vld [vmem:[#allocation43_spill] sm:$0xff] }
 0xea6   : > { %v10450_v12 = vld [vmem:[#allocation130_spill] sm:$0xff] }
 0xea8   : > { %4403 = vrot.lane.b32.xlu0 %v4365_v51, %s6948_s9  ;;  %v9651_v51 = vpop.xlane.xlu1 %4206 }
 0xea9   : > { %1678 = vrot.lane.b32.xlu1 %v1635_v54, %s6943_s28  ;;  %v10429_v54 = vld [vmem:[#allocation94_spill] sm:$0xff] }
 0xeaa   : > { %6798 = vrcp.f32 %v10429_v54 }
 0xeab   : > { %6800 = vrcp.f32 %v10431_v7 }
 0xeac   : > { %1672 = vrot.lane.b32.xlu0 %v1632_v48, %s6943_s28  ;;  %6802 = vrcp.f32 %v4203_v5 }
 0xead   : > { %2221 = vrot.lane.b32.xlu1 %v2180_v14, %s6944_s29 }
 0xeb0   : > { %1676 = vrot.lane.b32.xlu0 %v1634_v9, %s6943_s28  ;;  %v10433_v9 = vld [vmem:[#allocation37_spill] sm:$0xff] }
 0xeb1   : > { %2225 = vrot.lane.b32.xlu1 %v2182_v20, %s6944_s29  ;;  %6804 = vrcp.f32 %v10433_v9 }
 0xeb2   : > { %6806 = vrcp.f32 %v9304_v2  ;;  %v10437_v2 = vld [vmem:[#allocation105_spill] sm:$0xff] }
 0xeb4   : > { %2219 = vrot.lane.b32.xlu0 %v2179_v27, %s6944_s29 }
 0xeb5   : > { %2768 = vrot.lane.b32.xlu1 %v2727_v18, %s6945_s30  ;;  %v10436_v18 = vld [vmem:[#allocation103_spill] sm:$0xff] }
 0xeb8   : > { %2223 = vrot.lane.b32.xlu0 %v2181_v49, %s6944_s29 }
 0xeb9   : > { %2772 = vrot.lane.b32.xlu1 %v2729_v15, %s6945_s30  ;;  %v10440_v15 = vld [vmem:[#allocation127_spill] sm:$0xff] }
 0xebc   : > { %2766 = vrot.lane.b32.xlu0 %v2726_v45, %s6945_s30 }
 0xebd   : > { %3315 = vrot.lane.b32.xlu1 %v3274_v61, %s6946_s7 }
 0xebf   : > { %v4654_v50 = vpop.xlane.xlu0 %4653 }
 0xec0   : > { %2770 = vrot.lane.b32.xlu0 %v2728_v10, %s6945_s30  ;;  %v4683_v60 = vsub.f32 %v9432_v8, %v4654_v50  ;;  %v6789_v8 = vpop.eup %6788 }
 0xec1   : > { %3319 = vrot.lane.b32.xlu1 %v3276_v31, %s6946_s7  ;;  %v6791_v33 = vpop.eup %6790  ;;  %v3820_v27 = vmul.f32 %v6789_v8, %v10435_v0 }
 0xec2   : > { %v4701_v53 = vmul.f32 1.442695, %v4683_v60  ;;  %v6793_v63 = vpop.eup %6792  ;;  %v4368_v34 = vmul.f32 %v6791_v33, %v10436_v18  ;;  %v10447_v60 = vld [vmem:[#allocation104_spill] sm:$0xff]  ;;  %v10453_v33 = vld [vmem:[#allocation39_spill] sm:$0xff] }
 0xec3   : > { %v4650_v29 = vpop.xlane.xlu0 %4649  ;;  %v6795_v19 = vpop.eup %6794  ;;  %v3822_v45 = vmul.f32 %v6793_v63, %v10441_v32 }
 0xec4   : > { %v4681_v48 = vsub.f32 %v9437_v42, %v4650_v29  ;;  %3313 = vrot.lane.b32.xlu0 %v3273_v40, %s6946_s7  ;;  %v3823_v42 = vmul.f32 %v6787_v55, %v10434_v59  ;;  %v6797_v13 = vpop.eup %6796  ;;  %v4370_v1 = vmul.f32 %v6795_v19, %v10443_v39  ;;  %v10448_v55 = vld [vmem:[#allocation62_spill] sm:$0xff]  ;;  %v10452_v59 = vld [vmem:[#allocation76_spill] sm:$0xff] }
 0xec5   : > { %3862 = vrot.lane.b32.xlu1 %v3821_v46, %s6947_s8  ;;  %v4652_v57 = vpop.xlane.xlu1 %4651  ;;  %v6799_v10 = vpop.eup %6798  ;;  %v4367_v29 = vmul.f32 %v6797_v13, %v10447_v60  ;;  %v10455_v19 = vld [vmem:[#allocation68_spill] sm:$0xff] }
 0xec6   : > { %v4697_v3 = vmul.f32 1.442695, %v4681_v48  ;;  %v4682_v14 = vsub.f32 %v9442_v52, %v4652_v57  ;;  %v6801_v24 = vpop.eup %6800  ;;  %v1637_v48 = vmul.f32 %v6799_v10, %v10448_v55  ;;  %v10449_v57 = vld [vmem:[#allocation46_spill] sm:$0xff]  ;;  %v10461_v55 = vld [vmem:[#allocation91_spill] sm:$0xff] }
 0xec7   : > { %v4656_v36 = vpop.xlane.xlu0 %4655  ;;  %v6803_v6 = vpop.eup %6802 }
 0xec8   : > { %v4699_v20 = vmul.f32 1.442695, %v4682_v14  ;;  %v4684_v30 = vsub.f32 %v9447_v35, %v4656_v36  ;;  %3317 = vrot.lane.b32.xlu0 %v3275_v28, %s6946_s7  ;;  %6808 = vpow2.f32 %v4697_v3  ;;  %v10438_v35 = vld [vmem:[#allocation102_spill] sm:$0xff]  ;;  %v6805_v7 = vpop.eup %6804 }
 0xec9   : > { %3866 = vrot.lane.b32.xlu1 %v3823_v42, %s6947_s8  ;;  %v4662_v52 = vpop.xlane.xlu1 %4661  ;;  %v6807_v14 = vpop.eup %6806 }
 0xeca   : > { %6810 = vpow2.f32 %v4699_v20  ;;  %v4703_v5 = vmul.f32 1.442695, %v4684_v30  ;;  %v4687_v49 = vsub.f32 %v10438_v35, %v4662_v52  ;;  %v4369_v20 = vmul.f32 %v6803_v6, %v10453_v33 }
 0xecb   : > { %6812 = vpow2.f32 %v4701_v53  ;;  %v4664_v41 = vpop.xlane.xlu0 %4663  ;;  %v10451_v53 = vld [vmem:[#allocation101_spill] sm:$0xff] }
 0xecc   : > { %6814 = vpow2.f32 %v4703_v5  ;;  %v4688_v47 = vsub.f32 %v10437_v2, %v4664_v41  ;;  %3860 = vrot.lane.b32.xlu0 %v3820_v27, %s6947_s8  ;;  %v4709_v16 = vmul.f32 1.442695, %v4687_v49  ;;  %v10454_v5 = vld [vmem:[#allocation61_spill] sm:$0xff] }
 0xecd   : > { %4409 = vrot.lane.b32.xlu1 %v4368_v34, %s6948_s9  ;;  %v4658_v62 = vpop.xlane.xlu1 %4657  ;;  %6816 = vrcp.f32 %v10439_v26  ;;  %v1639_v0 = vmul.f32 %v6801_v24, %v10454_v5 }
 0xece   : > { %v4711_v22 = vmul.f32 1.442695, %v4688_v47  ;;  %v4685_v21 = vsub.f32 %v10440_v15, %v4658_v62  ;;  %6818 = vrcp.f32 %v10442_v43  ;;  %v10457_v15 = vld [vmem:[#allocation93_spill] sm:$0xff]  ;;  %v10458_v43 = vld [vmem:[#allocation75_spill] sm:$0xff] }
 0xecf   : > { %v4660_v61 = vpop.xlane.xlu0 %4659  ;;  %6820 = vrcp.f32 %v10444_v4 }
 0xed0   : > { %v4705_v50 = vmul.f32 1.442695, %v4685_v21  ;;  %v4686_v31 = vsub.f32 %v10445_v23, %v4660_v61  ;;  %3864 = vrot.lane.b32.xlu0 %v3822_v45, %s6947_s8  ;;  %6822 = vrcp.f32 %v10446_v37  ;;  %v2184_v21 = vmul.f32 %v6805_v7, %v10457_v15 }
 0xed1   : > { %4413 = vrot.lane.b32.xlu1 %v4370_v1, %s6948_s9  ;;  %v4670_v40 = vpop.xlane.xlu1 %4669  ;;  %6824 = vpow2.f32 %v4711_v22 }
 0xed2   : > { %v4707_v54 = vmul.f32 1.442695, %v4686_v31  ;;  %6826 = vpow2.f32 %v4705_v50  ;;  %v4691_v28 = vsub.f32 %v10450_v12, %v4670_v40  ;;  %v10459_v50 = vld [vmem:[#allocation59_spill] sm:$0xff] }
 0xed3   : > { %v4672_v46 = vpop.xlane.xlu0 %4671 }
 0xed4   : > { %6828 = vpow2.f32 %v4707_v54  ;;  %v4692_v3 = vsub.f32 %v10449_v57, %v4672_v46  ;;  %4407 = vrot.lane.b32.xlu0 %v4367_v29, %s6948_s9  ;;  %v4717_v2 = vmul.f32 1.442695, %v4691_v28 }
 0xed5   : > { %6830 = vpow2.f32 %v4709_v16  ;;  %1682 = vrot.lane.b32.xlu1 %v1637_v48, %s6943_s28  ;;  %v4666_v8 = vpop.xlane.xlu1 %4665  ;;  %v9692_v9 = vpop.eup %6808 }
 0xed6   : > { %6832 = vrcp.f32 %v10451_v53  ;;  %v4719_v36 = vmul.f32 1.442695, %v4692_v3  ;;  %v4689_v42 = vsub.f32 %v10452_v59, %v4666_v8  ;;  %v10462_v3 = vld [vmem:[#allocation125_spill] sm:$0xff]  ;;  %v10463_v53 = vld [vmem:[#allocation90_spill] sm:$0xff] }
 0xed7   : > { %v9697_v30 = vpop.eup %6810  ;;  %v4668_v52 = vpop.xlane.xlu0 %4667  ;;  %6834 = vrcp.f32 %v10455_v19 }
 0xed8   : > { %v9700_v27 = vpop.eup %6812  ;;  %v4713_v63 = vmul.f32 1.442695, %v4689_v42  ;;  %v4690_v41 = vsub.f32 %v9487_v56, %v4668_v52  ;;  %4411 = vrot.lane.b32.xlu0 %v4369_v20, %s6948_s9  ;;  %v4761_v18 = vpack.c.bf16 %v9697_v30, %v9692_v9  ;;  %6836 = vpow2.f32 %v4719_v36  ;;  %v10456_v56 = vld [vmem:[#allocation60_spill] sm:$0xff] }
 0xed9   : > { %v9706_v34 = vpop.eup %6814  ;;  %1686 = vrot.lane.b32.xlu1 %v1639_v0, %s6943_s28  ;;  %v4678_v47 = vpop.xlane.xlu1 %4677  ;;  %v1636_v62 = vmul.f32 %v6807_v14, %v10456_v56  ;;  %v10464_v0 = vld [vmem:[#allocation123_spill] sm:$0xff] }
 0xeda   : > { %v4762_v35 = vpack.c.bf16 %v9706_v34, %v9700_v27  ;;  %v4715_v49 = vmul.f32 1.442695, %v4690_v41  ;;  %6246 = vmatprep.mubr.bf16.mxu1 %v4761_v18  ;;  %v6817_v26 = vpop.eup %6816  ;;  %6838 = vpow2.f32 %v4713_v63  ;;  %v4695_v61 = vsub.f32 %v10458_v43, %v4678_v47 }
 0xedb   : > { %v4680_v22 = vpop.xlane.xlu0 %4679  ;;  %v6819_v32 = vpop.eup %6818  ;;  %v1638_v23 = vmul.f32 %v6817_v26, %v10459_v50 }
 0xedc   : > { %6840 = vpow2.f32 %v4715_v49  ;;  %v4696_v45 = vsub.f32 %v9497_v38, %v4680_v22  ;;  %1680 = vrot.lane.b32.xlu0 %v1636_v62, %s6943_s28  ;;  %6247 = vmatmul.mubr.bf16.vlgmr.msra.gmra.mxu1 %v4762_v35  ;;  %v6821_v13 = vpop.eup %6820  ;;  %v10460_v38 = vld [vmem:[#allocation92_spill] sm:$0xff]  ;;  %v4725_v29 = vmul.f32 1.442695, %v4695_v61 }
 0xedd   : > { %6842 = vpow2.f32 %v4717_v2  ;;  %2229 = vrot.lane.b32.xlu1 %v2184_v21, %s6944_s29  ;;  %v4674_v39 = vpop.xlane.xlu1 %4673  ;;  %v6823_v1 = vpop.eup %6822  ;;  %v2186_v16 = vmul.f32 %v6819_v32, %v10460_v38  ;;  %v2731_v14 = vmul.f32 %v6821_v13, %v10462_v3 }
 0xede   : > { %v4727_v10 = vmul.f32 1.442695, %v4696_v45  ;;  %v4693_v4 = vsub.f32 %v9503_v58, %v4674_v39  ;;  %v9720_v31 = vpop.eup %6824  ;;  %v2183_v48 = vmul.f32 %v6823_v1, %v10461_v55  ;;  %v10466_v55 = vld [vmem:[#allocation38_spill] sm:$0xff] }
 0xedf   : > { %v4676_v37 = vpop.xlane.xlu0 %4675  ;;  %v9723_v40 = vpop.eup %6826 }
 0xee0   : > { %v4721_v24 = vmul.f32 1.442695, %v4693_v4  ;;  %v4694_v54 = vsub.f32 %v9508_v17, %v4676_v37  ;;  %1684 = vrot.lane.b32.xlu0 %v1638_v23, %s6943_s28  ;;  %6844 = vpow2.f32 %v4727_v10 }
 0xee1   : > { %v9727_v60 = vpop.eup %6828  ;;  %2233 = vrot.lane.b32.xlu1 %v2186_v16, %s6944_s29  ;;  %v3847_v58 = vpop.permute.xlu1 %3846 }
 0xee2   : > { %v9730_v6 = vpop.eup %6830  ;;  %v4723_v46 = vmul.f32 1.442695, %v4694_v54  ;;  %3894 = vst.msk [vmem:[#allocation2 + $0x8] sm:$0xff] %vm3892_vm7, %v3847_v58  ;;  %v4763_v7 = vpack.c.bf16 %v9727_v60, %v9723_v40  ;;  %6846 = vpow2.f32 %v4721_v24  ;;  %v10465_v58 = vld [vmem:[#allocation35_spill] sm:$0xff] }
 0xee3   : > { %v6833_v17 = vpop.eup %6832  ;;  %v3845_v57 = vpop.permute.xlu0 %3844  ;;  %v4764_v12 = vpack.c.bf16 %v9720_v31, %v9730_v6 }
 0xee4   : > { %6848 = vpow2.f32 %v4723_v46  ;;  %3893 = vst.msk [vmem:[#allocation2] sm:$0xff] %vm3892_vm7, %v3845_v57  ;;  %2227 = vrot.lane.b32.xlu0 %v2183_v48, %s6944_s29  ;;  %6250 = vmatprep.mubr.bf16.mxu1 %v4763_v7  ;;  %v6835_v8 = vpop.eup %6834  ;;  %v2185_v36 = vmul.f32 %v6833_v17, %v10463_v53  ;;  %v10467_v7 = vld [vmem:[#allocation100_spill] sm:$0xff]  ;;  %v10468_v57 = vld [vmem:[#allocation66_spill] sm:$0xff] }
 0xee5   : > { %6850 = vpow2.f32 %v4725_v29  ;;  %2776 = vrot.lane.b32.xlu1 %v2731_v14, %s6945_s30  ;;  %6251 = vmatmul.mubr.bf16.gmra.mxu1 %v4764_v12  ;;  %v3851_v28 = vpop.permute.xlu1 %3850  ;;  %v9744_v59 = vpop.eup %6836  ;;  %v2730_v63 = vmul.f32 %v6835_v8, %v10464_v0  ;;  %v10469_v14 = vld [vmem:[#allocation126_spill] sm:$0xff]  ;;  %v10474_v0 = vld [vmem:[#allocation72_spill] sm:$0xff] }
 0xee6   : > { %3896 = vst.msk [vmem:[#allocation2 + $0x18] sm:$0xff] %vm3892_vm7, %v3851_v28  ;;  %6852 = vrcp.f32 %v10465_v58  ;;  %v10470_v28 = vld [vmem:[#allocation98_spill] sm:$0xff]  ;;  %v10485_v58 = vld [vmem:[#allocation161_spill] sm:$0xff] }
 0xee7   : > { %v3849_v42 = vpop.permute.xlu0 %3848  ;;  %v9746_v33 = vpop.eup %6838  ;;  %6854 = vrcp.f32 %v10466_v55 }
 0xee8   : > { %3895 = vst.msk [vmem:[#allocation2 + $0x10] sm:$0xff] %vm3892_vm7, %v3849_v42  ;;  %2231 = vrot.lane.b32.xlu0 %v2185_v36, %s6944_s29  ;;  %6856 = vrcp.f32 %v10467_v7  ;;  %v10471_v36 = vld [vmem:[#allocation40_spill] sm:$0xff]  ;;  %v10472_v42 = vld [vmem:[#allocation41_spill] sm:$0xff] }
 0xee9   : > { %v9750_v20 = vpop.eup %6840  ;;  %v4394_v52 = vpop.permute.xlu1 %4393  ;;  %6858 = vrcp.f32 %v10468_v57  ;;  %v10486_v7 = vld [vmem:[#allocation129_spill] sm:$0xff] }
 0xeea   : > { %v9752_v5 = vpop.eup %6842  ;;  %4441 = vst.msk [vmem:[#allocation2 + $0x8] sm:$0xff] %vm4439_vm8, %v4394_v52  ;;  %v4765_v41 = vpack.c.bf16 %v9750_v20, %v9746_v33  ;;  %6860 = vrcp.f32 %v10469_v14 }
 0xeeb   : > { %v4392_v18 = vpop.permute.xlu0 %4391  ;;  %v4766_v19 = vpack.c.bf16 %v9744_v59, %v9752_v5  ;;  %6862 = vrcp.f32 %v10470_v28 }
 0xeec   : > { %4440 = vst.msk [vmem:[#allocation2] sm:$0xff] %vm4439_vm8, %v4392_v18  ;;  %2774 = vrot.lane.b32.xlu0 %v2730_v63, %s6945_s30  ;;  %6254 = vmatprep.mubr.bf16.mxu1 %v4765_v41  ;;  %6864 = vrcp.f32 %v10471_v36  ;;  %v10475_v18 = vld [vmem:[#allocation150_spill] sm:$0xff] }
 0xeed   : > { %6255 = vmatmul.mubr.bf16.gmra.mxu1 %v4766_v19  ;;  %v4398_v2 = vpop.permute.xlu1 %4397  ;;  %v9763_v47 = vpop.eup %6844  ;;  %6866 = vrcp.f32 %v10472_v42 }
 0xeee   : > { %4443 = vst.msk [vmem:[#allocation2 + $0x18] sm:$0xff] %vm4439_vm8, %v4398_v2  ;;  %6868 = vrcp.f32 %v10474_v0  ;;  %v6399_v0 = vld [vmem:[%s10006_s4] sm:$0xff]  }
 0xeef   : > { %v4396_v35 = vpop.permute.xlu0 %4395  ;;  %v9765_v49 = vpop.eup %6846  ;;  %6870 = vrcp.f32 %v9640_v11 }
 0xef0   : > { %4442 = vst.msk [vmem:[#allocation2 + $0x10] sm:$0xff] %vm4439_vm8, %v4396_v35  ;;  %v10476_v35 = vld [vmem:[#allocation71_spill] sm:$0xff] }
 0xef1   : > { %v9768_v56 = vpop.eup %6848  ;;  %v1667_v62 = vpop.permute.xlu1 %1666  ;;  %6872 = vrcp.f32 %v10476_v35 }
 0xef2   : > { %v9770_v26 = vpop.eup %6850  ;;  %1710 = vst.msk [vmem:[#allocation2 + $0x28] sm:$0xff] %vm1704_vm3, %v1667_v62  ;;  %v4767_v22 = vpack.c.bf16 %v9768_v56, %v9765_v49  ;;  %6874 = vrcp.f32 %v9651_v51 }
 0xef3   : > { %v1665_v15 = vpop.permute.xlu0 %1664  ;;  %v4768_v21 = vpack.c.bf16 %v9763_v47, %v9770_v26  ;;  %v6853_v8 = vpop.eup %6852 }
 0xef4   : > { %1709 = vst.msk [vmem:[#allocation2 + $0x20] sm:$0xff] %vm1704_vm3, %v1665_v15  ;;  %6258 = vmatprep.mubr.bf16.mxu1 %v4767_v22  ;;  %v6855_v52 = vpop.eup %6854  ;;  %v10478_v22 = vld [vmem:[#allocation149_spill] sm:$0xff] }
 0xef5   : > { %6259 = vmatmul.mubr.bf16.gmra.mxu1 %v4768_v21  ;;  %v1671_v32 = vpop.permute.xlu1 %1670  ;;  %v6857_v41 = vpop.eup %6856  ;;  %v3278_v19 = vmul.f32 %v6855_v52, %v10475_v18 }
 0xef6   : > { %1712 = vst.msk [vmem:[#allocation2 + $0x38] sm:$0xff] %vm1704_vm3, %v1671_v32  ;;  %v6859_v2 = vpop.eup %6858 }
 0xef7   : > { %v1669_v45 = vpop.permute.xlu0 %1668  ;;  %v3280_v11 = vmul.f32 %v6859_v2, %v10478_v22 }
 0xef8   : > { %1711 = vst.msk [vmem:[#allocation2 + $0x30] sm:$0xff] %vm1704_vm3, %v1669_v45  ;;  %v10479_v45 = vld [vmem:[#allocation148_spill] sm:$0xff] }
 0xef9   : > { %v2214_v13 = vpop.permute.xlu1 %2213 }
 0xefa   : > { %2257 = vst.msk [vmem:[#allocation2 + $0x28] sm:$0xff] %vm2251_vm4, %v2214_v13 }
 0xefb   : > { %v2212_v43 = vpop.permute.xlu0 %2211 }
 0xefc   : > { %2256 = vst.msk [vmem:[#allocation2 + $0x20] sm:$0xff] %vm2251_vm4, %v2212_v43 }
 0xefd   : > { %v2218_v61 = vpop.permute.xlu1 %2217 }
 0xefe   : > { %2259 = vst.msk [vmem:[#allocation2 + $0x38] sm:$0xff] %vm2251_vm4, %v2218_v61  ;;  %v10480_v61 = vld [vmem:[#allocation164_spill] sm:$0xff] }
 0xeff   : > { %v2216_v39 = vpop.permute.xlu0 %2215 }
 0xf00   : > { %2258 = vst.msk [vmem:[#allocation2 + $0x30] sm:$0xff] %vm2251_vm4, %v2216_v39 }
 0xf01   : > { %v2761_v1 = vpop.permute.xlu1 %2760 }
 0xf02   : > { %2804 = vst.msk [vmem:[#allocation2 + $0x28] sm:$0xff] %vm2798_vm5, %v2761_v1 }
 0xf03   : > { %v2759_v10 = vpop.permute.xlu0 %2758 }
 0xf04   : > { %2803 = vst.msk [vmem:[#allocation2 + $0x20] sm:$0xff] %vm2798_vm5, %v2759_v10 }
 0xf05   : > { %v2765_v4 = vpop.permute.xlu1 %2764 }
 0xf06   : > { %2806 = vst.msk [vmem:[#allocation2 + $0x38] sm:$0xff] %vm2798_vm5, %v2765_v4 }
 0xf07   : > { %v2763_v50 = vpop.permute.xlu0 %2762 }
 0xf08   : > { %2805 = vst.msk [vmem:[#allocation2 + $0x30] sm:$0xff] %vm2798_vm5, %v2763_v50  ;;  %v10481_v50 = vld [vmem:[#allocation147_spill] sm:$0xff] }
 0xf09   : > { %4733 = vadd.xlane.f32.xlu1 %v9700_v27  ;;  %v3308_v23 = vpop.permute.xlu1 %3307 }
 0xf0a   : > { %3351 = vst.msk [vmem:[#allocation2 + $0x28] sm:$0xff] %vm3345_vm6, %v3308_v23 }
 0xf0b   : > { %v3306_v37 = vpop.permute.xlu0 %3305  ;;  %4735 = vadd.xlane.f32.xlu0 %v9706_v34 }
 0xf0c   : > { %3350 = vst.msk [vmem:[#allocation2 + $0x20] sm:$0xff] %vm3345_vm6, %v3306_v37  ;;  %v10482_v37 = vld [vmem:[#allocation163_spill] sm:$0xff] }
 0xf0d   : > { %4729 = vadd.xlane.f32.xlu1 %v9692_v9  ;;  %v3312_v38 = vpop.permute.xlu1 %3311 }
 0xf0e   : > { %3353 = vst.msk [vmem:[#allocation2 + $0x38] sm:$0xff] %vm3345_vm6, %v3312_v38 }
 0xf0f   : > { %v3310_v16 = vpop.permute.xlu0 %3309  ;;  %4731 = vadd.xlane.f32.xlu0 %v9697_v30 }
 0xf10   : > { %3352 = vst.msk [vmem:[#allocation2 + $0x30] sm:$0xff] %vm3345_vm6, %v3310_v16 }
 0xf11   : > { %4741 = vadd.xlane.f32.xlu1 %v9730_v6  ;;  %v3855_v27 = vpop.permute.xlu1 %3854 }
 0xf12   : > { %3898 = vst.msk [vmem:[#allocation2 + $0x28] sm:$0xff] %vm3892_vm7, %v3855_v27 }
 0xf13   : > { %v3853_v24 = vpop.permute.xlu0 %3852  ;;  %4743 = vadd.xlane.f32.xlu0 %v9720_v31 }
 0xf14   : > { %3897 = vst.msk [vmem:[#allocation2 + $0x20] sm:$0xff] %vm3892_vm7, %v3853_v24 }
 0xf15   : > { %4737 = vadd.xlane.f32.xlu1 %v9723_v40  ;;  %v3859_v9 = vpop.permute.xlu1 %3858 }
 0xf16   : > { %3900 = vst.msk [vmem:[#allocation2 + $0x38] sm:$0xff] %vm3892_vm7, %v3859_v9  ;;  %v10483_v9 = vld [vmem:[#allocation162_spill] sm:$0xff] }
 0xf17   : > { %v3857_v34 = vpop.permute.xlu0 %3856  ;;  %4739 = vadd.xlane.f32.xlu0 %v9727_v60 }
 0xf18   : > { %3899 = vst.msk [vmem:[#allocation2 + $0x30] sm:$0xff] %vm3892_vm7, %v3857_v34 }
 0xf19   : > { %4749 = vadd.xlane.f32.xlu1 %v9752_v5  ;;  %v4402_v30 = vpop.permute.xlu1 %4401 }
 0xf1a   : > { %4445 = vst.msk [vmem:[#allocation2 + $0x28] sm:$0xff] %vm4439_vm8, %v4402_v30 }
 0xf1b   : > { %v4400_v54 = vpop.permute.xlu0 %4399  ;;  %4751 = vadd.xlane.f32.xlu0 %v9744_v59 }
 0xf1c   : > { %4444 = vst.msk [vmem:[#allocation2 + $0x20] sm:$0xff] %vm4439_vm8, %v4400_v54  ;;  %v10484_v54 = vld [vmem:[#allocation128_spill] sm:$0xff] }
 0xf1d   : > { %4745 = vadd.xlane.f32.xlu1 %v9746_v33  ;;  %v4406_v31 = vpop.permute.xlu1 %4405  ;;  %v10473_v33 = vld [vmem:[#allocation124_spill] sm:$0xff] }
 0xf1e   : > { %4447 = vst.msk [vmem:[#allocation2 + $0x38] sm:$0xff] %vm4439_vm8, %v4406_v31 }
 0xf1f   : > { %v4404_v40 = vpop.permute.xlu0 %4403  ;;  %4747 = vadd.xlane.f32.xlu0 %v9750_v20  ;;  %v2733_v20 = vmul.f32 %v6853_v8, %v10473_v33 }
 0xf20   : > { %4446 = vst.msk [vmem:[#allocation2 + $0x30] sm:$0xff] %vm4439_vm8, %v4404_v40 }
 0xf21   : > { %4757 = vadd.xlane.f32.xlu1 %v9770_v26  ;;  %v1675_v60 = vpop.permute.xlu1 %1674  ;;  %v6861_v26 = vpop.eup %6860 }
 0xf22   : > { %1714 = vst.msk [vmem:[#allocation2 + $0x48] sm:$0xff] %vm1704_vm3, %v1675_v60  ;;  %v6863_v15 = vpop.eup %6862  ;;  %v3277_v13 = vmul.f32 %v6861_v26, %v10479_v45  ;;  %v6398_v60 = vld [vmem:[%s10006_s4 + $0x8] sm:$0xff]  }
 0xf23   : > { %v1673_v29 = vpop.permute.xlu0 %1672  ;;  %4759 = vadd.xlane.f32.xlu0 %v9763_v47  ;;  %v6865_v43 = vpop.eup %6864  ;;  %v3825_v39 = vmul.f32 %v6863_v15, %v10480_v61  ;;  %6262 = vmatprep.subr.bf16.mxu1 %v6398_v60 }
 0xf24   : > { %1713 = vst.msk [vmem:[#allocation2 + $0x40] sm:$0xff] %vm1704_vm3, %v1673_v29  ;;  %v6867_v1 = vpop.eup %6866  ;;  %v3279_v23 = vmul.f32 %v6865_v43, %v10481_v50  ;;  %6263 = vmatpush3.bf16.msra.mxu1 %v6398_v60 }
 0xf25   : > { %4753 = vadd.xlane.f32.xlu1 %v9765_v49  ;;  %v1679_v6 = vpop.permute.xlu1 %1678  ;;  %v6869_v51 = vpop.eup %6868  ;;  %v3827_v38 = vmul.f32 %v6867_v1, %v10482_v37  ;;  %6264 = vmatprep.subr.bf16.mxu1 %v6399_v0 }
 0xf26   : > { %1716 = vst.msk [vmem:[#allocation2 + $0x58] sm:$0xff] %vm1704_vm3, %v1679_v6  ;;  %v6871_v16 = vpop.eup %6870  ;;  %v3824_v34 = vmul.f32 %v6869_v51, %v10483_v9 }
 0xf27   : > { %v1677_v46 = vpop.permute.xlu0 %1676  ;;  %4755 = vadd.xlane.f32.xlu0 %v9768_v56  ;;  %v10477_v56 = vld [vmem:[#allocation122_spill] sm:$0xff]  ;;  %v6873_v30 = vpop.eup %6872  ;;  %v4372_v31 = vmul.f32 %v6871_v16, %v10484_v54 }
 0xf28   : > { %1715 = vst.msk [vmem:[#allocation2 + $0x50] sm:$0xff] %vm1704_vm3, %v1677_v46  ;;  %v2732_v62 = vmul.f32 %v6857_v41, %v10477_v56  ;;  %v3826_v6 = vmul.f32 %v6873_v30, %v10485_v58  ;;  %v6875_v46 = vpop.eup %6874  ;;  %6265 = vmatpush3.bf16.msra.mxu1 %v6399_v0 }
 0xf29   : > { %v2222_v48 = vpop.permute.xlu1 %2221 }
 0xf2a   : > { %2261 = vst.msk [vmem:[#allocation2 + $0x48] sm:$0xff] %vm2251_vm4, %v2222_v48 }
 0xf2b   : > { %v2220_v17 = vpop.permute.xlu0 %2219 }
 0xf2c   : > { %2260 = vst.msk [vmem:[#allocation2 + $0x40] sm:$0xff] %vm2251_vm4, %v2220_v17  ;;  %v4371_v17 = vmul.f32 %v6875_v46, %v10486_v7 }
 0xf2d   : > { %v2226_v3 = vpop.permute.xlu1 %2225 }
 0xf2e   : > { %2263 = vst.msk [vmem:[#allocation2 + $0x58] sm:$0xff] %vm2251_vm4, %v2226_v3 }
 0xf2f   : > { %v2224_v12 = vpop.permute.xlu0 %2223 }
 0xf30   : > { %2262 = vst.msk [vmem:[#allocation2 + $0x50] sm:$0xff] %vm2251_vm4, %v2224_v12 }
 0xf31   : > { %v2769_v53 = vpop.permute.xlu1 %2768 }
 0xf32   : > { %2808 = vst.msk [vmem:[#allocation2 + $0x48] sm:$0xff] %vm2798_vm5, %v2769_v53 }
 0xf33   : > { %v2767_v59 = vpop.permute.xlu0 %2766 }
 0xf34   : > { %2807 = vst.msk [vmem:[#allocation2 + $0x40] sm:$0xff] %vm2798_vm5, %v2767_v59 }
 0xf35   : > { %v2773_v5 = vpop.permute.xlu1 %2772 }
 0xf36   : > { %2810 = vst.msk [vmem:[#allocation2 + $0x58] sm:$0xff] %vm2798_vm5, %v2773_v5  ;;  %2780 = vrot.lane.b32.xlu1 %v2733_v20, %s6945_s30 }
 0xf37   : > { %v2771_v63 = vpop.permute.xlu0 %2770 }
 0xf38   : > { %2809 = vst.msk [vmem:[#allocation2 + $0x50] sm:$0xff] %vm2798_vm5, %v2771_v63 }
 0xf39   : > { %v3316_v47 = vpop.permute.xlu1 %3315 }
 0xf3a   : > { %3355 = vst.msk [vmem:[#allocation2 + $0x48] sm:$0xff] %vm3345_vm6, %v3316_v47  ;;  %3323 = vrot.lane.b32.xlu1 %v3278_v19, %s6946_s7 }
 0xf3b   : > { %v3314_v49 = vpop.permute.xlu0 %3313 }
 0xf3c   : > { %3354 = vst.msk [vmem:[#allocation2 + $0x40] sm:$0xff] %vm3345_vm6, %v3314_v49 }
 0xf3d   : > { %2778 = vrot.lane.b32.xlu0 %v2732_v62, %s6945_s30  ;;  %v3320_v21 = vpop.permute.xlu1 %3319 }
 0xf3e   : > { %3357 = vst.msk [vmem:[#allocation2 + $0x58] sm:$0xff] %vm3345_vm6, %v3320_v21  ;;  %3327 = vrot.lane.b32.xlu1 %v3280_v11, %s6946_s7 }
 0xf3f   : > { %v3318_v32 = vpop.permute.xlu0 %3317 }
 0xf40   : > { %3356 = vst.msk [vmem:[#allocation2 + $0x50] sm:$0xff] %vm3345_vm6, %v3318_v32 }
 0xf41   : > { %3321 = vrot.lane.b32.xlu0 %v3277_v13, %s6946_s7  ;;  %v3863_v10 = vpop.permute.xlu1 %3862 }
 0xf42   : > { %3902 = vst.msk [vmem:[#allocation2 + $0x48] sm:$0xff] %vm3892_vm7, %v3863_v10  ;;  %3870 = vrot.lane.b32.xlu1 %v3825_v39, %s6947_s8 }
 0xf43   : > { %v3861_v4 = vpop.permute.xlu0 %3860 }
 0xf44   : > { %3901 = vst.msk [vmem:[#allocation2 + $0x40] sm:$0xff] %vm3892_vm7, %v3861_v4 }
 0xf45   : > { %3325 = vrot.lane.b32.xlu0 %v3279_v23, %s6946_s7  ;;  %v3867_v27 = vpop.permute.xlu1 %3866 }
 0xf46   : > { %3904 = vst.msk [vmem:[#allocation2 + $0x58] sm:$0xff] %vm3892_vm7, %v3867_v27  ;;  %3874 = vrot.lane.b32.xlu1 %v3827_v38, %s6947_s8 }
 0xf47   : > { %v3865_v24 = vpop.permute.xlu0 %3864 }
 0xf48   : > { %3903 = vst.msk [vmem:[#allocation2 + $0x50] sm:$0xff] %vm3892_vm7, %v3865_v24 }
 0xf49   : > { %3868 = vrot.lane.b32.xlu0 %v3824_v34, %s6947_s8  ;;  %v4410_v40 = vpop.permute.xlu1 %4409 }
 0xf4a   : > { %4449 = vst.msk [vmem:[#allocation2 + $0x48] sm:$0xff] %vm4439_vm8, %v4410_v40  ;;  %4417 = vrot.lane.b32.xlu1 %v4372_v31, %s6948_s9 }
 0xf4b   : > { %v4408_v29 = vpop.permute.xlu0 %4407 }
 0xf4c   : > { %4448 = vst.msk [vmem:[#allocation2 + $0x40] sm:$0xff] %vm4439_vm8, %v4408_v29 }
 0xf4d   : > { %3872 = vrot.lane.b32.xlu0 %v3826_v6, %s6947_s8  ;;  %v4414_v55 = vpop.permute.xlu1 %4413 }
 0xf4e   : > { %4451 = vst.msk [vmem:[#allocation2 + $0x58] sm:$0xff] %vm4439_vm8, %v4414_v55 }
 0xf4f   : > { %v4412_v48 = vpop.permute.xlu0 %4411 }
 0xf50   : > { %4450 = vst.msk [vmem:[#allocation2 + $0x50] sm:$0xff] %vm4439_vm8, %v4412_v48 }
 0xf51   : > { %4415 = vrot.lane.b32.xlu0 %v4371_v17, %s6948_s9  ;;  %v1683_v57 = vpop.permute.xlu1 %1682 }
 0xf52   : > { %1718 = vst.msk [vmem:[#allocation2 + $0x68] sm:$0xff] %vm1704_vm3, %v1683_v57 }
 0xf53   : > { %v1681_v3 = vpop.permute.xlu0 %1680 }
 0xf54   : > { %1717 = vst.msk [vmem:[#allocation2 + $0x60] sm:$0xff] %vm1704_vm3, %v1681_v3 }
 0xf55   : > { %v1687_v14 = vpop.permute.xlu1 %1686 }
 0xf56   : > { %1720 = vst.msk [vmem:[#allocation2 + $0x78] sm:$0xff] %vm1704_vm3, %v1687_v14 }
 0xf57   : > { %v1685_v12 = vpop.permute.xlu0 %1684 }
 0xf58   : > { %1719 = vst.msk [vmem:[#allocation2 + $0x70] sm:$0xff] %vm1704_vm3, %v1685_v12 }
 0xf59   : > { %v2230_v28 = vpop.permute.xlu1 %2229 }
 0xf5a   : > { %2265 = vst.msk [vmem:[#allocation2 + $0x68] sm:$0xff] %vm2251_vm4, %v2230_v28 }
 0xf5b   : > { %v2228_v8 = vpop.permute.xlu0 %2227 }
 0xf5c   : > { %2264 = vst.msk [vmem:[#allocation2 + $0x60] sm:$0xff] %vm2251_vm4, %v2228_v8 }
 0xf5d   : > { %v2234_v53 = vpop.permute.xlu1 %2233 }
 0xf5e   : > { %2267 = vst.msk [vmem:[#allocation2 + $0x78] sm:$0xff] %vm2251_vm4, %v2234_v53 }
 0xf5f   : > { %v2232_v36 = vpop.permute.xlu0 %2231 }
 0xf60   : > { %2266 = vst.msk [vmem:[#allocation2 + $0x70] sm:$0xff] %vm2251_vm4, %v2232_v36  ;;  %v10487_v36 = vld [vmem:[#allocation70_spill] sm:$0xff] }
 0xf61   : > { %v2777_v59 = vpop.permute.xlu1 %2776 }
 0xf62   : > { %2812 = vst.msk [vmem:[#allocation2 + $0x68] sm:$0xff] %vm2798_vm5, %v2777_v59 }
 0xf63   : > { %v2775_v42 = vpop.permute.xlu0 %2774 }
 0xf64   : > { %2811 = vst.msk [vmem:[#allocation2 + $0x60] sm:$0xff] %vm2798_vm5, %v2775_v42 }
 0xf92   : > { %v4734_v33 = vpop.xlane.xlu1 %4733 }
 0xf93   : > { %6876 = vrcp.f32 %v4734_v33 }
 0xf94   : > { %v4736_v20 = vpop.xlane.xlu0 %4735 }
 0xf95   : > { %6878 = vrcp.f32 %v4736_v20  ;;  %v10488_v20 = vld [vmem:[#allocation73_spill] sm:$0xff] }
 0xf96   : > { %v4730_v52 = vpop.xlane.xlu1 %4729 }
 0xf97   : > { %6880 = vrcp.f32 %v4730_v52 }
 0xf98   : > { %v4732_v5 = vpop.xlane.xlu0 %4731 }
 0xf99   : > { %6882 = vrcp.f32 %v4732_v5 }
 0xf9a   : > { %v4742_v63 = vpop.xlane.xlu1 %4741 }
 0xf9b   : > { %6884 = vrcp.f32 %v4742_v63 }
 0xf9c   : > { %v4744_v41 = vpop.xlane.xlu0 %4743  ;;  %v6248_v18 = vpop.f32.mrf.mxu1 }
 0xf9d   : > { %6886 = vrcp.f32 %v4744_v41 }
 0xf9e   : > { %v4827_v19 = vpop.f32.mrf.mxu1  ;;  %v4738_v2 = vpop.xlane.xlu1 %4737 }
 0xf9f   : > { %6888 = vrcp.f32 %v4738_v2 }
 0xfa0   : > { %v6877_v47 = vpop.eup %6876  ;;  %v4740_v35 = vpop.xlane.xlu0 %4739 }
 0xfa1   : > { %v6249_v49 = vpop.f32.mrf.mxu1  ;;  %v4908_v56 = vmul.f32 %v6877_v47, %v6248_v18  ;;  %6890 = vrcp.f32 %v4740_v35 }
 0xfa2   : > { %v6879_v62 = vpop.eup %6878  ;;  %v4750_v22 = vpop.xlane.xlu1 %4749 }
 0xfa3   : > { %v4830_v26 = vpop.f32.mrf.mxu1  ;;  %v4909_v11 = vmul.f32 %v6879_v62, %v6249_v49  ;;  %6892 = vrcp.f32 %v4750_v22  ;;  %4942 = vrot.lane.b32.xlu0 %v4908_v56, %s6949_s14 }
 0xfa4   : > { %v6881_v15 = vpop.eup %6880  ;;  %v4752_v21 = vpop.xlane.xlu0 %4751 }
 0xfa5   : > { %v4906_v32 = vmul.f32 %v6881_v15, %v4827_v19  ;;  %6894 = vrcp.f32 %v4752_v21  ;;  %v6252_v45 = vpop.f32.mrf.mxu1  ;;  %4944 = vrot.lane.b32.xlu1 %v4909_v11, %s6949_s14 }
 0xfa6   : > { %v6883_v13 = vpop.eup %6882  ;;  %v4746_v43 = vpop.xlane.xlu1 %4745 }
 0xfa7   : > { %v4907_v61 = vmul.f32 %v6883_v13, %v4830_v26  ;;  %6896 = vrcp.f32 %v4746_v43  ;;  %v4843_v39 = vpop.f32.mrf.mxu1  ;;  %4938 = vrot.lane.b32.xlu0 %v4906_v32, %s6949_s14 }
 0xfa8   : > { %v6885_v1 = vpop.eup %6884  ;;  %6898 = vrcp.f32 %v9642_v44  ;;  %v4748_v10 = vpop.xlane.xlu0 %4747 }
 0xfa9   : > { %v4912_v4 = vmul.f32 %v6885_v1, %v6252_v45  ;;  %6900 = vrcp.f32 %v4748_v10  ;;  %v6253_v50 = vpop.f32.mrf.mxu1  ;;  %4940 = vrot.lane.b32.xlu1 %v4907_v61, %s6949_s14 }
 0xfaa   : > { %v6887_v23 = vpop.eup %6886  ;;  %v4758_v51 = vpop.xlane.xlu1 %4757  ;;  %6902 = vrcp.f32 %v9629_v25 }
 0xfab   : > { %v4913_v37 = vmul.f32 %v6887_v23, %v6253_v50  ;;  %v4846_v38 = vpop.f32.mrf.mxu1  ;;  %4950 = vrot.lane.b32.xlu0 %v4912_v4, %s6949_s14 }
 0xfac   : > { %v6889_v16 = vpop.eup %6888  ;;  %v4760_v27 = vpop.xlane.xlu0 %4759 }
 0xfad   : > { %v4910_v24 = vmul.f32 %v6889_v16, %v4843_v39  ;;  %v6256_v9 = vpop.f32.mrf.mxu1  ;;  %4952 = vrot.lane.b32.xlu1 %v4913_v37, %s6949_s14 }
 0xfae   : > { %v6891_v44 = vpop.eup %6890  ;;  %v4754_v34 = vpop.xlane.xlu1 %4753 }
 0xfaf   : > { %v4911_v30 = vmul.f32 %v6891_v44, %v4846_v38  ;;  %6904 = vrcp.f32 %v4754_v34  ;;  %v4859_v54 = vpop.f32.mrf.mxu1  ;;  %4946 = vrot.lane.b32.xlu0 %v4910_v24, %s6949_s14 }
 0xfb0   : > { %v6893_v31 = vpop.eup %6892  ;;  %6906 = vrcp.f32 %v4758_v51  ;;  %v4756_v25 = vpop.xlane.xlu0 %4755 }
 0xfb1   : > { %v4916_v40 = vmul.f32 %v6893_v31, %v6256_v9  ;;  %6908 = vrcp.f32 %v4756_v25  ;;  %v6257_v60 = vpop.f32.mrf.mxu1  ;;  %4948 = vrot.lane.b32.xlu1 %v4911_v30, %s6949_s14 }
 0xfb2   : > { %v6895_v29 = vpop.eup %6894  ;;  %v2781_v58 = vpop.permute.xlu1 %2780  ;;  %6910 = vrcp.f32 %v4760_v27 }
 0xfb3   : > { %v4917_v6 = vmul.f32 %v6895_v29, %v6257_v60  ;;  %2814 = vst.msk [vmem:[#allocation2 + $0x78] sm:$0xff] %vm2798_vm5, %v2781_v58  ;;  %v4862_v46 = vpop.f32.mrf.mxu1  ;;  %4958 = vrot.lane.b32.xlu0 %v4916_v40, %s6949_s14 }
 0xfb4   : > { %v6897_v55 = vpop.eup %6896  ;;  %v2779_v48 = vpop.permute.xlu0 %2778 }
 0xfb5   : > { %v6899_v7 = vpop.eup %6898  ;;  %v4914_v17 = vmul.f32 %v6897_v55, %v4859_v54  ;;  %2813 = vst.msk [vmem:[#allocation2 + $0x70] sm:$0xff] %vm2798_vm5, %v2779_v48  ;;  %v6260_v57 = vpop.f32.mrf.mxu1  ;;  %4960 = vrot.lane.b32.xlu1 %v4917_v6, %s6949_s14 }
 0xfb6   : > { %v6901_v3 = vpop.eup %6900  ;;  %v3324_v14 = vpop.permute.xlu1 %3323  ;;  %v4373_v59 = vmul.f32 %v6899_v7, %v10487_v36  ;;  %v5379_v36 = vld [vmem:[%s10007_s5] ss:$0 sm:$0xff] }
 0xfb7   : > { %v4915_v12 = vmul.f32 %v6901_v3, %v4862_v46  ;;  %3359 = vst.msk [vmem:[#allocation2 + $0x68] sm:$0xff] %vm3345_vm6, %v3324_v14  ;;  %v4875_v28 = vpop.f32.mrf.mxu1  ;;  %4954 = vrot.lane.b32.xlu0 %v4914_v17, %s6949_s14  ;;  %v6903_v8 = vpop.eup %6902 }
 0xfb8   : > { %v3322_v53 = vpop.permute.xlu0 %3321  ;;  %v4374_v52 = vmul.f32 %v6903_v8, %v10488_v20 }
 0xfb9   : > { %3358 = vst.msk [vmem:[#allocation2 + $0x60] sm:$0xff] %vm3345_vm6, %v3322_v53  ;;  %4956 = vrot.lane.b32.xlu1 %v4915_v12, %s6949_s14  ;;  %v6261_v42 = vpop.f32.mrf.mxu1 }
 0xfba   : > { %v3328_v33 = vpop.permute.xlu1 %3327 }
 0xfbb   : > { %3361 = vst.msk [vmem:[#allocation2 + $0x78] sm:$0xff] %vm3345_vm6, %v3328_v33  ;;  %4419 = vrot.lane.b32.xlu0 %v4373_v59, %s6948_s9  ;;  %v4878_v19 = vpop.f32.mrf.mxu1 }
 0xfbc   : > { %v6905_v5 = vpop.eup %6904  ;;  %v3326_v0 = vpop.permute.xlu0 %3325 }
 0xfbd   : > { %v6907_v63 = vpop.eup %6906  ;;  %v4918_v41 = vmul.f32 %v6905_v5, %v4875_v28  ;;  %3360 = vst.msk [vmem:[#allocation2 + $0x70] sm:$0xff] %vm3345_vm6, %v3326_v0  ;;  %4421 = vrot.lane.b32.xlu1 %v4374_v52, %s6948_s9 }
 0xfbe   : > { %v6909_v18 = vpop.eup %6908  ;;  %v3871_v2 = vpop.permute.xlu1 %3870  ;;  %v4920_v56 = vmul.f32 %v6907_v63, %v6260_v57 }
 0xfbf   : > { %v4919_v47 = vmul.f32 %v6909_v18, %v4878_v19  ;;  %3906 = vst.msk [vmem:[#allocation2 + $0x68] sm:$0xff] %vm3892_vm7, %v3871_v2  ;;  %4962 = vrot.lane.b32.xlu0 %v4918_v41, %s6949_s14  ;;  %v6911_v35 = vpop.eup %6910 }
 0xfc0   : > { %v3869_v49 = vpop.permute.xlu0 %3868  ;;  %v4921_v26 = vmul.f32 %v6911_v35, %v6261_v42 }
 0xfc1   : > { %3905 = vst.msk [vmem:[#allocation2 + $0x60] sm:$0xff] %vm3892_vm7, %v3869_v49  ;;  %4964 = vrot.lane.b32.xlu1 %v4919_v47, %s6949_s14 }
 0xfc2   : > { %v3875_v62 = vpop.permute.xlu1 %3874 }
 0xfc3   : > { %3908 = vst.msk [vmem:[#allocation2 + $0x78] sm:$0xff] %vm3892_vm7, %v3875_v62  ;;  %4966 = vrot.lane.b32.xlu0 %v4920_v56, %s6949_s14 }
 0xfc4   : > { %v3873_v22 = vpop.permute.xlu0 %3872 }
 0xfc5   : > { %3907 = vst.msk [vmem:[#allocation2 + $0x70] sm:$0xff] %vm3892_vm7, %v3873_v22  ;;  %4968 = vrot.lane.b32.xlu1 %v4921_v26, %s6949_s14 }
 0xfc6   : > { %v4418_v11 = vpop.permute.xlu1 %4417 }
 0xfc7   : > { %4453 = vst.msk [vmem:[#allocation2 + $0x68] sm:$0xff] %vm4439_vm8, %v4418_v11 }
 0xfc8   : > { %v4416_v15 = vpop.permute.xlu0 %4415 }
 0xfc9   : > { %4452 = vst.msk [vmem:[#allocation2 + $0x60] sm:$0xff] %vm4439_vm8, %v4416_v15 }
0x1015   : > { %v4943_v21 = vpop.permute.xlu0 %4942 }
0x1016   : > { %4989 = vst.msk [vmem:[#allocation2 + $0x10] sm:$0xff] %vm4986_vm9, %v4943_v21 }
0x1017   : > { %v4945_v32 = vpop.permute.xlu1 %4944 }
0x1018   : > { %4990 = vst.msk [vmem:[#allocation2 + $0x18] sm:$0xff] %vm4986_vm9, %v4945_v32 }
0x1019   : > { %v4939_v45 = vpop.permute.xlu0 %4938 }
0x101a   : > { %4987 = vst.msk [vmem:[#allocation2] sm:$0xff] %vm4986_vm9, %v4939_v45 }
0x101b   : > { %v4941_v13 = vpop.permute.xlu1 %4940 }
0x101c   : > { %4988 = vst.msk [vmem:[#allocation2 + $0x8] sm:$0xff] %vm4986_vm9, %v4941_v13 }
0x101d   : > { %v4951_v43 = vpop.permute.xlu0 %4950  ;;  %v5005_v51 = vld [vmem:[#allocation2 + $0x10] sm:$0xff] }
0x101e   : > { %4993 = vst.msk [vmem:[#allocation2 + $0x30] sm:$0xff] %vm4986_vm9, %v4951_v43 }
0x101f   : > { %v4953_v61 = vpop.permute.xlu1 %4952  ;;  %v5006_v1 = vld [vmem:[#allocation2 + $0x18] sm:$0xff] }
0x1020   : > { %4994 = vst.msk [vmem:[#allocation2 + $0x38] sm:$0xff] %vm4986_vm9, %v4953_v61  ;;  %v5020_v38 = vpack.c.bf16 %v5006_v1, %v5005_v51 }
0x1021   : > { %v4947_v39 = vpop.permute.xlu0 %4946  ;;  %v5003_v4 = vld [vmem:[#allocation2] sm:$0xff] }
0x1022   : > { %4991 = vst.msk [vmem:[#allocation2 + $0x20] sm:$0xff] %vm4986_vm9, %v4947_v39 }
0x1023   : > { %v4949_v10 = vpop.permute.xlu1 %4948  ;;  %v5004_v50 = vld [vmem:[#allocation2 + $0x8] sm:$0xff] }
0x1024   : > { %4992 = vst.msk [vmem:[#allocation2 + $0x28] sm:$0xff] %vm4986_vm9, %v4949_v10  ;;  %v5019_v23 = vpack.c.bf16 %v5004_v50, %v5003_v4 }
0x1025   : > { %v4959_v37 = vpop.permute.xlu0 %4958  ;;  %v5009_v54 = vld [vmem:[#allocation2 + $0x30] sm:$0xff] }
0x1026   : > { %4997 = vst.msk [vmem:[#allocation2 + $0x50] sm:$0xff] %vm4986_vm9, %v4959_v37  ;;  %6266 = vmatprep.mubr.msk.bf16.mxu1 %vm348_vm0, %v5019_v23 }
0x1027   : > { %6267 = vmatmul.mubr.msk.bf16.vlgmr.msra.gmra.mxu1 %vm348_vm0, %v5020_v38  ;;  %v4961_v16 = vpop.permute.xlu1 %4960  ;;  %v5010_v24 = vld [vmem:[#allocation2 + $0x38] sm:$0xff] }
0x1028   : > { %4998 = vst.msk [vmem:[#allocation2 + $0x58] sm:$0xff] %vm4986_vm9, %v4961_v16  ;;  %v5022_v25 = vpack.c.bf16 %v5010_v24, %v5009_v54 }
0x1029   : > { %v4955_v27 = vpop.permute.xlu0 %4954  ;;  %v5007_v44 = vld [vmem:[#allocation2 + $0x20] sm:$0xff] }
0x102a   : > { %4995 = vst.msk [vmem:[#allocation2 + $0x40] sm:$0xff] %vm4986_vm9, %v4955_v27 }
0x102b   : > { %v4957_v9 = vpop.permute.xlu1 %4956  ;;  %v5008_v34 = vld [vmem:[#allocation2 + $0x28] sm:$0xff] }
0x102c   : > { %4996 = vst.msk [vmem:[#allocation2 + $0x48] sm:$0xff] %vm4986_vm9, %v4957_v9  ;;  %v5021_v30 = vpack.c.bf16 %v5008_v34, %v5007_v44 }
0x102d   : > { %v4420_v31 = vpop.permute.xlu0 %4419  ;;  %v5013_v48 = vld [vmem:[#allocation2 + $0x50] sm:$0xff] }
0x102e   : > { %4454 = vst.msk [vmem:[#allocation2 + $0x70] sm:$0xff] %vm4439_vm8, %v4420_v31  ;;  %6270 = vmatprep.mubr.msk.bf16.mxu1 %vm348_vm0, %v5021_v30 }
0x102f   : > { %6271 = vmatmul.mubr.msk.bf16.gmra.mxu1 %vm348_vm0, %v5022_v25  ;;  %v4422_v40 = vpop.permute.xlu1 %4421  ;;  %v5014_v29 = vld [vmem:[#allocation2 + $0x58] sm:$0xff] }
0x1030   : > { %4455 = vst.msk [vmem:[#allocation2 + $0x78] sm:$0xff] %vm4439_vm8, %v4422_v40  ;;  %v5024_v17 = vpack.c.bf16 %v5014_v29, %v5013_v48 }
0x1031   : > { %v4963_v60 = vpop.permute.xlu0 %4962  ;;  %v5011_v6 = vld [vmem:[#allocation2 + $0x40] sm:$0xff] }
0x1032   : > { %4999 = vst.msk [vmem:[#allocation2 + $0x60] sm:$0xff] %vm4986_vm9, %v4963_v60 }
0x1033   : > { %v4965_v58 = vpop.permute.xlu1 %4964  ;;  %v5012_v46 = vld [vmem:[#allocation2 + $0x48] sm:$0xff] }
0x1034   : > { %5000 = vst.msk [vmem:[#allocation2 + $0x68] sm:$0xff] %vm4986_vm9, %v4965_v58  ;;  %v5023_v55 = vpack.c.bf16 %v5012_v46, %v5011_v6 }
0x1035   : > { %v4967_v7 = vpop.permute.xlu0 %4966 }
0x1036   : > { %5001 = vst.msk [vmem:[#allocation2 + $0x70] sm:$0xff] %vm4986_vm9, %v4967_v7  ;;  %6274 = vmatprep.mubr.msk.bf16.mxu1 %vm348_vm0, %v5023_v55 }
0x1037   : > { %6275 = vmatmul.mubr.msk.bf16.gmra.mxu1 %vm348_vm0, %v5024_v17  ;;  %v4969_v57 = vpop.permute.xlu1 %4968 }
0x1038   : > { %5002 = vst.msk [vmem:[#allocation2 + $0x78] sm:$0xff] %vm4986_vm9, %v4969_v57 }
0x1039   : > { %v5015_v3 = vld [vmem:[#allocation2 + $0x60] sm:$0xff] }
0x103b   : > { %v5016_v14 = vld [vmem:[#allocation2 + $0x68] sm:$0xff] }
0x103c   : > { %v5025_v12 = vpack.c.bf16 %v5016_v14, %v5015_v3 }
0x103d   : > { %v5017_v28 = vld [vmem:[#allocation2 + $0x70] sm:$0xff] }
0x103e   : > { %6278 = vmatprep.mubr.msk.bf16.mxu1 %vm348_vm0, %v5025_v12 }
0x103f   : > { %v5018_v8 = vld [vmem:[#allocation2 + $0x78] sm:$0xff] }
0x1040   : > { %v5026_v53 = vpack.c.bf16 %v5018_v8, %v5017_v28 }
0x1042   : > { %6279 = vmatmul.mubr.msk.bf16.gmra.mxu1 %vm348_vm0, %v5026_v53 }
0x10e7   : > { %v6268_v59 = vpop.f32.mrf.mxu1 }
0x10e8   : > { %v5117_v42 = vadd.f32 %v6268_v59, %v5379_v36 }
0x10e9   : > { %v5108_v33 = vpop.f32.mrf.mxu1 }
0x10ea   : > { %5173 = vst.msk [vmem:[%s9959_s20 + $0x10] sm:$0xff] %vm348_vm0, %v5117_v42  ;;  %v5109_v20 = vadd.f32 %v5379_v36, %v5108_v33 }
0x10eb   : > { %v6269_v52 = vpop.f32.mrf.mxu1 }
0x10ec   : > { %5171 = vst.msk [vmem:[%s9959_s20] sm:$0xff] %vm348_vm0, %v5109_v20  ;;  %v5120_v5 = vadd.f32 %v6269_v52, %v5379_v36 }
0x10ed   : > { %v5111_v0 = vpop.f32.mrf.mxu1 }
0x10ee   : > { %5174 = vst.msk [vmem:[%s9959_s20 + $0x18] sm:$0xff] %vm348_vm0, %v5120_v5  ;;  %v5112_v63 = vadd.f32 %v5379_v36, %v5111_v0 }
0x10ef   : > { %v6272_v41 = vpop.f32.mrf.mxu1 }
0x10f0   : > { %5172 = vst.msk [vmem:[%s9959_s20 + $0x8] sm:$0xff] %vm348_vm0, %v5112_v63  ;;  %v5133_v18 = vadd.f32 %v6272_v41, %v5379_v36 }
0x10f1   : > { %v5124_v19 = vpop.f32.mrf.mxu1 }
0x10f2   : > { %5177 = vst.msk [vmem:[%s9959_s20 + $0x30] sm:$0xff] %vm348_vm0, %v5133_v18  ;;  %v5125_v2 = vadd.f32 %v5379_v36, %v5124_v19 }
0x10f3   : > { %v6273_v47 = vpop.f32.mrf.mxu1 }
0x10f4   : > { %5175 = vst.msk [vmem:[%s9959_s20 + $0x20] sm:$0xff] %vm348_vm0, %v5125_v2  ;;  %v5136_v35 = vadd.f32 %v6273_v47, %v5379_v36 }
0x10f5   : > { %v5127_v49 = vpop.f32.mrf.mxu1 }
0x10f6   : > { %5178 = vst.msk [vmem:[%s9959_s20 + $0x38] sm:$0xff] %vm348_vm0, %v5136_v35  ;;  %v5128_v56 = vadd.f32 %v5379_v36, %v5127_v49 }
0x10f7   : > { %v6276_v62 = vpop.f32.mrf.mxu1 }
0x10f8   : > { %5176 = vst.msk [vmem:[%s9959_s20 + $0x28] sm:$0xff] %vm348_vm0, %v5128_v56  ;;  %v5149_v26 = vadd.f32 %v6276_v62, %v5379_v36 }
0x10f9   : > { %v5140_v22 = vpop.f32.mrf.mxu1 }
0x10fa   : > { %5181 = vst.msk [vmem:[%s9959_s20 + $0x50] sm:$0xff] %vm348_vm0, %v5149_v26  ;;  %v5141_v11 = vadd.f32 %v5379_v36, %v5140_v22 }
0x10fb   : > { %v6277_v15 = vpop.f32.mrf.mxu1 }
0x10fc   : > { %5179 = vst.msk [vmem:[%s9959_s20 + $0x40] sm:$0xff] %vm348_vm0, %v5141_v11  ;;  %v5152_v21 = vadd.f32 %v6277_v15, %v5379_v36 }
0x10fd   : > { %v5143_v32 = vpop.f32.mrf.mxu1 }
0x10fe   : > { %5182 = vst.msk [vmem:[%s9959_s20 + $0x58] sm:$0xff] %vm348_vm0, %v5152_v21  ;;  %v5144_v45 = vadd.f32 %v5379_v36, %v5143_v32 }
0x1100   : > { %5180 = vst.msk [vmem:[%s9959_s20 + $0x48] sm:$0xff] %vm348_vm0, %v5144_v45 }
0x1102   : > { %v6280_v13 = vpop.f32.mrf.mxu1 }
0x1103   : > { %v5165_v43 = vadd.f32 %v6280_v13, %v5379_v36 }
0x1104   : > { %v5156_v61 = vpop.f32.mrf.mxu1 }
0x1105   : > { %5185 = vst.msk [vmem:[%s9959_s20 + $0x70] sm:$0xff] %vm348_vm0, %v5165_v43  ;;  %v5157_v39 = vadd.f32 %v5379_v36, %v5156_v61 }
0x1106   : > { %v6281_v1 = vpop.f32.mrf.mxu1 }
0x1107   : > { %5183 = vst.msk [vmem:[%s9959_s20 + $0x60] sm:$0xff] %vm348_vm0, %v5157_v39  ;;  %v5168_v10 = vadd.f32 %v6281_v1, %v5379_v36 }
0x1108   : > { %v5159_v4 = vpop.f32.mrf.mxu1 }
0x1109   : > { %5186 = vst.msk [vmem:[%s9959_s20 + $0x78] sm:$0xff] %vm348_vm0, %v5168_v10  ;;  %v5160_v50 = vadd.f32 %v5379_v36, %v5159_v4 }
0x110b   : > { %5184 = vst.msk [vmem:[%s9959_s20 + $0x68] sm:$0xff] %vm348_vm0, %v5160_v50 }
0x110c PF: > { %s16_s23 = sadd.s32 1, %s6934_s23   ;;  %s10489_s21 = smov %s6930_s22 }
0x110d   : > { %p13_p5 = scmp.ge.s32.totalorder %s16_s23, 4   ;;  %s10490_s22 = smov %s10492_s24 }
0x110f   :  { %15 = sbr.rel (!%p13_p5) target bundleno = 2 (0x2), region = 74 }

</bundles_post_ra>
